<compile_context>
chip_gen: v7x
topology: tpu7x:2x2x1
jax: 0.10.0
libtpu: 0.0.40
codegen_flags: <defaults>
</compile_context>

<pallas_src>
import functools

import jax
import jax.numpy as jnp
from jax.experimental import pallas as pl
from jax.experimental.pallas import tpu as pltpu


def _make_relu_gconv_kernel(Bn, H, W, Cg, Cg_out, compute_dtype):
    Hp, Wp = H + 2, W + 2
    M = Bn * H * Wp

    def shift_w(x, kx):
        # x: (Bn, Hp, Wp, Cg) -> xs with xs[..., u, :] = x[..., (u + kx) % Wp, :].
        # Explicit slice+concat (== roll by -kx) keeps the shift semantics unambiguous.
        # Wrapped columns only ever feed the 2 output columns the wrapper crops.
        if kx == 0:
            return x
        return jnp.concatenate([x[:, :, kx:, :], x[:, :, :kx, :]], axis=2)

    def kernel(x_ref, w_ref, o_ref):
        # x_ref: (Bn, 1, Hp, Wp, Cg)   zero-padded pre-ReLU activations of one group
        # w_ref: (1, 9, Cg, Cg_out)    this group's weights, index [ky*3+kx, ci, co]
        # o_ref: (Bn, 1, H, Wp, Cg_out) full-width output (cols >= W cropped by wrapper)
        x = jnp.maximum(x_ref[...], 0.0)                    # ReLU (padding zeros stay 0)
        x = x.astype(compute_dtype).reshape(Bn, Hp, Wp, Cg)
        acc = jnp.zeros((M, Cg_out), dtype=jnp.float32)
        for kx in range(3):
            xs = shift_w(x, kx)                             # one sublane shift, reused over ky
            for ky in range(3):
                patch = xs[:, ky:ky + H].reshape(M, Cg)     # leading-dim slice: free, aligned
                w = w_ref[0, ky * 3 + kx].astype(compute_dtype)
                acc = acc + jnp.dot(patch, w, preferred_element_type=jnp.float32)
        o_ref[...] = acc.reshape(Bn, 1, H, Wp, Cg_out).astype(o_ref.dtype)

    return kernel


def relu_grouped_conv2d(x_nchw, w_oihw, groups, *, batch_block=None,
                        compute_dtype=jnp.float32):
    """ReLU followed by grouped 3x3 conv, stride 1, pad 1, no bias.

    x_nchw: (N, C, H, W); w_oihw: (C_out, C/groups, 3, 3) (PyTorch layout).
    """
    N, C, H, W = x_nchw.shape
    G = groups
    assert C % G == 0
    Cg = C // G
    C_out, Cg_in, kh, kw = w_oihw.shape
    assert (kh, kw) == (3, 3) and Cg_in == Cg and C_out % G == 0
    Cg_out = C_out // G
    Hp, Wp = H + 2, W + 2

    if batch_block is None:
        batch_block = next(b for b in (4, 2, 1) if N % b == 0)
    Bn = batch_block
    assert N % Bn == 0
    NB = N // Bn

    # (N, C, H, W) -> (N, G, H, W, Cg); zero-pad H and W by (1, 1).
    x = x_nchw.reshape(N, G, Cg, H, W).transpose(0, 1, 3, 4, 2)
    x_pad = jnp.pad(x, ((0, 0), (0, 0), (1, 1), (1, 1), (0, 0)))

    # (C_out, Cg, 3, 3) -> (G, co, ci, ky, kx) -> (G, ky, kx, ci, co) -> (G, 9, Cg, Cg_out)
    w = (w_oihw.reshape(G, Cg_out, Cg, 3, 3)
         .transpose(0, 3, 4, 2, 1)
         .reshape(G, 9, Cg, Cg_out))

    kernel = _make_relu_gconv_kernel(Bn, H, W, Cg, Cg_out, compute_dtype)

    out = pl.pallas_call(
        kernel,
        out_shape=jax.ShapeDtypeStruct((N, G, H, Wp, Cg_out), x_nchw.dtype),
        grid_spec=pltpu.PrefetchScalarGridSpec(
            num_scalar_prefetch=0,
            # G slow / batch fast: weight block index depends only on g, so the
            # weights stay VMEM-resident across the fast batch axis.
            grid=(G, NB),
            in_specs=[
                pl.BlockSpec((Bn, 1, Hp, Wp, Cg),
                             lambda g, nb: (nb, g, 0, 0, 0)),
                pl.BlockSpec((1, 9, Cg, Cg_out),
                             lambda g, nb: (g, 0, 0, 0)),
            ],
            out_specs=pl.BlockSpec((Bn, 1, H, Wp, Cg_out),
                                   lambda g, nb: (nb, g, 0, 0, 0)),
        ),
        compiler_params=pltpu.CompilerParams(
            dimension_semantics=("parallel", "arbitrary"),
            vmem_limit_bytes=32 * 1024 * 1024,
        ),
    )(x_pad, w)

    # Drop the 2 dead output columns and go back to NCHW (slice fuses into the transpose).
    out = out[:, :, :, :W, :]                               # (N, G, H, W, Cg_out)
    return out.transpose(0, 1, 4, 2, 3).reshape(N, C_out, H, W)


if __name__ == "__main__":
    # Small shapes consistent with the module: groups=6, 3x3, stride 1, pad 1.
    # (original: N=1, C=1392, H=W=14; scaled down to C=48 keeping groups=6)
    N, C, H, W = 2, 48, 14, 14
    G = 6
    Cg = C // G

    key = jax.random.PRNGKey(0)
    kx_, kw_ = jax.random.split(key)
    x = jax.random.normal(kx_, (N, C, H, W), dtype=jnp.float32)
    w = jax.random.normal(kw_, (C, Cg, 3, 3), dtype=jnp.float32) * 0.05

    fn = jax.jit(functools.partial(relu_grouped_conv2d, groups=G))
    out = jax.block_until_ready(fn(x, w))

    # Reference: ReLU + grouped conv via lax.conv_general_dilated.
    ref = jax.lax.conv_general_dilated(
        jnp.maximum(x, 0.0), w,
        window_strides=(1, 1), padding=((1, 1), (1, 1)),
        dimension_numbers=("NCHW", "OIHW", "NCHW"),
        feature_group_count=G,
    )
    assert out.shape == (N, C, H, W)
    assert jnp.allclose(out, ref, atol=1e-4, rtol=1e-4), "f32 mismatch vs reference"

    # bf16 MXU-operand path (v6e/v7x): bf16 operands, f32 accumulation.
    fn_bf16 = jax.jit(functools.partial(relu_grouped_conv2d, groups=G,
                                        compute_dtype=jnp.bfloat16))
    out_bf16 = jax.block_until_ready(fn_bf16(x, w))
    assert jnp.allclose(out_bf16, ref, atol=3e-2, rtol=3e-2), "bf16 mismatch vs reference"

    print("KERNEL_OK")
</pallas_src>

<mosaic_0001>
module attributes {stable_mosaic.version = 11 : i64} {
  func.func @kernel(%arg0: i32, %arg1: i32, %arg2: memref<2x1x16x16x8xf32, #tpu.memory_space<vmem>>, %arg3: memref<1x9x8x8xf32, #tpu.memory_space<vmem>>, %arg4: memref<2x1x14x16x8xf32, #tpu.memory_space<vmem>>) attributes {dimension_semantics = [#tpu.dimension_semantics<parallel>, #tpu.dimension_semantics<arbitrary>], iteration_bounds = array<i64: 6, 1>, scalar_prefetch = 0 : i64, scratch_operands = 0 : i64, tpu.core_type = #tpu.core_type<tc>, window_params = [{transform_indices = @transform_0, window_bounds = array<i64: 2, 1, 16, 16, 8>}, {transform_indices = @transform_1, window_bounds = array<i64: 1, 9, 8, 8>}, {transform_indices = @transform_2, window_bounds = array<i64: 2, 1, 14, 16, 8>}]} {
    %c0 = arith.constant 0 : index
    %c0_0 = arith.constant 0 : index
    %c0_1 = arith.constant 0 : index
    %c0_2 = arith.constant 0 : index
    %c0_3 = arith.constant 0 : index
    %0 = vector.load %arg2[%c0, %c0_0, %c0_1, %c0_2, %c0_3] : memref<2x1x16x16x8xf32, #tpu.memory_space<vmem>>, vector<2x1x16x16x8xf32>
    %cst = arith.constant 0.000000e+00 : f32
    %1 = vector.broadcast %cst : f32 to vector<2x1x16x16x8xf32>
    %2 = arith.maximumf %0, %1 : vector<2x1x16x16x8xf32>
    %3 = vector.shape_cast %2 : vector<2x1x16x16x8xf32> to vector<2x16x16x8xf32>
    %cst_4 = arith.constant 0.000000e+00 : f32
    %4 = vector.broadcast %cst_4 : f32 to vector<448x8xf32>
    %5 = vector.extract_strided_slice %3 {offsets = [0, 0, 0, 0], sizes = [2, 14, 16, 8], strides = [1, 1, 1, 1]} : vector<2x16x16x8xf32> to vector<2x14x16x8xf32>
    %6 = vector.shape_cast %5 : vector<2x14x16x8xf32> to vector<448x8xf32>
    %c0_5 = arith.constant 0 : index
    %c0_6 = arith.constant 0 : index
    %c0_7 = arith.constant 0 : index
    %c0_8 = arith.constant 0 : index
    %7 = vector.load %arg3[%c0_5, %c0_6, %c0_7, %c0_8] : memref<1x9x8x8xf32, #tpu.memory_space<vmem>>, vector<1x1x8x8xf32>
    %8 = vector.shape_cast %7 : vector<1x1x8x8xf32> to vector<8x8xf32>
    %cst_9 = arith.constant dense<0.000000e+00> : vector<448x8xf32>
    %9 = tpu.matmul %6, %8, %cst_9 {dimension_numbers = #tpu.dot_dimension_numbers<[1], [0], [0], [1], [0, 0, 1, 1], [], []>} : vector<448x8xf32>, vector<8x8xf32>, vector<448x8xf32> -> vector<448x8xf32>
    %10 = arith.addf %4, %9 : vector<448x8xf32>
    %11 = vector.extract_strided_slice %3 {offsets = [0, 1, 0, 0], sizes = [2, 14, 16, 8], strides = [1, 1, 1, 1]} : vector<2x16x16x8xf32> to vector<2x14x16x8xf32>
    %12 = vector.shape_cast %11 : vector<2x14x16x8xf32> to vector<448x8xf32>
    %c0_10 = arith.constant 0 : index
    %c3 = arith.constant 3 : index
    %c0_11 = arith.constant 0 : index
    %c0_12 = arith.constant 0 : index
    %13 = vector.load %arg3[%c0_10, %c3, %c0_11, %c0_12] : memref<1x9x8x8xf32, #tpu.memory_space<vmem>>, vector<1x1x8x8xf32>
    %14 = vector.shape_cast %13 : vector<1x1x8x8xf32> to vector<8x8xf32>
    %cst_13 = arith.constant dense<0.000000e+00> : vector<448x8xf32>
    %15 = tpu.matmul %12, %14, %cst_13 {dimension_numbers = #tpu.dot_dimension_numbers<[1], [0], [0], [1], [0, 0, 1, 1], [], []>} : vector<448x8xf32>, vector<8x8xf32>, vector<448x8xf32> -> vector<448x8xf32>
    %16 = arith.addf %10, %15 : vector<448x8xf32>
    %17 = vector.extract_strided_slice %3 {offsets = [0, 2, 0, 0], sizes = [2, 14, 16, 8], strides = [1, 1, 1, 1]} : vector<2x16x16x8xf32> to vector<2x14x16x8xf32>
    %18 = vector.shape_cast %17 : vector<2x14x16x8xf32> to vector<448x8xf32>
    %c0_14 = arith.constant 0 : index
    %c6 = arith.constant 6 : index
    %c0_15 = arith.constant 0 : index
    %c0_16 = arith.constant 0 : index
    %19 = vector.load %arg3[%c0_14, %c6, %c0_15, %c0_16] : memref<1x9x8x8xf32, #tpu.memory_space<vmem>>, vector<1x1x8x8xf32>
    %20 = vector.shape_cast %19 : vector<1x1x8x8xf32> to vector<8x8xf32>
    %cst_17 = arith.constant dense<0.000000e+00> : vector<448x8xf32>
    %21 = tpu.matmul %18, %20, %cst_17 {dimension_numbers = #tpu.dot_dimension_numbers<[1], [0], [0], [1], [0, 0, 1, 1], [], []>} : vector<448x8xf32>, vector<8x8xf32>, vector<448x8xf32> -> vector<448x8xf32>
    %22 = arith.addf %16, %21 : vector<448x8xf32>
    %23 = vector.extract_strided_slice %3 {offsets = [0, 0, 1, 0], sizes = [2, 16, 15, 8], strides = [1, 1, 1, 1]} : vector<2x16x16x8xf32> to vector<2x16x15x8xf32>
    %24 = vector.extract_strided_slice %3 {offsets = [0, 0, 0, 0], sizes = [2, 16, 1, 8], strides = [1, 1, 1, 1]} : vector<2x16x16x8xf32> to vector<2x16x1x8xf32>
    %25 = tpu.concatenate %23, %24 in 2 : vector<2x16x15x8xf32>, vector<2x16x1x8xf32> -> vector<2x16x16x8xf32>
    %26 = vector.extract_strided_slice %25 {offsets = [0, 0, 0, 0], sizes = [2, 14, 16, 8], strides = [1, 1, 1, 1]} : vector<2x16x16x8xf32> to vector<2x14x16x8xf32>
    %27 = vector.shape_cast %26 : vector<2x14x16x8xf32> to vector<448x8xf32>
    %c0_18 = arith.constant 0 : index
    %c1 = arith.constant 1 : index
    %c0_19 = arith.constant 0 : index
    %c0_20 = arith.constant 0 : index
    %28 = vector.load %arg3[%c0_18, %c1, %c0_19, %c0_20] : memref<1x9x8x8xf32, #tpu.memory_space<vmem>>, vector<1x1x8x8xf32>
    %29 = vector.shape_cast %28 : vector<1x1x8x8xf32> to vector<8x8xf32>
    %cst_21 = arith.constant dense<0.000000e+00> : vector<448x8xf32>
    %30 = tpu.matmul %27, %29, %cst_21 {dimension_numbers = #tpu.dot_dimension_numbers<[1], [0], [0], [1], [0, 0, 1, 1], [], []>} : vector<448x8xf32>, vector<8x8xf32>, vector<448x8xf32> -> vector<448x8xf32>
    %31 = arith.addf %22, %30 : vector<448x8xf32>
    %32 = vector.extract_strided_slice %25 {offsets = [0, 1, 0, 0], sizes = [2, 14, 16, 8], strides = [1, 1, 1, 1]} : vector<2x16x16x8xf32> to vector<2x14x16x8xf32>
    %33 = vector.shape_cast %32 : vector<2x14x16x8xf32> to vector<448x8xf32>
    %c0_22 = arith.constant 0 : index
    %c4 = arith.constant 4 : index
    %c0_23 = arith.constant 0 : index
    %c0_24 = arith.constant 0 : index
    %34 = vector.load %arg3[%c0_22, %c4, %c0_23, %c0_24] : memref<1x9x8x8xf32, #tpu.memory_space<vmem>>, vector<1x1x8x8xf32>
    %35 = vector.shape_cast %34 : vector<1x1x8x8xf32> to vector<8x8xf32>
    %cst_25 = arith.constant dense<0.000000e+00> : vector<448x8xf32>
    %36 = tpu.matmul %33, %35, %cst_25 {dimension_numbers = #tpu.dot_dimension_numbers<[1], [0], [0], [1], [0, 0, 1, 1], [], []>} : vector<448x8xf32>, vector<8x8xf32>, vector<448x8xf32> -> vector<448x8xf32>
    %37 = arith.addf %31, %36 : vector<448x8xf32>
    %38 = vector.extract_strided_slice %25 {offsets = [0, 2, 0, 0], sizes = [2, 14, 16, 8], strides = [1, 1, 1, 1]} : vector<2x16x16x8xf32> to vector<2x14x16x8xf32>
    %39 = vector.shape_cast %38 : vector<2x14x16x8xf32> to vector<448x8xf32>
    %c0_26 = arith.constant 0 : index
    %c7 = arith.constant 7 : index
    %c0_27 = arith.constant 0 : index
    %c0_28 = arith.constant 0 : index
    %40 = vector.load %arg3[%c0_26, %c7, %c0_27, %c0_28] : memref<1x9x8x8xf32, #tpu.memory_space<vmem>>, vector<1x1x8x8xf32>
    %41 = vector.shape_cast %40 : vector<1x1x8x8xf32> to vector<8x8xf32>
    %cst_29 = arith.constant dense<0.000000e+00> : vector<448x8xf32>
    %42 = tpu.matmul %39, %41, %cst_29 {dimension_numbers = #tpu.dot_dimension_numbers<[1], [0], [0], [1], [0, 0, 1, 1], [], []>} : vector<448x8xf32>, vector<8x8xf32>, vector<448x8xf32> -> vector<448x8xf32>
    %43 = arith.addf %37, %42 : vector<448x8xf32>
    %44 = vector.extract_strided_slice %3 {offsets = [0, 0, 2, 0], sizes = [2, 16, 14, 8], strides = [1, 1, 1, 1]} : vector<2x16x16x8xf32> to vector<2x16x14x8xf32>
    %45 = vector.extract_strided_slice %3 {offsets = [0, 0, 0, 0], sizes = [2, 16, 2, 8], strides = [1, 1, 1, 1]} : vector<2x16x16x8xf32> to vector<2x16x2x8xf32>
    %46 = tpu.concatenate %44, %45 in 2 : vector<2x16x14x8xf32>, vector<2x16x2x8xf32> -> vector<2x16x16x8xf32>
    %47 = vector.extract_strided_slice %46 {offsets = [0, 0, 0, 0], sizes = [2, 14, 16, 8], strides = [1, 1, 1, 1]} : vector<2x16x16x8xf32> to vector<2x14x16x8xf32>
    %48 = vector.shape_cast %47 : vector<2x14x16x8xf32> to vector<448x8xf32>
    %c0_30 = arith.constant 0 : index
    %c2 = arith.constant 2 : index
    %c0_31 = arith.constant 0 : index
    %c0_32 = arith.constant 0 : index
    %49 = vector.load %arg3[%c0_30, %c2, %c0_31, %c0_32] : memref<1x9x8x8xf32, #tpu.memory_space<vmem>>, vector<1x1x8x8xf32>
    %50 = vector.shape_cast %49 : vector<1x1x8x8xf32> to vector<8x8xf32>
    %cst_33 = arith.constant dense<0.000000e+00> : vector<448x8xf32>
    %51 = tpu.matmul %48, %50, %cst_33 {dimension_numbers = #tpu.dot_dimension_numbers<[1], [0], [0], [1], [0, 0, 1, 1], [], []>} : vector<448x8xf32>, vector<8x8xf32>, vector<448x8xf32> -> vector<448x8xf32>
    %52 = arith.addf %43, %51 : vector<448x8xf32>
    %53 = vector.extract_strided_slice %46 {offsets = [0, 1, 0, 0], sizes = [2, 14, 16, 8], strides = [1, 1, 1, 1]} : vector<2x16x16x8xf32> to vector<2x14x16x8xf32>
    %54 = vector.shape_cast %53 : vector<2x14x16x8xf32> to vector<448x8xf32>
    %c0_34 = arith.constant 0 : index
    %c5 = arith.constant 5 : index
    %c0_35 = arith.constant 0 : index
    %c0_36 = arith.constant 0 : index
    %55 = vector.load %arg3[%c0_34, %c5, %c0_35, %c0_36] : memref<1x9x8x8xf32, #tpu.memory_space<vmem>>, vector<1x1x8x8xf32>
    %56 = vector.shape_cast %55 : vector<1x1x8x8xf32> to vector<8x8xf32>
    %cst_37 = arith.constant dense<0.000000e+00> : vector<448x8xf32>
    %57 = tpu.matmul %54, %56, %cst_37 {dimension_numbers = #tpu.dot_dimension_numbers<[1], [0], [0], [1], [0, 0, 1, 1], [], []>} : vector<448x8xf32>, vector<8x8xf32>, vector<448x8xf32> -> vector<448x8xf32>
    %58 = arith.addf %52, %57 : vector<448x8xf32>
    %59 = vector.extract_strided_slice %46 {offsets = [0, 2, 0, 0], sizes = [2, 14, 16, 8], strides = [1, 1, 1, 1]} : vector<2x16x16x8xf32> to vector<2x14x16x8xf32>
    %60 = vector.shape_cast %59 : vector<2x14x16x8xf32> to vector<448x8xf32>
    %c0_38 = arith.constant 0 : index
    %c8 = arith.constant 8 : index
    %c0_39 = arith.constant 0 : index
    %c0_40 = arith.constant 0 : index
    %61 = vector.load %arg3[%c0_38, %c8, %c0_39, %c0_40] : memref<1x9x8x8xf32, #tpu.memory_space<vmem>>, vector<1x1x8x8xf32>
    %62 = vector.shape_cast %61 : vector<1x1x8x8xf32> to vector<8x8xf32>
    %cst_41 = arith.constant dense<0.000000e+00> : vector<448x8xf32>
    %63 = tpu.matmul %60, %62, %cst_41 {dimension_numbers = #tpu.dot_dimension_numbers<[1], [0], [0], [1], [0, 0, 1, 1], [], []>} : vector<448x8xf32>, vector<8x8xf32>, vector<448x8xf32> -> vector<448x8xf32>
    %64 = arith.addf %58, %63 : vector<448x8xf32>
    %65 = vector.shape_cast %64 : vector<448x8xf32> to vector<2x1x14x16x8xf32>
    %c0_42 = arith.constant 0 : index
    %c0_43 = arith.constant 0 : index
    %c0_44 = arith.constant 0 : index
    %c0_45 = arith.constant 0 : index
    %c0_46 = arith.constant 0 : index
    %66 = vector.load %arg4[%c0_42, %c0_43, %c0_44, %c0_45, %c0_46] : memref<2x1x14x16x8xf32, #tpu.memory_space<vmem>>, vector<2x1x14x16x8xf32>
    tpu.vector_store %arg4[%c0_42, %c0_43, %c0_44, %c0_45, %c0_46], %65 {strides = array<i32>} : memref<2x1x14x16x8xf32, #tpu.memory_space<vmem>>, vector<2x1x14x16x8xf32>,
    return
  }
  func.func @transform_0(%arg0: i32, %arg1: i32) -> (i32, i32, i32, i32, i32) {
    %c0_i32 = arith.constant 0 : i32
    %c0_i32_0 = arith.constant 0 : i32
    %c0_i32_1 = arith.constant 0 : i32
    %c0_i32_2 = arith.constant 0 : i32
    return %arg1, %arg0, %c0_i32, %c0_i32_0, %c0_i32_1 : i32, i32, i32, i32, i32
  }
  func.func @transform_1(%arg0: i32, %arg1: i32) -> (i32, i32, i32, i32) {
    %c0_i32 = arith.constant 0 : i32
    %c0_i32_0 = arith.constant 0 : i32
    %c0_i32_1 = arith.constant 0 : i32
    %c0_i32_2 = arith.constant 0 : i32
    return %arg0, %c0_i32, %c0_i32_0, %c0_i32_1 : i32, i32, i32, i32
  }
  func.func @transform_2(%arg0: i32, %arg1: i32) -> (i32, i32, i32, i32, i32) {
    %c0_i32 = arith.constant 0 : i32
    %c0_i32_0 = arith.constant 0 : i32
    %c0_i32_1 = arith.constant 0 : i32
    %c0_i32_2 = arith.constant 0 : i32
    return %arg1, %arg0, %c0_i32, %c0_i32_0, %c0_i32_1 : i32, i32, i32, i32, i32
  }
}

</mosaic_0001>

<bundles_post_ra>
// kernel: relu_grouped_conv2d.1
= control target key start
LH: loop header
LB: loop body
LE: loop exit
PB: predicated region body
PF: predicated region fallthrough
CT: control target
= control target key end

     0   :  { %s7773_s9 = smov 0   ;;  %s7775_s10 = smov 0   ;;  %s9944_s0 = inlined_call_operand.vmem [shape: f32[2,6,16,16,8], index: 0, kind: input, shape index: {}]   ;;  %s9945_s1 = inlined_call_operand.vmem [shape: f32[6,9,8,8], index: 1, kind: input, shape index: {}]   ;;  %s9946_s2 = inlined_call_operand.vmem [shape: f32[2,6,14,16,8], index: 2, kind: output, shape index: {}]  }
   0x1   :  { %s7777_s11 = smov 0   ;;  %s7779_s12 = smov 0  }
   0x2   :  { %s7781_s13 = smov 0  }
   0x3 LB: > { %s24_s14 = sadd.s32 1, %s7752_s12  ;;  %s5411_s15 = sadd.s32 4294967295, %s7756_s13   ;;  %s7756_s13 = sphi %s7781_s13, %s12_s13   ;;  %s7752_s12 = sphi %s7779_s12, %s10295_s12   ;;  %s7748_s11 = sphi %s7777_s11, %s10294_s11   ;;  %s7744_s10 = sphi %s7775_s10, %s10293_s10   ;;  %s7740_s9 = sphi %s7773_s9, %s10292_s9  }
   0x4   : > { %p26_p0 = scmp.ge.s32.totalorder %s24_s14, 6  ;;  %p40_p1 = scmp.ne.s32.totalorder %s7744_s10, %s7740_s9 }
   0x5   : > { %p41_p2 = scmp.eq.s32.totalorder %s7756_s13, 0  ;;  %p98_p4 = scmp.eq.s32.totalorder %s5411_s15, 5 }
   0x6   : > { %s10297_s14 = smov (%p26_p0, %s24_s14), 0  ;;  %s33_s17 = sadd.s32 1, %s7744_s10 }
   0x7   : > { %p42_p3 = por %p41_p2, %p40_p1  ;;  %s29_s16 = ssub.s32 %s7752_s12, %s10297_s14 }
   0x8   : > { %p31_p5 = scmp.eq.s32.totalorder %s29_s16, 0  ;;  %p7808_p6 = por %p98_p4, %p40_p1 }
   0x9   : > { %p5414_p7 = scmp.ge.s32.totalorder %s7756_s13, 6 }
   0xa   : > { %s7813_s19 = scalar_select %p31_p5, %s7744_s10, %s33_s17  }
   0xb   : > { %120 = sbr.rel (%p5414_p7) target bundleno = 54 (0x36), region = 16 }
  0x12   : > { %123 = sbr.rel (!%p42_p3) target bundleno = 54 (0x36), region = 20  ;;  %s125_s20 = sand.u32 (%p42_p3), 1, %s7744_s10  }
  0x13   : > { %s5936_s21 = sshll.u32 (%p42_p3), %s7752_s12, 8  ;;  %s5415_s22 = sshll.u32 (%p42_p3), %s125_s20, 9 }
  0x14   : > { %s7821_s25 = scalar_lea.vmem (%p42_p3), %s9944_s0, %s5936_s21  ;;  %s7826_s26 = scalar_lea.vmem (%p42_p3), [#allocation2], %s5415_s22 }
  0x15   : > { %v287_v0 = vld [vmem:[%s7821_s25] sm:$0xff] (%p42_p3)  ;;  %v289_v1 = vld [vmem:[%s7821_s25 + $0x8] sm:$0xff] (%p42_p3)  ;;  %v291_v2 = vld [vmem:[%s7821_s25 + $0x10] sm:$0xff] (%p42_p3) }
  0x16   : > { %288 = vst [vmem:[%s7826_s26] sm:$0xff] (%p42_p3), %v287_v0  ;;  %290 = vst [vmem:[%s7826_s26 + $0x8] sm:$0xff] (%p42_p3), %v289_v1  ;;  %v293_v3 = vld [vmem:[%s7821_s25 + $0x18] sm:$0xff] (%p42_p3)  ;;  %v295_v4 = vld [vmem:[%s7821_s25 + $0x20] sm:$0xff] (%p42_p3) }
  0x17   : > { %292 = vst [vmem:[%s7826_s26 + $0x10] sm:$0xff] (%p42_p3), %v291_v2  ;;  %v297_v5 = vld [vmem:[%s7821_s25 + $0x28] sm:$0xff] (%p42_p3)  ;;  %294 = vst [vmem:[%s7826_s26 + $0x18] sm:$0xff] (%p42_p3), %v293_v3  ;;  %v299_v6 = vld [vmem:[%s7821_s25 + $0x30] sm:$0xff] (%p42_p3) }
  0x18   : > { %296 = vst [vmem:[%s7826_s26 + $0x20] sm:$0xff] (%p42_p3), %v295_v4  ;;  %298 = vst [vmem:[%s7826_s26 + $0x28] sm:$0xff] (%p42_p3), %v297_v5  ;;  %v301_v7 = vld [vmem:[%s7821_s25 + $0x38] sm:$0xff] (%p42_p3)  ;;  %v303_v8 = vld [vmem:[%s7821_s25 + $0x40] sm:$0xff] (%p42_p3) }
  0x19   : > { %300 = vst [vmem:[%s7826_s26 + $0x30] sm:$0xff] %v299_v6  ;;  %302 = vst [vmem:[%s7826_s26 + $0x38] sm:$0xff] %v301_v7  ;;  %v305_v9 = vld [vmem:[%s7821_s25 + $0x48] sm:$0xff]  ;;  %v307_v10 = vld [vmem:[%s7821_s25 + $0x50] sm:$0xff] }
  0x1a   : > { %304 = vst [vmem:[%s7826_s26 + $0x40] sm:$0xff] %v303_v8  ;;  %v309_v11 = vld [vmem:[%s7821_s25 + $0x58] sm:$0xff]  ;;  %306 = vst [vmem:[%s7826_s26 + $0x48] sm:$0xff] %v305_v9  ;;  %v311_v12 = vld [vmem:[%s7821_s25 + $0x60] sm:$0xff] }
  0x1b   : > { %308 = vst [vmem:[%s7826_s26 + $0x50] sm:$0xff] %v307_v10  ;;  %310 = vst [vmem:[%s7826_s26 + $0x58] sm:$0xff] %v309_v11  ;;  %v313_v13 = vld [vmem:[%s7821_s25 + $0x68] sm:$0xff]  ;;  %v315_v14 = vld [vmem:[%s7821_s25 + $0x70] sm:$0xff] }
  0x1c   : > { %312 = vst [vmem:[%s7826_s26 + $0x60] sm:$0xff] %v311_v12  ;;  %314 = vst [vmem:[%s7826_s26 + $0x68] sm:$0xff] %v313_v13  ;;  %v317_v15 = vld [vmem:[%s7821_s25 + $0x78] sm:$0xff]  ;;  %v319_v16 = vld [vmem:[%s7821_s25 + $0x80] sm:$0xff] }
  0x1d   : > { %316 = vst [vmem:[%s7826_s26 + $0x70] sm:$0xff] %v315_v14  ;;  %v321_v17 = vld [vmem:[%s7821_s25 + $0x88] sm:$0xff]  ;;  %318 = vst [vmem:[%s7826_s26 + $0x78] sm:$0xff] %v317_v15  ;;  %v323_v18 = vld [vmem:[%s7821_s25 + $0x90] sm:$0xff] }
  0x1e   : > { %320 = vst [vmem:[%s7826_s26 + $0x80] sm:$0xff] %v319_v16  ;;  %322 = vst [vmem:[%s7826_s26 + $0x88] sm:$0xff] %v321_v17  ;;  %v325_v19 = vld [vmem:[%s7821_s25 + $0x98] sm:$0xff]  ;;  %v327_v20 = vld [vmem:[%s7821_s25 + $0xa0] sm:$0xff] }
  0x1f   : > { %324 = vst [vmem:[%s7826_s26 + $0x90] sm:$0xff] %v323_v18  ;;  %326 = vst [vmem:[%s7826_s26 + $0x98] sm:$0xff] %v325_v19  ;;  %v329_v21 = vld [vmem:[%s7821_s25 + $0xa8] sm:$0xff]  ;;  %v331_v22 = vld [vmem:[%s7821_s25 + $0xb0] sm:$0xff] }
  0x20   : > { %328 = vst [vmem:[%s7826_s26 + $0xa0] sm:$0xff] %v327_v20  ;;  %v333_v23 = vld [vmem:[%s7821_s25 + $0xb8] sm:$0xff]  ;;  %330 = vst [vmem:[%s7826_s26 + $0xa8] sm:$0xff] %v329_v21  ;;  %v335_v24 = vld [vmem:[%s7821_s25 + $0xc0] sm:$0xff] }
  0x21   : > { %332 = vst [vmem:[%s7826_s26 + $0xb0] sm:$0xff] %v331_v22  ;;  %334 = vst [vmem:[%s7826_s26 + $0xb8] sm:$0xff] %v333_v23  ;;  %v337_v25 = vld [vmem:[%s7821_s25 + $0xc8] sm:$0xff]  ;;  %v339_v26 = vld [vmem:[%s7821_s25 + $0xd0] sm:$0xff] }
  0x22   : > { %336 = vst [vmem:[%s7826_s26 + $0xc0] sm:$0xff] %v335_v24  ;;  %338 = vst [vmem:[%s7826_s26 + $0xc8] sm:$0xff] %v337_v25  ;;  %v341_v27 = vld [vmem:[%s7821_s25 + $0xd8] sm:$0xff]  ;;  %v343_v28 = vld [vmem:[%s7821_s25 + $0xe0] sm:$0xff] }
  0x23   : > { %340 = vst [vmem:[%s7826_s26 + $0xd0] sm:$0xff] %v339_v26  ;;  %v345_v29 = vld [vmem:[%s7821_s25 + $0xe8] sm:$0xff]  ;;  %342 = vst [vmem:[%s7826_s26 + $0xd8] sm:$0xff] %v341_v27  ;;  %v347_v30 = vld [vmem:[%s7821_s25 + $0xf0] sm:$0xff] }
  0x24   : > { %344 = vst [vmem:[%s7826_s26 + $0xe0] sm:$0xff] %v343_v28  ;;  %346 = vst [vmem:[%s7826_s26 + $0xe8] sm:$0xff] %v345_v29  ;;  %v349_v31 = vld [vmem:[%s7821_s25 + $0xf8] sm:$0xff]  ;;  %v351_v32 = vld [vmem:[%s7821_s25 + $0x600] sm:$0xff] }
  0x25   : > { %348 = vst [vmem:[%s7826_s26 + $0xf0] sm:$0xff] %v347_v30  ;;  %350 = vst [vmem:[%s7826_s26 + $0xf8] sm:$0xff] %v349_v31  ;;  %v353_v33 = vld [vmem:[%s7821_s25 + $0x608] sm:$0xff]  ;;  %v355_v34 = vld [vmem:[%s7821_s25 + $0x610] sm:$0xff] }
  0x26   : > { %352 = vst [vmem:[%s7826_s26 + $0x100] sm:$0xff] %v351_v32  ;;  %v357_v35 = vld [vmem:[%s7821_s25 + $0x618] sm:$0xff]  ;;  %354 = vst [vmem:[%s7826_s26 + $0x108] sm:$0xff] %v353_v33  ;;  %v359_v36 = vld [vmem:[%s7821_s25 + $0x620] sm:$0xff] }
  0x27   : > { %356 = vst [vmem:[%s7826_s26 + $0x110] sm:$0xff] %v355_v34  ;;  %358 = vst [vmem:[%s7826_s26 + $0x118] sm:$0xff] %v357_v35  ;;  %v361_v37 = vld [vmem:[%s7821_s25 + $0x628] sm:$0xff]  ;;  %v363_v38 = vld [vmem:[%s7821_s25 + $0x630] sm:$0xff] }
  0x28   : > { %360 = vst [vmem:[%s7826_s26 + $0x120] sm:$0xff] %v359_v36  ;;  %362 = vst [vmem:[%s7826_s26 + $0x128] sm:$0xff] %v361_v37  ;;  %v365_v39 = vld [vmem:[%s7821_s25 + $0x638] sm:$0xff]  ;;  %v367_v40 = vld [vmem:[%s7821_s25 + $0x640] sm:$0xff] }
  0x29   : > { %364 = vst [vmem:[%s7826_s26 + $0x130] sm:$0xff] %v363_v38  ;;  %v369_v41 = vld [vmem:[%s7821_s25 + $0x648] sm:$0xff]  ;;  %366 = vst [vmem:[%s7826_s26 + $0x138] sm:$0xff] %v365_v39  ;;  %v371_v42 = vld [vmem:[%s7821_s25 + $0x650] sm:$0xff] }
  0x2a   : > { %368 = vst [vmem:[%s7826_s26 + $0x140] sm:$0xff] %v367_v40  ;;  %370 = vst [vmem:[%s7826_s26 + $0x148] sm:$0xff] %v369_v41  ;;  %v373_v43 = vld [vmem:[%s7821_s25 + $0x658] sm:$0xff]  ;;  %v375_v44 = vld [vmem:[%s7821_s25 + $0x660] sm:$0xff] }
  0x2b   : > { %372 = vst [vmem:[%s7826_s26 + $0x150] sm:$0xff] %v371_v42  ;;  %374 = vst [vmem:[%s7826_s26 + $0x158] sm:$0xff] %v373_v43  ;;  %v377_v45 = vld [vmem:[%s7821_s25 + $0x668] sm:$0xff]  ;;  %v379_v46 = vld [vmem:[%s7821_s25 + $0x670] sm:$0xff] }
  0x2c   : > { %376 = vst [vmem:[%s7826_s26 + $0x160] sm:$0xff] %v375_v44  ;;  %v381_v47 = vld [vmem:[%s7821_s25 + $0x678] sm:$0xff]  ;;  %378 = vst [vmem:[%s7826_s26 + $0x168] sm:$0xff] %v377_v45  ;;  %v383_v48 = vld [vmem:[%s7821_s25 + $0x680] sm:$0xff] }
  0x2d   : > { %380 = vst [vmem:[%s7826_s26 + $0x170] sm:$0xff] %v379_v46  ;;  %382 = vst [vmem:[%s7826_s26 + $0x178] sm:$0xff] %v381_v47  ;;  %v385_v49 = vld [vmem:[%s7821_s25 + $0x688] sm:$0xff]  ;;  %v387_v50 = vld [vmem:[%s7821_s25 + $0x690] sm:$0xff] }
  0x2e   : > { %384 = vst [vmem:[%s7826_s26 + $0x180] sm:$0xff] %v383_v48  ;;  %386 = vst [vmem:[%s7826_s26 + $0x188] sm:$0xff] %v385_v49  ;;  %v389_v51 = vld [vmem:[%s7821_s25 + $0x698] sm:$0xff]  ;;  %v391_v52 = vld [vmem:[%s7821_s25 + $0x6a0] sm:$0xff] }
  0x2f   : > { %388 = vst [vmem:[%s7826_s26 + $0x190] sm:$0xff] %v387_v50  ;;  %v393_v53 = vld [vmem:[%s7821_s25 + $0x6a8] sm:$0xff]  ;;  %390 = vst [vmem:[%s7826_s26 + $0x198] sm:$0xff] %v389_v51  ;;  %v395_v54 = vld [vmem:[%s7821_s25 + $0x6b0] sm:$0xff] }
  0x30   : > { %392 = vst [vmem:[%s7826_s26 + $0x1a0] sm:$0xff] %v391_v52  ;;  %394 = vst [vmem:[%s7826_s26 + $0x1a8] sm:$0xff] %v393_v53  ;;  %v397_v55 = vld [vmem:[%s7821_s25 + $0x6b8] sm:$0xff]  ;;  %v399_v56 = vld [vmem:[%s7821_s25 + $0x6c0] sm:$0xff] }
  0x31   : > { %396 = vst [vmem:[%s7826_s26 + $0x1b0] sm:$0xff] %v395_v54  ;;  %398 = vst [vmem:[%s7826_s26 + $0x1b8] sm:$0xff] %v397_v55  ;;  %v401_v57 = vld [vmem:[%s7821_s25 + $0x6c8] sm:$0xff]  ;;  %v403_v58 = vld [vmem:[%s7821_s25 + $0x6d0] sm:$0xff] }
  0x32   : > { %400 = vst [vmem:[%s7826_s26 + $0x1c0] sm:$0xff] %v399_v56  ;;  %v405_v59 = vld [vmem:[%s7821_s25 + $0x6d8] sm:$0xff]  ;;  %402 = vst [vmem:[%s7826_s26 + $0x1c8] sm:$0xff] %v401_v57  ;;  %v407_v60 = vld [vmem:[%s7821_s25 + $0x6e0] sm:$0xff] }
  0x33   : > { %404 = vst [vmem:[%s7826_s26 + $0x1d0] sm:$0xff] %v403_v58  ;;  %406 = vst [vmem:[%s7826_s26 + $0x1d8] sm:$0xff] %v405_v59  ;;  %v409_v61 = vld [vmem:[%s7821_s25 + $0x6e8] sm:$0xff]  ;;  %v411_v62 = vld [vmem:[%s7821_s25 + $0x6f0] sm:$0xff] }
  0x34   : > { %408 = vst [vmem:[%s7826_s26 + $0x1e0] sm:$0xff] %v407_v60  ;;  %410 = vst [vmem:[%s7826_s26 + $0x1e8] sm:$0xff] %v409_v61  ;;  %v413_v63 = vld [vmem:[%s7821_s25 + $0x6f8] sm:$0xff] }
  0x35   : > { %412 = vst [vmem:[%s7826_s26 + $0x1f0] sm:$0xff] %v411_v62  ;;  %414 = vst [vmem:[%s7826_s26 + $0x1f8] sm:$0xff] %v413_v63 }
  0x36 PF: > { %p5418_p8 = scmp.ge.s32.totalorder %s7756_s13, 1  ;;  %p427_p9 = scmp.lt.s32.totalorder %s7756_s13, 7 }
  0x38   : > { %p428_p10 = pnand %p5418_p8, %p427_p9 }
  0x3a   : > { %431 = sbr.rel (%p428_p10) target bundleno = 800 (0x320), region = 62 }
  0x41   : > { %p460_p11 = scmp.lt.s32.totalorder %s7748_s11, 5  ;;  %s434_s27 = sand.u32 1, %s7740_s9   ;;  %vm597_vm0 = vcmask 64512   ;;  %vm1883_vm1 = vcmask 1046528   ;;  %vm3445_vm2 = vcmask 1045504  }
  0x42   : > { %s5419_s28 = sshll.u32 %s434_s27, 9  ;;  %s7674_s7 = smul.u32 448, %s434_s27 }
  0x43   : > { %s461_s29 = scalar_select %p460_p11, %s7748_s11, 5 }
  0x44   : > { %s7960_s3 = scalar_lea.vmem [#allocation2], %s5419_s28  ;;  %s9683_s8 = scalar_lea.vmem [#allocation3], %s7674_s7 }
  0x45   : > { %s7675_s30 = smul.u32 72, %s461_s29  ;;  %v468_v0 = vld [vmem:[%s7960_s3 + $0x10] sm:$0xff]  ;;  %v469_v1 = vld [vmem:[%s7960_s3 + $0x18] sm:$0xff]  ;;  %v470_v2 = vld [vmem:[%s7960_s3 + $0x20] sm:$0xff] }
  0x46   : > { %v7965_v3 = vmax.f32 %v468_v0, 0.0  ;;  %v7967_v4 = vmax.f32 %v469_v1, 0.0  ;;  %v7969_v5 = vmax.f32 %v470_v2, 0.0  ;;  %v471_v6 = vld [vmem:[%s7960_s3 + $0x28] sm:$0xff]  ;;  %v472_v7 = vld [vmem:[%s7960_s3 + $0x30] sm:$0xff]  ;;  %v473_v8 = vld [vmem:[%s7960_s3 + $0x38] sm:$0xff] }
  0x47   : > { %s7977_s6 = scalar_lea.vmem %s9945_s1, %s7675_s30  ;;  %v7979_v9 = vmax.f32 %v471_v6, 0.0  ;;  %v7981_v10 = vmax.f32 %v472_v7, 0.0  ;;  %v7983_v11 = vmax.f32 %v473_v8, 0.0  ;;  %v474_v12 = vld [vmem:[%s7960_s3 + $0x40] sm:$0xff]  ;;  %v475_v13 = vld [vmem:[%s7960_s3 + $0x48] sm:$0xff]  ;;  %v476_v28 = vld [vmem:[%s7960_s3 + $0x50] sm:$0xff] }
  0x48   : > { %v5421_v14 = vld [vmem:[%s7977_s6 + $0x18] sm:$0xff]  ;;  %v5648_v15 = vld [vmem:[%s7977_s6 + $0x20] sm:$0xff]  ;;  %6452 = vmatprep.mubr.msk.f32.mxu1 %vm597_vm0, %v7965_v3  ;;  %v1887_v16 = vrot.slane %v7965_v3, 1  ;;  %v1888_v17 = vrot.slane %v7967_v4, 1  ;;  %v1890_v18 = vrot.slane %v7969_v5, 1  ;;  %v8005_v26 = vmax.f32 %v474_v12, 0.0 }
  0x49   : > { %6450 = vmatprep.subr.mxu1 %v5421_v14  ;;  %6794 = vmatprep.subr.mxu0 %v5648_v15  ;;  %v594_v19 = vld [vmem:[%s7977_s6] sm:$0xff]  ;;  %v1891_v20 = vrot.slane %v7979_v9, 1  ;;  %v1893_v21 = vrot.slane %v7981_v10, 1  ;;  %v1894_v22 = vrot.slane %v7983_v11, 1  ;;  %v5705_v25 = vld [vmem:[%s7977_s6 + $0x38] sm:$0xff]  ;;  %v8007_v27 = vmax.f32 %v475_v13, 0.0 }
  0x4a   : > { %6451 = vmatpush3.msra.mxu1 %v5421_v14  ;;  %6795 = vmatpush3.msra.mxu0 %v5648_v15  ;;  %v7999_v23 = vsel %vm1883_vm1, %v1887_v16, %v1888_v17  ;;  %v8002_v24 = vsel %vm1883_vm1, %v1888_v17, %v1887_v16  ;;  %v477_v29 = vld [vmem:[%s7960_s3 + $0x58] sm:$0xff]  ;;  %v8023_v32 = vmax.f32 %v476_v28, 0.0  ;;  %v1896_v34 = vrot.slane %v8005_v26, 1  ;;  %v478_v37 = vld [vmem:[%s7960_s3 + $0x60] sm:$0xff]  ;;  %v479_v38 = vld [vmem:[%s7960_s3 + $0x68] sm:$0xff]  ;;  %s7676_s9 = smul.u32 (%p7808_p6), 224, %s7748_s11 }
  0x4b   : > { %10101 = vst [vmem:[#allocation4_spill] sm:$0xff] %v7999_v23  ;;  %10102 = vst [vmem:[#allocation5_spill] sm:$0xff] %v8002_v24  ;;  %6796 = vmatprep.mubr.msk.f32.mxu0 %vm597_vm0, %v7999_v23  ;;  %6453 = vmatmul.mubr.msk.f32.vlgmr.msra.gmra.mrb[0].mxu1 %vm597_vm0, %v7967_v4  ;;  %v8018_v30 = vsel %vm1883_vm1, %v1890_v18, %v1891_v20  ;;  %v8021_v31 = vsel %vm1883_vm1, %v1891_v20, %v1890_v18  ;;  %v1897_v35 = vrot.slane %v8007_v27, 1  ;;  %v8051_v41 = vld [vmem:[%s7977_s6 + $0x10] sm:$0xff]  ;;  %v481_v47 = vld [vmem:[%s7960_s3 + $0x78] sm:$0xff] }
  0x4c   : > { %6536 = vmatprep.subr.mxu1 %v594_v19  ;;  %6797 = vmatmul.mubr.msk.f32.vlgmr.msra.gmra.mrb[0].mxu0 %vm597_vm0, %v8002_v24  ;;  %10103 = vst [vmem:[#allocation6_spill] sm:$0xff] %v8018_v30  ;;  %10104 = vst [vmem:[#allocation7_spill] sm:$0xff] %v8021_v31  ;;  %v8028_v33 = vsel %vm1883_vm1, %v1893_v21, %v1894_v22  ;;  %v8032_v36 = vmax.f32 %v477_v29, 0.0  ;;  %v8047_v39 = vsel %vm1883_vm1, %v1894_v22, %v1893_v21  ;;  %v480_v46 = vld [vmem:[%s7960_s3 + $0x70] sm:$0xff]  ;;  %v482_v54 = vld [vmem:[%s7960_s3 + $0x80] sm:$0xff]  ;;  %s9821_s17 = scalar_lea.vmem (%p7808_p6), %s9946_s2, %s7676_s9 }
  0x4d   : > { %6880 = vmatprep.subr.mxu0 %v5705_v25  ;;  %6537 = vmatpush3.msra.mxu1 %v594_v19  ;;  %10105 = vst [vmem:[#allocation8_spill] sm:$0xff] %v8028_v33  ;;  %10106 = vst [vmem:[#allocation9_spill] sm:$0xff] %v8047_v39  ;;  %v1899_v40 = vrot.slane %v8023_v32, 1  ;;  %v8054_v42 = vsel %vm1883_vm1, %v1896_v34, %v1897_v35  ;;  %v8057_v44 = vmax.f32 %v478_v37, 0.0  ;;  %v8059_v45 = vmax.f32 %v479_v38, 0.0  ;;  %v483_v55 = vld [vmem:[%s7960_s3 + $0x88] sm:$0xff] }
  0x4e   : > { %6881 = vmatpush3.msra.mxu0 %v5705_v25  ;;  %6455 = vmatprep.mubr.msk.f32.mxu1 %vm597_vm0, %v7969_v5  ;;  %10107 = vst [vmem:[#allocation10_spill] sm:$0xff] %v8054_v42  ;;  %v1900_v43 = vrot.slane %v8032_v36, 1  ;;  %v8073_v48 = vsel %vm1883_vm1, %v1897_v35, %v1896_v34  ;;  %v8075_v49 = vmax.f32 %v480_v46, 0.0  ;;  %v8082_v53 = vmax.f32 %v481_v47, 0.0  ;;  %v484_v62 = vld [vmem:[%s7960_s3 + $0x90] sm:$0xff]  ;;  %v485_v63 = vld [vmem:[%s7960_s3 + $0x98] sm:$0xff] }
  0x4f   : > { %6799 = vmatprep.mubr.msk.f32.mxu0 %vm597_vm0, %v8018_v30  ;;  %6456 = vmatmul.mubr.msk.f32.gmra.mrb[2].mxu1 %vm597_vm0, %v7979_v9  ;;  %10108 = vst [vmem:[#allocation11_spill] sm:$0xff] %v8073_v48  ;;  %v1902_v51 = vrot.slane %v8057_v44, 1  ;;  %v1903_v52 = vrot.slane %v8059_v45, 1  ;;  %v8097_v57 = vmax.f32 %v482_v54, 0.0  ;;  %v8104_v61 = vmax.f32 %v483_v55, 0.0  ;;  %v8121_v2 = vld [vmem:[%s7977_s6 + $0x30] sm:$0xff] }
  0x50   : > { %6800 = vmatmul.mubr.msk.f32.gmra.mrb[2].mxu0 %vm597_vm0, %v8021_v31  ;;  %6458 = vmatprep.mubr.msk.f32.mxu1 %vm597_vm0, %v7981_v10  ;;  %v8078_v50 = vsel %vm1883_vm1, %v1899_v40, %v1900_v43  ;;  %v8095_v56 = vsel %vm1883_vm1, %v1900_v43, %v1899_v40  ;;  %v1905_v59 = vrot.slane %v8075_v49, 1  ;;  %v1906_v60 = vrot.slane %v8082_v53, 1  ;;  %v486_v13 = vld [vmem:[%s7960_s3 + $0xa0] sm:$0xff]  ;;  %v487_v14 = vld [vmem:[%s7960_s3 + $0xa8] sm:$0xff]  ;;  %v488_v21 = vld [vmem:[%s7960_s3 + $0xb0] sm:$0xff] }
  0x51   : > { %6802 = vmatprep.mubr.msk.f32.mxu0 %vm597_vm0, %v8028_v33  ;;  %6966 = vmatprep.subr.mxu0 %v8051_v41  ;;  %10109 = vst [vmem:[#allocation12_spill] sm:$0xff] %v8078_v50  ;;  %10110 = vst [vmem:[#allocation13_spill] sm:$0xff] %v8095_v56  ;;  %v8100_v58 = vsel %vm1883_vm1, %v1902_v51, %v1903_v52  ;;  %v8117_v0 = vsel %vm1883_vm1, %v1903_v52, %v1902_v51  ;;  %v1908_v1 = vrot.slane %v8097_v57, 1  ;;  %v489_v22 = vld [vmem:[%s7960_s3 + $0xb8] sm:$0xff]  ;;  %v490_v38 = vld [vmem:[%s7960_s3 + $0xc0] sm:$0xff] }
  0x52   : > { %10111 = vst [vmem:[#allocation14_spill] sm:$0xff] %v8100_v58  ;;  %10112 = vst [vmem:[#allocation15_spill] sm:$0xff] %v8117_v0  ;;  %v8124_v6 = vsel %vm1883_vm1, %v1905_v59, %v1906_v60  ;;  %v1909_v7 = vrot.slane %v8104_v61, 1  ;;  %v8127_v8 = vmax.f32 %v484_v62, 0.0  ;;  %v8129_v12 = vmax.f32 %v485_v63, 0.0  ;;  %6622 = vmatprep.subr.mxu1 %v8121_v2  ;;  %v491_v40 = vld [vmem:[%s7960_s3 + $0xc8] sm:$0xff] }
  0x53   : > { %6459 = vmatmul.mubr.msk.f32.gmra.mrb[4].mxu1 %vm597_vm0, %v7983_v11  ;;  %10113 = vst [vmem:[#allocation16_spill] sm:$0xff] %v8124_v6  ;;  %v8143_v15 = vsel %vm1883_vm1, %v1906_v60, %v1905_v59  ;;  %v8145_v16 = vmax.f32 %v486_v13, 0.0  ;;  %v8152_v20 = vmax.f32 %v487_v14, 0.0  ;;  %v8167_v28 = vmax.f32 %v488_v21, 0.0  ;;  %v492_v55 = vld [vmem:[%s7960_s3 + $0xd0] sm:$0xff]  ;;  %v493_v59 = vld [vmem:[%s7960_s3 + $0xd8] sm:$0xff] }
  0x54   : > { %6803 = vmatmul.mubr.msk.f32.gmra.mrb[4].mxu0 %vm597_vm0, %v8047_v39  ;;  %6461 = vmatprep.mubr.msk.f32.mxu1 %vm597_vm0, %v8005_v26  ;;  %10114 = vst [vmem:[#allocation17_spill] sm:$0xff] %v8143_v15  ;;  %v8148_v17 = vsel %vm1883_vm1, %v1908_v1, %v1909_v7  ;;  %v1911_v18 = vrot.slane %v8127_v8, 1  ;;  %v1912_v19 = vrot.slane %v8129_v12, 1  ;;  %v8165_v25 = vsel %vm1883_vm1, %v1909_v7, %v1908_v1  ;;  %v494_v14 = vld [vmem:[%s7960_s3 + $0xe0] sm:$0xff]  ;;  %v503_v23 = vld [vmem:[%s7960_s3 + $0x128] sm:$0xff] }
  0x55   : > { %6805 = vmatprep.mubr.msk.f32.mxu0 %vm597_vm0, %v8054_v42  ;;  %10115 = vst [vmem:[#allocation18_spill] sm:$0xff] %v8148_v17  ;;  %10116 = vst [vmem:[#allocation19_spill] sm:$0xff] %v8165_v25  ;;  %v1914_v34 = vrot.slane %v8145_v16, 1  ;;  %v1915_v35 = vrot.slane %v8152_v20, 1  ;;  %v8174_v37 = vmax.f32 %v489_v22, 0.0  ;;  %v8189_v46 = vmax.f32 %v490_v38, 0.0 }
  0x56   : > { %v8170_v29 = vsel %vm1883_vm1, %v1911_v18, %v1912_v19  ;;  %v8187_v43 = vsel %vm1883_vm1, %v1912_v19, %v1911_v18  ;;  %v1917_v51 = vrot.slane %v8167_v28, 1  ;;  %v8196_v54 = vmax.f32 %v491_v40, 0.0  ;;  %v495_v18 = vld [vmem:[%s7960_s3 + $0xe8] sm:$0xff] }
  0x57   : > { %6462 = vmatmul.mubr.msk.f32.gmra.mrb[6].mxu1 %vm597_vm0, %v8007_v27  ;;  %10117 = vst [vmem:[#allocation20_spill] sm:$0xff] %v8170_v29  ;;  %10118 = vst [vmem:[#allocation21_spill] sm:$0xff] %v8187_v43  ;;  %v8192_v47 = vsel %vm1883_vm1, %v1914_v34, %v1915_v35  ;;  %v1918_v52 = vrot.slane %v8174_v37, 1  ;;  %v8209_v60 = vsel %vm1883_vm1, %v1915_v35, %v1914_v34  ;;  %v1920_v62 = vrot.slane %v8189_v46, 1 }
  0x58   : > { %6806 = vmatmul.mubr.msk.f32.gmra.mrb[6].mxu0 %vm597_vm0, %v8073_v48  ;;  %6464 = vmatprep.mubr.msk.f32.mxu1 %vm597_vm0, %v8023_v32  ;;  %10119 = vst [vmem:[#allocation22_spill] sm:$0xff] %v8192_v47  ;;  %10120 = vst [vmem:[#allocation23_spill] sm:$0xff] %v8209_v60  ;;  %v1921_v1 = vrot.slane %v8196_v54, 1  ;;  %v8216_v7 = vmax.f32 %v492_v55, 0.0  ;;  %v8218_v13 = vmax.f32 %v493_v59, 0.0  ;;  %v8233_v21 = vmax.f32 %v494_v14, 0.0 }
  0x59   : > { %6808 = vmatprep.mubr.msk.f32.mxu0 %vm597_vm0, %v8078_v50  ;;  %v8213_v63 = vsel %vm1883_vm1, %v1917_v51, %v1918_v52  ;;  %v8231_v19 = vsel %vm1883_vm1, %v1918_v52, %v1917_v51  ;;  %v8240_v38 = vmax.f32 %v495_v18, 0.0  ;;  %v501_v18 = vld [vmem:[%s7960_s3 + $0x118] sm:$0xff] }
  0x5a   : > { %10121 = vst [vmem:[#allocation24_spill] sm:$0xff] %v8213_v63  ;;  %10122 = vst [vmem:[#allocation25_spill] sm:$0xff] %v8231_v19  ;;  %v8236_v22 = vsel %vm1883_vm1, %v1920_v62, %v1921_v1  ;;  %v1923_v34 = vrot.slane %v8216_v7, 1  ;;  %v1924_v35 = vrot.slane %v8218_v13, 1  ;;  %v8251_v40 = vsel %vm1883_vm1, %v1921_v1, %v1920_v62  ;;  %v500_v62 = vld [vmem:[%s7960_s3 + $0x110] sm:$0xff] }
  0x5b   : > { %6465 = vmatmul.mubr.msk.f32.gmra.mrb[8].mxu1 %vm597_vm0, %v8032_v36  ;;  %10123 = vst [vmem:[#allocation26_spill] sm:$0xff] %v8233_v21  ;;  %10124 = vst [vmem:[#allocation27_spill] sm:$0xff] %v8236_v22  ;;  %v1926_v52 = vrot.slane %v8233_v21, 1  ;;  %v1927_v55 = vrot.slane %v8240_v38, 1  ;;  %v8279_v14 = vmax.f32 %v500_v62, 0.0  ;;  %v8290_v24 = vmax.f32 %v501_v18, 0.0 }
  0x5c   : > { %6809 = vmatmul.mubr.msk.f32.gmra.mrb[8].mxu0 %vm597_vm0, %v8095_v56  ;;  %6467 = vmatprep.mubr.msk.f32.mxu1 %vm597_vm0, %v8057_v44  ;;  %10125 = vst [vmem:[#allocation28_spill] sm:$0xff] %v8240_v38  ;;  %10126 = vst [vmem:[#allocation29_spill] sm:$0xff] %v8251_v40  ;;  %v8254_v51 = vsel %vm1883_vm1, %v1923_v34, %v1924_v35  ;;  %v8267_v59 = vsel %vm1883_vm1, %v1924_v35, %v1923_v34  ;;  %v502_v35 = vld [vmem:[%s7960_s3 + $0x120] sm:$0xff]  ;;  %v8307_v18 = vld [vmem:[%s7977_s6 + $0x28] sm:$0xff] }
  0x5d   : > { %6811 = vmatprep.mubr.msk.f32.mxu0 %vm597_vm0, %v8100_v58  ;;  %10127 = vst [vmem:[#allocation30_spill] sm:$0xff] %v8254_v51  ;;  %10128 = vst [vmem:[#allocation31_spill] sm:$0xff] %v8267_v59  ;;  %v8271_v1 = vsel %vm1883_vm1, %v1926_v52, %v1927_v55  ;;  %v8285_v34 = vsel %vm1883_vm1, %v1927_v55, %v1926_v52  ;;  %v8296_v62 = vmax.f32 %v502_v35, 0.0  ;;  %v504_v52 = vld [vmem:[%s7960_s3 + $0x130] sm:$0xff]  ;;  %v8304_v55 = vmax.f32 %v503_v23, 0.0  ;;  %v506_v23 = vld [vmem:[%s7960_s3 + $0x140] sm:$0xff] }
  0x5e   : > { %10129 = vst [vmem:[#allocation32_spill] sm:$0xff] %v8279_v14  ;;  %10130 = vst [vmem:[#allocation33_spill] sm:$0xff] %v8290_v24  ;;  %v8313_v35 = vmax.f32 %v504_v52, 0.0  ;;  %v507_v52 = vld [vmem:[%s7960_s3 + $0x148] sm:$0xff] }
  0x5f   : > { %6468 = vmatmul.mubr.msk.f32.gmra.mrb[10].mxu1 %vm597_vm0, %v8059_v45  ;;  %10131 = vst [vmem:[#allocation34_spill] sm:$0xff] %v8296_v62  ;;  %10132 = vst [vmem:[#allocation35_spill] sm:$0xff] %v8304_v55 }
  0x60   : > { %6812 = vmatmul.mubr.msk.f32.gmra.mrb[10].mxu0 %vm597_vm0, %v8117_v0  ;;  %6470 = vmatprep.mubr.msk.f32.mxu1 %vm597_vm0, %v8075_v49  ;;  %10133 = vst [vmem:[#allocation36_spill] sm:$0xff] %v8307_v18 }
  0x61   : > { %6814 = vmatprep.mubr.msk.f32.mxu0 %vm597_vm0, %v8124_v6 }
  0x63   : > { %6471 = vmatmul.mubr.msk.f32.gmra.mrb[12].mxu1 %vm597_vm0, %v8082_v53 }
  0x64   : > { %6815 = vmatmul.mubr.msk.f32.gmra.mrb[12].mxu0 %vm597_vm0, %v8143_v15  ;;  %6473 = vmatprep.mubr.msk.f32.mxu1 %vm597_vm0, %v8097_v57 }
  0x65   : > { %6817 = vmatprep.mubr.msk.f32.mxu0 %vm597_vm0, %v8148_v17 }
  0x67   : > { %6474 = vmatmul.mubr.msk.f32.gmra.mrb[14].mxu1 %vm597_vm0, %v8104_v61 }
  0x68   : > { %6818 = vmatmul.mubr.msk.f32.gmra.mrb[14].mxu0 %vm597_vm0, %v8165_v25  ;;  %6476 = vmatprep.mubr.msk.f32.mxu1 %vm597_vm0, %v8127_v8 }
  0x69   : > { %6820 = vmatprep.mubr.msk.f32.mxu0 %vm597_vm0, %v8170_v29 }
  0x6b   : > { %6477 = vmatmul.mubr.msk.f32.gmra.mrb[16].mxu1 %vm597_vm0, %v8129_v12 }
  0x6c   : > { %6821 = vmatmul.mubr.msk.f32.gmra.mrb[16].mxu0 %vm597_vm0, %v8187_v43  ;;  %6479 = vmatprep.mubr.msk.f32.mxu1 %vm597_vm0, %v8145_v16 }
  0x6d   : > { %6823 = vmatprep.mubr.msk.f32.mxu0 %vm597_vm0, %v8192_v47 }
  0x6f   : > { %6480 = vmatmul.mubr.msk.f32.gmra.mrb[18].mxu1 %vm597_vm0, %v8152_v20 }
  0x70   : > { %6824 = vmatmul.mubr.msk.f32.gmra.mrb[18].mxu0 %vm597_vm0, %v8209_v60  ;;  %6482 = vmatprep.mubr.msk.f32.mxu1 %vm597_vm0, %v8167_v28 }
  0x71   : > { %6826 = vmatprep.mubr.msk.f32.mxu0 %vm597_vm0, %v8213_v63 }
  0x73   : > { %6483 = vmatmul.mubr.msk.f32.gmra.mrb[20].mxu1 %vm597_vm0, %v8174_v37 }
  0x74   : > { %6827 = vmatmul.mubr.msk.f32.gmra.mrb[20].mxu0 %vm597_vm0, %v8231_v19  ;;  %6485 = vmatprep.mubr.msk.f32.mxu1 %vm597_vm0, %v8189_v46 }
  0x75   : > { %6829 = vmatprep.mubr.msk.f32.mxu0 %vm597_vm0, %v8236_v22 }
  0x77   : > { %6486 = vmatmul.mubr.msk.f32.gmra.mrb[22].mxu1 %vm597_vm0, %v8196_v54 }
  0x78   : > { %6830 = vmatmul.mubr.msk.f32.gmra.mrb[22].mxu0 %vm597_vm0, %v8251_v40  ;;  %6488 = vmatprep.mubr.msk.f32.mxu1 %vm597_vm0, %v8216_v7 }
  0x79   : > { %6832 = vmatprep.mubr.msk.f32.mxu0 %vm597_vm0, %v8254_v51 }
  0x7b   : > { %6489 = vmatmul.mubr.msk.f32.gmra.mrb[24].mxu1 %vm597_vm0, %v8218_v13 }
  0x7c   : > { %6833 = vmatmul.mubr.msk.f32.gmra.mrb[24].mxu0 %vm597_vm0, %v8267_v59  ;;  %6491 = vmatprep.mubr.msk.f32.mxu1 %vm597_vm0, %v8233_v21  ;;  %v497_v21 = vld [vmem:[%s7960_s3 + $0xf8] sm:$0xff] }
  0x7d   : > { %6835 = vmatprep.mubr.msk.f32.mxu0 %vm597_vm0, %v8271_v1 }
  0x7f   : > { %6492 = vmatmul.mubr.msk.f32.gmra.mrb[26].mxu1 %vm597_vm0, %v8240_v38  ;;  %v505_v38 = vld [vmem:[%s7960_s3 + $0x138] sm:$0xff] }
  0x80   : > { %6836 = vmatmul.mubr.msk.f32.gmra.mrb[26].mxu0 %vm597_vm0, %v8285_v34  ;;  %6494 = vmatprep.mubr.msk.f32.mxu1 %vm597_vm0, %v8279_v14 }
  0x81   : > { %6882 = vmatprep.mubr.msk.f32.mxu0 %vm597_vm0, %v8018_v30 }
  0x83   : > { %6495 = vmatmul.mubr.msk.f32.gmra.mrb[28].mxu1 %vm597_vm0, %v8290_v24 }
  0x84   : > { %6883 = vmatmul.mubr.msk.f32.vlgmr.msra.gmra.mrb[0].mxu0 %vm597_vm0, %v8021_v31  ;;  %6497 = vmatprep.mubr.msk.f32.mxu1 %vm597_vm0, %v8296_v62  ;;  %v8323_v31 = vmax.f32 %v505_v38, 0.0  ;;  %v8337_v38 = vmax.f32 %v507_v52, 0.0 }
  0x85   : > { %6967 = vmatpush3.msra.mxu0 %v8051_v41  ;;  %6885 = vmatprep.mubr.msk.f32.mxu0 %vm597_vm0, %v8028_v33  ;;  %v8329_v41 = vmax.f32 %v506_v23, 0.0  ;;  %v508_v33 = vld [vmem:[%s7960_s3 + $0x150] sm:$0xff] }
  0x86   : > { %7052 = vmatprep.subr.mxu0 %v8307_v18  ;;  %v8343_v23 = vmax.f32 %v508_v33, 0.0  ;;  %v1942_v14 = vrot.slane %v8323_v31, 1 }
  0x87   : > { %6498 = vmatmul.mubr.msk.f32.gmra.mrb[30].mxu1 %vm597_vm0, %v8304_v55 }
  0x88   : > { %6886 = vmatmul.mubr.msk.f32.gmra.mrb[2].mxu0 %vm597_vm0, %v8047_v39  ;;  %6500 = vmatprep.mubr.msk.f32.mxu1 %vm597_vm0, %v8313_v35  ;;  %v509_v39 = vld [vmem:[%s7960_s3 + $0x158] sm:$0xff] }
  0x89   : > { %6888 = vmatprep.mubr.msk.f32.mxu0 %vm597_vm0, %v8054_v42  ;;  %v510_v42 = vld [vmem:[%s7960_s3 + $0x160] sm:$0xff]  ;;  %v8351_v52 = vmax.f32 %v509_v39, 0.0 }
  0x8a   : > { %v8357_v33 = vmax.f32 %v510_v42, 0.0 }
  0x8b   : > { %6501 = vmatmul.mubr.msk.f32.gmra.mrb[32].mxu1 %vm597_vm0, %v8323_v31 }
  0x8c   : > { %6889 = vmatmul.mubr.msk.f32.gmra.mrb[4].mxu0 %vm597_vm0, %v8073_v48  ;;  %6503 = vmatprep.mubr.msk.f32.mxu1 %vm597_vm0, %v8329_v41  ;;  %v511_v48 = vld [vmem:[%s7960_s3 + $0x168] sm:$0xff] }
  0x8d   : > { %6891 = vmatprep.mubr.msk.f32.mxu0 %vm597_vm0, %v8078_v50  ;;  %v512_v50 = vld [vmem:[%s7960_s3 + $0x170] sm:$0xff]  ;;  %v8365_v39 = vmax.f32 %v511_v48, 0.0 }
  0x8e   : > { %v8371_v42 = vmax.f32 %v512_v50, 0.0 }
  0x8f   : > { %6504 = vmatmul.mubr.msk.f32.gmra.mrb[34].mxu1 %vm597_vm0, %v8337_v38 }
  0x90   : > { %6892 = vmatmul.mubr.msk.f32.gmra.mrb[6].mxu0 %vm597_vm0, %v8095_v56  ;;  %6506 = vmatprep.mubr.msk.f32.mxu1 %vm597_vm0, %v8343_v23  ;;  %v513_v56 = vld [vmem:[%s7960_s3 + $0x178] sm:$0xff] }
  0x91   : > { %6894 = vmatprep.mubr.msk.f32.mxu0 %vm597_vm0, %v8100_v58  ;;  %v514_v58 = vld [vmem:[%s7960_s3 + $0x180] sm:$0xff]  ;;  %v8379_v48 = vmax.f32 %v513_v56, 0.0 }
  0x92   : > { %v8385_v50 = vmax.f32 %v514_v58, 0.0 }
  0x93   : > { %6507 = vmatmul.mubr.msk.f32.gmra.mrb[36].mxu1 %vm597_vm0, %v8351_v52 }
  0x94   : > { %6895 = vmatmul.mubr.msk.f32.gmra.mrb[8].mxu0 %vm597_vm0, %v8117_v0  ;;  %6509 = vmatprep.mubr.msk.f32.mxu1 %vm597_vm0, %v8357_v33  ;;  %v515_v0 = vld [vmem:[%s7960_s3 + $0x188] sm:$0xff] }
  0x95   : > { %6897 = vmatprep.mubr.msk.f32.mxu0 %vm597_vm0, %v8124_v6  ;;  %v516_v6 = vld [vmem:[%s7960_s3 + $0x190] sm:$0xff]  ;;  %v8393_v56 = vmax.f32 %v515_v0, 0.0 }
  0x96   : > { %v8399_v58 = vmax.f32 %v516_v6, 0.0 }
  0x97   : > { %6510 = vmatmul.mubr.msk.f32.gmra.mrb[38].mxu1 %vm597_vm0, %v8365_v39 }
  0x98   : > { %6898 = vmatmul.mubr.msk.f32.gmra.mrb[10].mxu0 %vm597_vm0, %v8143_v15  ;;  %6512 = vmatprep.mubr.msk.f32.mxu1 %vm597_vm0, %v8371_v42  ;;  %v517_v15 = vld [vmem:[%s7960_s3 + $0x198] sm:$0xff] }
  0x99   : > { %6900 = vmatprep.mubr.msk.f32.mxu0 %vm597_vm0, %v8148_v17  ;;  %v518_v17 = vld [vmem:[%s7960_s3 + $0x1a0] sm:$0xff]  ;;  %v8407_v0 = vmax.f32 %v517_v15, 0.0 }
  0x9a   : > { %v8413_v6 = vmax.f32 %v518_v17, 0.0 }
  0x9b   : > { %6513 = vmatmul.mubr.msk.f32.gmra.mrb[40].mxu1 %vm597_vm0, %v8379_v48 }
  0x9c   : > { %6901 = vmatmul.mubr.msk.f32.gmra.mrb[12].mxu0 %vm597_vm0, %v8165_v25  ;;  %6515 = vmatprep.mubr.msk.f32.mxu1 %vm597_vm0, %v8385_v50  ;;  %v519_v25 = vld [vmem:[%s7960_s3 + $0x1a8] sm:$0xff] }
  0x9d   : > { %6903 = vmatprep.mubr.msk.f32.mxu0 %vm597_vm0, %v8170_v29  ;;  %v520_v29 = vld [vmem:[%s7960_s3 + $0x1b0] sm:$0xff]  ;;  %v8421_v15 = vmax.f32 %v519_v25, 0.0 }
  0x9e   : > { %v8427_v17 = vmax.f32 %v520_v29, 0.0  ;;  %v496_v25 = vld [vmem:[%s7960_s3 + $0xf0] sm:$0xff] }
  0x9f   : > { %6516 = vmatmul.mubr.msk.f32.gmra.mrb[42].mxu1 %vm597_vm0, %v8393_v56  ;;  %v8449_v24 = vmax.f32 %v496_v25, 0.0 }
  0xa0   : > { %6904 = vmatmul.mubr.msk.f32.gmra.mrb[14].mxu0 %vm597_vm0, %v8187_v43  ;;  %6518 = vmatprep.mubr.msk.f32.mxu1 %vm597_vm0, %v8399_v58  ;;  %v521_v43 = vld [vmem:[%s7960_s3 + $0x1b8] sm:$0xff] }
  0xa1   : > { %6906 = vmatprep.mubr.msk.f32.mxu0 %vm597_vm0, %v8192_v47  ;;  %v522_v47 = vld [vmem:[%s7960_s3 + $0x1c0] sm:$0xff]  ;;  %v8435_v30 = vmax.f32 %v521_v43, 0.0  ;;  %10134 = vst [vmem:[#allocation37_spill] sm:$0xff] %v8449_v24  ;;  %v8451_v43 = vmax.f32 %v497_v21, 0.0  ;;  %v1929_v25 = vrot.slane %v8449_v24, 1  ;;  %v1938_v24 = vrot.slane %v8296_v62, 1 }
  0xa2   : > { %v8443_v29 = vmax.f32 %v522_v47, 0.0  ;;  %v526_v21 = vld [vmem:[%s7960_s3 + $0x1e0] sm:$0xff] }
  0xa3   : > { %6519 = vmatmul.mubr.msk.f32.gmra.mrb[44].mxu1 %vm597_vm0, %v8407_v0  ;;  %10135 = vst [vmem:[#allocation38_spill] sm:$0xff] %v8451_v43 }
  0xa4   : > { %6907 = vmatmul.mubr.msk.f32.gmra.mrb[16].mxu0 %vm597_vm0, %v8209_v60  ;;  %6521 = vmatprep.mubr.msk.f32.mxu1 %vm597_vm0, %v8413_v6  ;;  %v523_v60 = vld [vmem:[%s7960_s3 + $0x1c8] sm:$0xff] }
  0xa5   : > { %6909 = vmatprep.mubr.msk.f32.mxu0 %vm597_vm0, %v8213_v63  ;;  %v524_v63 = vld [vmem:[%s7960_s3 + $0x1d0] sm:$0xff]  ;;  %v8455_v18 = vmax.f32 %v523_v60, 0.0 }
  0xa6   : > { %v8461_v47 = vmax.f32 %v524_v63, 0.0  ;;  %v8477_v63 = vmax.f32 %v526_v21, 0.0 }
  0xa7   : > { %6522 = vmatmul.mubr.msk.f32.gmra.mrb[46].mxu1 %vm597_vm0, %v8421_v15 }
  0xa8   : > { %6910 = vmatmul.mubr.msk.f32.gmra.mrb[18].mxu0 %vm597_vm0, %v8231_v19  ;;  %6524 = vmatprep.mubr.msk.f32.mxu1 %vm597_vm0, %v8427_v17  ;;  %v1930_v19 = vrot.slane %v8451_v43, 1  ;;  %10137 = vst [vmem:[#allocation40_spill] sm:$0xff] %v8477_v63 }
  0xa9   : > { %6912 = vmatprep.mubr.msk.f32.mxu0 %vm597_vm0, %v8236_v22  ;;  %v525_v22 = vld [vmem:[%s7960_s3 + $0x1d8] sm:$0xff] }
  0xaa   : > { %v8471_v60 = vmax.f32 %v525_v22, 0.0  ;;  %v1931_v43 = vsel %vm1883_vm1, %v1929_v25, %v1930_v19  ;;  %v1939_v22 = vrot.slane %v8304_v55, 1  ;;  %v2059_v62 = vsel %vm1883_vm1, %v1930_v19, %v1929_v25 }
  0xab   : > { %6525 = vmatmul.mubr.msk.f32.gmra.mrb[48].mxu1 %vm597_vm0, %v8435_v30  ;;  %v1945_v25 = vrot.slane %v8337_v38, 1 }
  0xac   : > { %6913 = vmatmul.mubr.msk.f32.gmra.mrb[20].mxu0 %vm597_vm0, %v8251_v40  ;;  %6527 = vmatprep.mubr.msk.f32.mxu1 %vm597_vm0, %v8443_v29  ;;  %10136 = vst [vmem:[#allocation39_spill] sm:$0xff] %v8471_v60  ;;  %v466_v40 = vld [vmem:[%s7960_s3] sm:$0xff]  ;;  %v8500_v55 = vsel %vm1883_vm1, %v1938_v24, %v1939_v22  ;;  %v8514_v19 = vsel %vm1883_vm1, %v1939_v22, %v1938_v24 }
  0xad   : > { %6915 = vmatprep.mubr.msk.f32.mxu0 %vm597_vm0, %v8254_v51  ;;  %v527_v51 = vld [vmem:[%s7960_s3 + $0x1e8] sm:$0xff]  ;;  %v8494_v21 = vmax.f32 %v466_v40, 0.0  ;;  %10140 = vst [vmem:[#allocation43_spill] sm:$0xff] %v8500_v55  ;;  %10142 = vst [vmem:[#allocation45_spill] sm:$0xff] %v8514_v19 }
  0xaf   : > { %6528 = vmatmul.mubr.msk.f32.gmra.mrb[50].mxu1 %vm597_vm0, %v8455_v18  ;;  %10139 = vst [vmem:[#allocation42_spill] sm:$0xff] %v8494_v21 }
  0xb0   : > { %6916 = vmatmul.mubr.msk.f32.gmra.mrb[22].mxu0 %vm597_vm0, %v8267_v59  ;;  %6530 = vmatprep.mubr.msk.f32.mxu1 %vm597_vm0, %v8461_v47  ;;  %v8488_v59 = vmax.f32 %v527_v51, 0.0  ;;  %v1941_v51 = vrot.slane %v8313_v35, 1 }
  0xb1   : > { %6918 = vmatprep.mubr.msk.f32.mxu0 %vm597_vm0, %v8271_v1  ;;  %v467_v1 = vld [vmem:[%s7960_s3 + $0x8] sm:$0xff] }
  0xb2   : > { %10138 = vst [vmem:[#allocation41_spill] sm:$0xff] %v8488_v59  ;;  %v8517_v40 = vsel %vm1883_vm1, %v1941_v51, %v1942_v14  ;;  %v8534_v24 = vsel %vm1883_vm1, %v1942_v14, %v1941_v51  ;;  %v1950_v51 = vrot.slane %v8357_v33, 1 }
  0xb3   : > { %6531 = vmatmul.mubr.msk.f32.gmra.mrb[52].mxu1 %vm597_vm0, %v8471_v60  ;;  %10143 = vst [vmem:[#allocation46_spill] sm:$0xff] %v8517_v40  ;;  %10145 = vst [vmem:[#allocation48_spill] sm:$0xff] %v8534_v24 }
  0xb4   : > { %6919 = vmatmul.mubr.msk.f32.gmra.mrb[24].mxu0 %vm597_vm0, %v8285_v34  ;;  %6533 = vmatprep.mubr.msk.f32.mxu1 %vm597_vm0, %v8477_v63  ;;  %v8506_v34 = vmax.f32 %v467_v1, 0.0  ;;  %v1947_v1 = vrot.slane %v8343_v23, 1 }
  0xb5   : > { %6921 = vmatprep.mubr.msk.f32.mxu0 %vm597_vm0, %v1931_v43  ;;  %v1944_v43 = vrot.slane %v8329_v41, 1 }
  0xb6   : > { %10141 = vst [vmem:[#allocation44_spill] sm:$0xff] %v8506_v34 }
  0xb7   : > { %6534 = vmatmul.mubr.msk.f32.gmra.mrb[54].mxu1 %vm597_vm0, %v8488_v59  ;;  %v8537_v22 = vsel %vm1883_vm1, %v1944_v43, %v1945_v25 }
  0xb8   : > { %6922 = vmatmul.mubr.msk.f32.gmra.mrb[26].mxu0 %vm597_vm0, %v2059_v62  ;;  %6538 = vmatprep.mubr.msk.f32.mxu1 %vm597_vm0, %v8494_v21  ;;  %v8524_v62 = vld [vmem:[%s7977_s6 + $0x8] sm:$0xff]  ;;  %10146 = vst [vmem:[#allocation49_spill] sm:$0xff] %v8537_v22 }
  0xb9   : > { %6924 = vmatprep.mubr.msk.f32.mxu0 %vm597_vm0, %v8500_v55  ;;  %10144 = vst [vmem:[#allocation47_spill] sm:$0xff] %v8524_v62  ;;  %v1948_v55 = vrot.slane %v8351_v52, 1 }
  0xbb   : > { %6539 = vmatmul.mubr.msk.f32.vlgmr.msra.gmra.mrb[0].mxu1 %vm597_vm0, %v8506_v34  ;;  %v8554_v14 = vsel %vm1883_vm1, %v1947_v1, %v1948_v55 }
  0xbc   : > { %6925 = vmatmul.mubr.msk.f32.gmra.mrb[28].mxu0 %vm597_vm0, %v8514_v19  ;;  %6623 = vmatpush3.msra.mxu1 %v8121_v2  ;;  %v8551_v2 = vsel %vm1883_vm1, %v1945_v25, %v1944_v43  ;;  %10148 = vst [vmem:[#allocation51_spill] sm:$0xff] %v8554_v14  ;;  %v8567_v43 = vsel %vm1883_vm1, %v1948_v55, %v1947_v1  ;;  %v529_v19 = vld [vmem:[%s7960_s3 + $0x1f8] sm:$0xff] }
  0xbd   : > { %6541 = vmatprep.mubr.msk.f32.mxu1 %vm597_vm0, %v7965_v3  ;;  %6927 = vmatprep.mubr.msk.f32.mxu0 %vm597_vm0, %v8517_v40  ;;  %10147 = vst [vmem:[#allocation50_spill] sm:$0xff] %v8551_v2  ;;  %v1951_v40 = vrot.slane %v8365_v39, 1  ;;  %10149 = vst [vmem:[#allocation52_spill] sm:$0xff] %v8567_v43 }
  0xbe   : > { %6708 = vmatprep.subr.mxu1 %v8524_v62  ;;  %v1975_v62 = vrot.slane %v8488_v59, 1  ;;  %v3458_v59 = vrot.slane %v8005_v26, 2 }
  0xbf   : > { %6542 = vmatmul.mubr.msk.f32.gmra.mrb[2].mxu1 %vm597_vm0, %v7967_v4  ;;  %v8570_v25 = vsel %vm1883_vm1, %v1950_v51, %v1951_v40  ;;  %v8583_v55 = vsel %vm1883_vm1, %v1951_v40, %v1950_v51 }
  0xc0   : > { %6928 = vmatmul.mubr.msk.f32.gmra.mrb[30].mxu0 %vm597_vm0, %v8534_v24  ;;  %6544 = vmatprep.mubr.msk.f32.mxu1 %vm597_vm0, %v7969_v5  ;;  %10150 = vst [vmem:[#allocation53_spill] sm:$0xff] %v8570_v25  ;;  %v1954_v24 = vrot.slane %v8379_v48, 1  ;;  %10151 = vst [vmem:[#allocation54_spill] sm:$0xff] %v8583_v55 }
  0xc1   : > { %6930 = vmatprep.mubr.msk.f32.mxu0 %vm597_vm0, %v8537_v22  ;;  %v1953_v22 = vrot.slane %v8371_v42, 1 }
  0xc3   : > { %6545 = vmatmul.mubr.msk.f32.gmra.mrb[4].mxu1 %vm597_vm0, %v7979_v9  ;;  %v8586_v1 = vsel %vm1883_vm1, %v1953_v22, %v1954_v24  ;;  %v8599_v40 = vsel %vm1883_vm1, %v1954_v24, %v1953_v22 }
  0xc4   : > { %6931 = vmatmul.mubr.msk.f32.gmra.mrb[32].mxu0 %vm597_vm0, %v8551_v2  ;;  %6547 = vmatprep.mubr.msk.f32.mxu1 %vm597_vm0, %v7981_v10  ;;  %10152 = vst [vmem:[#allocation55_spill] sm:$0xff] %v8586_v1  ;;  %v1957_v2 = vrot.slane %v8393_v56, 1  ;;  %10153 = vst [vmem:[#allocation56_spill] sm:$0xff] %v8599_v40 }
  0xc5   : > { %6933 = vmatprep.mubr.msk.f32.mxu0 %vm597_vm0, %v8554_v14  ;;  %v1956_v14 = vrot.slane %v8385_v50, 1 }
  0xc7   : > { %6548 = vmatmul.mubr.msk.f32.gmra.mrb[6].mxu1 %vm597_vm0, %v7983_v11  ;;  %v8602_v51 = vsel %vm1883_vm1, %v1956_v14, %v1957_v2  ;;  %v8615_v24 = vsel %vm1883_vm1, %v1957_v2, %v1956_v14 }
  0xc8   : > { %6934 = vmatmul.mubr.msk.f32.gmra.mrb[34].mxu0 %vm597_vm0, %v8567_v43  ;;  %6550 = vmatprep.mubr.msk.f32.mxu1 %vm597_vm0, %v8005_v26  ;;  %10154 = vst [vmem:[#allocation57_spill] sm:$0xff] %v8602_v51  ;;  %v1960_v43 = vrot.slane %v8407_v0, 1  ;;  %10155 = vst [vmem:[#allocation58_spill] sm:$0xff] %v8615_v24 }
  0xc9   : > { %6936 = vmatprep.mubr.msk.f32.mxu0 %vm597_vm0, %v8570_v25  ;;  %v1959_v25 = vrot.slane %v8399_v58, 1 }
  0xcb   : > { %6551 = vmatmul.mubr.msk.f32.gmra.mrb[8].mxu1 %vm597_vm0, %v8007_v27  ;;  %v8618_v22 = vsel %vm1883_vm1, %v1959_v25, %v1960_v43  ;;  %v8631_v2 = vsel %vm1883_vm1, %v1960_v43, %v1959_v25 }
  0xcc   : > { %6937 = vmatmul.mubr.msk.f32.gmra.mrb[36].mxu0 %vm597_vm0, %v8583_v55  ;;  %6553 = vmatprep.mubr.msk.f32.mxu1 %vm597_vm0, %v8023_v32  ;;  %10156 = vst [vmem:[#allocation59_spill] sm:$0xff] %v8618_v22  ;;  %v1963_v55 = vrot.slane %v8421_v15, 1  ;;  %10157 = vst [vmem:[#allocation60_spill] sm:$0xff] %v8631_v2 }
  0xcd   : > { %6939 = vmatprep.mubr.msk.f32.mxu0 %vm597_vm0, %v8586_v1  ;;  %v1962_v1 = vrot.slane %v8413_v6, 1 }
  0xcf   : > { %6554 = vmatmul.mubr.msk.f32.gmra.mrb[10].mxu1 %vm597_vm0, %v8032_v36  ;;  %v8634_v14 = vsel %vm1883_vm1, %v1962_v1, %v1963_v55  ;;  %v8647_v43 = vsel %vm1883_vm1, %v1963_v55, %v1962_v1 }
  0xd0   : > { %6940 = vmatmul.mubr.msk.f32.gmra.mrb[38].mxu0 %vm597_vm0, %v8599_v40  ;;  %6556 = vmatprep.mubr.msk.f32.mxu1 %vm597_vm0, %v8057_v44  ;;  %10158 = vst [vmem:[#allocation61_spill] sm:$0xff] %v8634_v14  ;;  %v1966_v40 = vrot.slane %v8435_v30, 1  ;;  %10159 = vst [vmem:[#allocation62_spill] sm:$0xff] %v8647_v43 }
  0xd1   : > { %6942 = vmatprep.mubr.msk.f32.mxu0 %vm597_vm0, %v8602_v51  ;;  %v1965_v51 = vrot.slane %v8427_v17, 1 }
  0xd3   : > { %6557 = vmatmul.mubr.msk.f32.gmra.mrb[12].mxu1 %vm597_vm0, %v8059_v45  ;;  %v8650_v25 = vsel %vm1883_vm1, %v1965_v51, %v1966_v40  ;;  %v8663_v55 = vsel %vm1883_vm1, %v1966_v40, %v1965_v51  ;;  %v1974_v51 = vrot.slane %v8477_v63, 1  ;;  %v3461_v63 = vrot.slane %v8023_v32, 2 }
  0xd4   : > { %6943 = vmatmul.mubr.msk.f32.gmra.mrb[40].mxu0 %vm597_vm0, %v8615_v24  ;;  %6559 = vmatprep.mubr.msk.f32.mxu1 %vm597_vm0, %v8075_v49  ;;  %10160 = vst [vmem:[#allocation63_spill] sm:$0xff] %v8650_v25  ;;  %v1969_v24 = vrot.slane %v8455_v18, 1  ;;  %10161 = vst [vmem:[#allocation64_spill] sm:$0xff] %v8663_v55 }
  0xd5   : > { %6945 = vmatprep.mubr.msk.f32.mxu0 %vm597_vm0, %v8618_v22  ;;  %v1968_v22 = vrot.slane %v8443_v29, 1 }
  0xd7   : > { %6560 = vmatmul.mubr.msk.f32.gmra.mrb[14].mxu1 %vm597_vm0, %v8082_v53  ;;  %v8666_v1 = vsel %vm1883_vm1, %v1968_v22, %v1969_v24  ;;  %v8681_v40 = vsel %vm1883_vm1, %v1969_v24, %v1968_v22  ;;  %v8704_v22 = vsel %vm1883_vm1, %v1974_v51, %v1975_v62 }
  0xd8   : > { %6946 = vmatmul.mubr.msk.f32.gmra.mrb[42].mxu0 %vm597_vm0, %v8631_v2  ;;  %6562 = vmatprep.mubr.msk.f32.mxu1 %vm597_vm0, %v8097_v57  ;;  %10162 = vst [vmem:[#allocation65_spill] sm:$0xff] %v8666_v1  ;;  %v1972_v2 = vrot.slane %v8471_v60, 1  ;;  %10163 = vst [vmem:[#allocation66_spill] sm:$0xff] %v8681_v40 }
  0xd9   : > { %6948 = vmatprep.mubr.msk.f32.mxu0 %vm597_vm0, %v8634_v14  ;;  %v1971_v14 = vrot.slane %v8461_v47, 1  ;;  %10168 = vst [vmem:[#allocation71_spill] sm:$0xff] %v8704_v22 }
  0xdb   : > { %6563 = vmatmul.mubr.msk.f32.gmra.mrb[16].mxu1 %vm597_vm0, %v8104_v61  ;;  %v8701_v24 = vsel %vm1883_vm1, %v1972_v2, %v1971_v14 }
  0xdc   : > { %6949 = vmatmul.mubr.msk.f32.gmra.mrb[44].mxu0 %vm597_vm0, %v8647_v43  ;;  %6565 = vmatprep.mubr.msk.f32.mxu1 %vm597_vm0, %v8127_v8  ;;  %v528_v43 = vld [vmem:[%s7960_s3 + $0x1f0] sm:$0xff]  ;;  %10167 = vst [vmem:[#allocation70_spill] sm:$0xff] %v8701_v24 }
  0xdd   : > { %6951 = vmatprep.mubr.msk.f32.mxu0 %vm597_vm0, %v8650_v25  ;;  %v8685_v25 = vsel %vm1883_vm1, %v1971_v14, %v1972_v2  ;;  %v8688_v60 = vmax.f32 %v528_v43, 0.0  ;;  %v8717_v2 = vsel %vm1883_vm1, %v1975_v62, %v1974_v51  ;;  %v498_v14 = vld [vmem:[%s7960_s3 + $0x100] sm:$0xff]  ;;  %v499_v62 = vld [vmem:[%s7960_s3 + $0x108] sm:$0xff] }
  0xde   : > { %10164 = vst [vmem:[#allocation67_spill] sm:$0xff] %v8685_v25  ;;  %10169 = vst [vmem:[#allocation72_spill] sm:$0xff] %v8717_v2 }
  0xdf   : > { %6566 = vmatmul.mubr.msk.f32.gmra.mrb[18].mxu1 %vm597_vm0, %v8129_v12  ;;  %10165 = vst [vmem:[#allocation68_spill] sm:$0xff] %v8688_v60 }
  0xe0   : > { %6952 = vmatmul.mubr.msk.f32.gmra.mrb[46].mxu0 %vm597_vm0, %v8663_v55  ;;  %6568 = vmatprep.mubr.msk.f32.mxu1 %vm597_vm0, %v8145_v16  ;;  %v8690_v55 = vmax.f32 %v529_v19, 0.0  ;;  %v1977_v19 = vrot.slane %v8688_v60, 1  ;;  %v3450_v60 = vrot.slane %v7967_v4, 2  ;;  %v3453_v4 = vrot.slane %v7979_v9, 2 }
  0xe1   : > { %6954 = vmatprep.mubr.msk.f32.mxu0 %vm597_vm0, %v8666_v1  ;;  %v3447_v1 = vrot.slane %v8506_v34, 2  ;;  %v3459_v34 = vrot.slane %v8007_v27, 2 }
  0xe2   : > { %10166 = vst [vmem:[#allocation69_spill] sm:$0xff] %v8690_v55  ;;  %v1978_v43 = vrot.slane %v8690_v55, 1  ;;  %v3449_v55 = vrot.slane %v7965_v3, 2  ;;  %v3452_v3 = vrot.slane %v7969_v5, 2 }
  0xe3   : > { %6569 = vmatmul.mubr.msk.f32.gmra.mrb[20].mxu1 %vm597_vm0, %v8152_v20 }
  0xe4   : > { %6955 = vmatmul.mubr.msk.f32.gmra.mrb[48].mxu0 %vm597_vm0, %v8681_v40  ;;  %6571 = vmatprep.mubr.msk.f32.mxu1 %vm597_vm0, %v8167_v28  ;;  %v3446_v40 = vrot.slane %v8494_v21, 2  ;;  %v2075_v51 = vsel %vm1883_vm1, %v1978_v43, %v1977_v19  ;;  %v10179_v21 = vld [vmem:[#allocation35_spill] sm:$0xff] }
  0xe5   : > { %6957 = vmatprep.mubr.msk.f32.mxu0 %vm597_vm0, %v8685_v25  ;;  %v1979_v25 = vsel %vm1883_vm1, %v1977_v19, %v1978_v43  ;;  %v8747_v19 = vsel %vm3445_vm2, %v3449_v55, %v3450_v60  ;;  %v8754_v43 = vld [vmem:[%s7977_s6 + $0x40] sm:$0xff] }
  0xe7   : > { %6572 = vmatmul.mubr.msk.f32.gmra.mrb[22].mxu1 %vm597_vm0, %v8174_v37 }
  0xe8   : > { %6958 = vmatmul.mubr.msk.f32.gmra.mrb[50].mxu0 %vm597_vm0, %v8701_v24  ;;  %6574 = vmatprep.mubr.msk.f32.mxu1 %vm597_vm0, %v8189_v46  ;;  %v3448_v24 = vsel %vm3445_vm2, %v3446_v40, %v3447_v1 }
  0xe9   : > { %6960 = vmatprep.mubr.msk.f32.mxu0 %vm597_vm0, %v8704_v22  ;;  %v8729_v22 = vmax.f32 %v498_v14, 0.0  ;;  %v10172_v14 = vld [vmem:[#allocation32_spill] sm:$0xff] }
  0xeb   : > { %6575 = vmatmul.mubr.msk.f32.gmra.mrb[24].mxu1 %vm597_vm0, %v8196_v54  ;;  %10170 = vst [vmem:[#allocation73_spill] sm:$0xff] %v8729_v22 }
  0xec   : > { %6961 = vmatmul.mubr.msk.f32.gmra.mrb[52].mxu0 %vm597_vm0, %v8717_v2  ;;  %6577 = vmatprep.mubr.msk.f32.mxu1 %vm597_vm0, %v8216_v7  ;;  %v8739_v2 = vmax.f32 %v499_v62, 0.0  ;;  %v3455_v62 = vrot.slane %v7981_v10, 2 }
  0xed   : > { %6963 = vmatprep.mubr.msk.f32.mxu0 %vm597_vm0, %v1979_v25  ;;  %v3606_v25 = vsel %vm3445_vm2, %v3447_v1, %v3446_v40  ;;  %v8763_v1 = vsel %vm3445_vm2, %v3450_v60, %v3449_v55  ;;  %v8766_v40 = vsel %vm3445_vm2, %v3452_v3, %v3453_v4  ;;  %v8780_v60 = vsel %vm3445_vm2, %v3453_v4, %v3452_v3 }
  0xee   : > { %10171 = vst [vmem:[#allocation74_spill] sm:$0xff] %v8739_v2  ;;  %v8799_v4 = vsel %vm3445_vm2, %v3458_v59, %v3459_v34 }
  0xef   : > { %6578 = vmatmul.mubr.msk.f32.gmra.mrb[26].mxu1 %vm597_vm0, %v8218_v13  ;;  %10181 = vst [vmem:[#allocation76_spill] sm:$0xff] %v8799_v4 }
  0xf0   : > { %6964 = vmatmul.mubr.msk.f32.gmra.mrb[54].mxu0 %vm597_vm0, %v2075_v51  ;;  %6580 = vmatprep.mubr.msk.f32.mxu1 %vm597_vm0, %v8729_v22  ;;  %v3456_v51 = vrot.slane %v7983_v11, 2 }
  0xf1   : > { %6968 = vmatprep.mubr.msk.f32.mxu0 %vm597_vm0, %v3448_v24  ;;  %v10173_v24 = vld [vmem:[#allocation36_spill] sm:$0xff] }
  0xf2   : > { %10174 = vst [vmem:[#allocation36_spill] sm:$0xff] %v8766_v40  ;;  %v8783_v55 = vsel %vm3445_vm2, %v3455_v62, %v3456_v51  ;;  %v8796_v3 = vsel %vm3445_vm2, %v3456_v51, %v3455_v62  ;;  %v8812_v62 = vsel %vm3445_vm2, %v3459_v34, %v3458_v59 }
  0xf3   : > { %6581 = vmatmul.mubr.msk.f32.gmra.mrb[28].mxu1 %vm597_vm0, %v8739_v2  ;;  %10178 = vst [vmem:[#allocation75_spill] sm:$0xff] %v8783_v55  ;;  %10180 = vst [vmem:[#allocation35_spill] sm:$0xff] %v8796_v3 }
  0xf4   : > { %6969 = vmatmul.mubr.msk.f32.vlgmr.msra.gmra.mrb[0].mxu0 %vm597_vm0, %v3606_v25  ;;  %6583 = vmatprep.mubr.msk.f32.mxu1 %vm597_vm0, %v10172_v14  ;;  %v10175_v25 = vld [vmem:[#allocation33_spill] sm:$0xff]  ;;  %10182 = vst [vmem:[#allocation77_spill] sm:$0xff] %v8812_v62 }
  0xf5   : > { %7053 = vmatpush3.msra.mxu0 %v10173_v24  ;;  %6971 = vmatprep.mubr.msk.f32.mxu0 %vm597_vm0, %v8747_v19  ;;  %v10176_v24 = vld [vmem:[#allocation34_spill] sm:$0xff] }
  0xf6   : > { %7138 = vmatprep.subr.mxu0 %v8754_v43  ;;  %10177 = vst [vmem:[#allocation34_spill] sm:$0xff] %v8780_v60 }
  0xf7   : > { %6584 = vmatmul.mubr.msk.f32.gmra.mrb[30].mxu1 %vm597_vm0, %v10175_v25 }
  0xf8   : > { %6972 = vmatmul.mubr.msk.f32.gmra.mrb[2].mxu0 %vm597_vm0, %v8763_v1  ;;  %6586 = vmatprep.mubr.msk.f32.mxu1 %vm597_vm0, %v10176_v24 }
  0xf9   : > { %6974 = vmatprep.mubr.msk.f32.mxu0 %vm597_vm0, %v8766_v40  ;;  %v3462_v40 = vrot.slane %v8032_v36, 2 }
  0xfb   : > { %6587 = vmatmul.mubr.msk.f32.gmra.mrb[32].mxu1 %vm597_vm0, %v10179_v21  ;;  %v8815_v51 = vsel %vm3445_vm2, %v3461_v63, %v3462_v40  ;;  %v8828_v59 = vsel %vm3445_vm2, %v3462_v40, %v3461_v63 }
  0xfc   : > { %6975 = vmatmul.mubr.msk.f32.gmra.mrb[4].mxu0 %vm597_vm0, %v8780_v60  ;;  %6589 = vmatprep.mubr.msk.f32.mxu1 %vm597_vm0, %v8313_v35  ;;  %10183 = vst [vmem:[#allocation78_spill] sm:$0xff] %v8815_v51  ;;  %v3465_v60 = vrot.slane %v8059_v45, 2  ;;  %10184 = vst [vmem:[#allocation79_spill] sm:$0xff] %v8828_v59 }
  0xfd   : > { %6977 = vmatprep.mubr.msk.f32.mxu0 %vm597_vm0, %v8783_v55  ;;  %v3464_v55 = vrot.slane %v8057_v44, 2 }
  0xff   : > { %6590 = vmatmul.mubr.msk.f32.gmra.mrb[34].mxu1 %vm597_vm0, %v8323_v31  ;;  %v8831_v34 = vsel %vm3445_vm2, %v3464_v55, %v3465_v60  ;;  %v8844_v63 = vsel %vm3445_vm2, %v3465_v60, %v3464_v55 }
 0x100   : > { %6978 = vmatmul.mubr.msk.f32.gmra.mrb[6].mxu0 %vm597_vm0, %v8796_v3  ;;  %6592 = vmatprep.mubr.msk.f32.mxu1 %vm597_vm0, %v8329_v41  ;;  %10185 = vst [vmem:[#allocation80_spill] sm:$0xff] %v8831_v34  ;;  %v3468_v3 = vrot.slane %v8082_v53, 2  ;;  %10186 = vst [vmem:[#allocation81_spill] sm:$0xff] %v8844_v63 }
 0x101   : > { %6980 = vmatprep.mubr.msk.f32.mxu0 %vm597_vm0, %v8799_v4  ;;  %v3467_v4 = vrot.slane %v8075_v49, 2 }
 0x103   : > { %6593 = vmatmul.mubr.msk.f32.gmra.mrb[36].mxu1 %vm597_vm0, %v8337_v38  ;;  %v8847_v40 = vsel %vm3445_vm2, %v3467_v4, %v3468_v3  ;;  %v8860_v60 = vsel %vm3445_vm2, %v3468_v3, %v3467_v4 }
 0x104   : > { %6981 = vmatmul.mubr.msk.f32.gmra.mrb[8].mxu0 %vm597_vm0, %v8812_v62  ;;  %6595 = vmatprep.mubr.msk.f32.mxu1 %vm597_vm0, %v8343_v23  ;;  %10187 = vst [vmem:[#allocation82_spill] sm:$0xff] %v8847_v40  ;;  %v3471_v62 = vrot.slane %v8104_v61, 2  ;;  %10188 = vst [vmem:[#allocation83_spill] sm:$0xff] %v8860_v60 }
 0x105   : > { %6983 = vmatprep.mubr.msk.f32.mxu0 %vm597_vm0, %v8815_v51  ;;  %v3470_v51 = vrot.slane %v8097_v57, 2 }
 0x107   : > { %6596 = vmatmul.mubr.msk.f32.gmra.mrb[38].mxu1 %vm597_vm0, %v8351_v52  ;;  %v8863_v55 = vsel %vm3445_vm2, %v3470_v51, %v3471_v62  ;;  %v8876_v3 = vsel %vm3445_vm2, %v3471_v62, %v3470_v51 }
 0x108   : > { %6984 = vmatmul.mubr.msk.f32.gmra.mrb[10].mxu0 %vm597_vm0, %v8828_v59  ;;  %6598 = vmatprep.mubr.msk.f32.mxu1 %vm597_vm0, %v8357_v33  ;;  %10189 = vst [vmem:[#allocation84_spill] sm:$0xff] %v8863_v55  ;;  %v3474_v59 = vrot.slane %v8129_v12, 2  ;;  %10190 = vst [vmem:[#allocation85_spill] sm:$0xff] %v8876_v3 }
 0x109   : > { %6986 = vmatprep.mubr.msk.f32.mxu0 %vm597_vm0, %v8831_v34  ;;  %v3473_v34 = vrot.slane %v8127_v8, 2 }
 0x10b   : > { %6599 = vmatmul.mubr.msk.f32.gmra.mrb[40].mxu1 %vm597_vm0, %v8365_v39  ;;  %v8879_v4 = vsel %vm3445_vm2, %v3473_v34, %v3474_v59  ;;  %v8892_v62 = vsel %vm3445_vm2, %v3474_v59, %v3473_v34 }
 0x10c   : > { %6987 = vmatmul.mubr.msk.f32.gmra.mrb[12].mxu0 %vm597_vm0, %v8844_v63  ;;  %6601 = vmatprep.mubr.msk.f32.mxu1 %vm597_vm0, %v8371_v42  ;;  %10191 = vst [vmem:[#allocation86_spill] sm:$0xff] %v8879_v4  ;;  %v3477_v63 = vrot.slane %v8152_v20, 2  ;;  %10192 = vst [vmem:[#allocation87_spill] sm:$0xff] %v8892_v62 }
 0x10d   : > { %6989 = vmatprep.mubr.msk.f32.mxu0 %vm597_vm0, %v8847_v40  ;;  %v3476_v40 = vrot.slane %v8145_v16, 2 }
 0x10f   : > { %6602 = vmatmul.mubr.msk.f32.gmra.mrb[42].mxu1 %vm597_vm0, %v8379_v48  ;;  %v8895_v51 = vsel %vm3445_vm2, %v3476_v40, %v3477_v63  ;;  %v8908_v59 = vsel %vm3445_vm2, %v3477_v63, %v3476_v40 }
 0x110   : > { %6990 = vmatmul.mubr.msk.f32.gmra.mrb[14].mxu0 %vm597_vm0, %v8860_v60  ;;  %6604 = vmatprep.mubr.msk.f32.mxu1 %vm597_vm0, %v8385_v50  ;;  %10193 = vst [vmem:[#allocation88_spill] sm:$0xff] %v8895_v51  ;;  %v3480_v60 = vrot.slane %v8174_v37, 2  ;;  %10194 = vst [vmem:[#allocation89_spill] sm:$0xff] %v8908_v59 }
 0x111   : > { %6992 = vmatprep.mubr.msk.f32.mxu0 %vm597_vm0, %v8863_v55  ;;  %v3479_v55 = vrot.slane %v8167_v28, 2 }
 0x113   : > { %6605 = vmatmul.mubr.msk.f32.gmra.mrb[44].mxu1 %vm597_vm0, %v8393_v56  ;;  %v8911_v34 = vsel %vm3445_vm2, %v3479_v55, %v3480_v60  ;;  %v8924_v63 = vsel %vm3445_vm2, %v3480_v60, %v3479_v55 }
 0x114   : > { %6993 = vmatmul.mubr.msk.f32.gmra.mrb[16].mxu0 %vm597_vm0, %v8876_v3  ;;  %6607 = vmatprep.mubr.msk.f32.mxu1 %vm597_vm0, %v8399_v58  ;;  %10195 = vst [vmem:[#allocation90_spill] sm:$0xff] %v8911_v34  ;;  %v3483_v3 = vrot.slane %v8196_v54, 2 }
 0x115   : > { %6995 = vmatprep.mubr.msk.f32.mxu0 %vm597_vm0, %v8879_v4  ;;  %v3482_v4 = vrot.slane %v8189_v46, 2 }
 0x117   : > { %6608 = vmatmul.mubr.msk.f32.gmra.mrb[46].mxu1 %vm597_vm0, %v8407_v0  ;;  %v8927_v40 = vsel %vm3445_vm2, %v3482_v4, %v3483_v3  ;;  %v8940_v60 = vsel %vm3445_vm2, %v3483_v3, %v3482_v4 }
 0x118   : > { %6996 = vmatmul.mubr.msk.f32.gmra.mrb[18].mxu0 %vm597_vm0, %v8892_v62  ;;  %6610 = vmatprep.mubr.msk.f32.mxu1 %vm597_vm0, %v8413_v6  ;;  %10196 = vst [vmem:[#allocation91_spill] sm:$0xff] %v8927_v40  ;;  %v3486_v62 = vrot.slane %v8218_v13, 2 }
 0x119   : > { %6998 = vmatprep.mubr.msk.f32.mxu0 %vm597_vm0, %v8895_v51  ;;  %v3485_v51 = vrot.slane %v8216_v7, 2 }
 0x11b   : > { %6611 = vmatmul.mubr.msk.f32.gmra.mrb[48].mxu1 %vm597_vm0, %v8421_v15  ;;  %v8943_v55 = vsel %vm3445_vm2, %v3485_v51, %v3486_v62  ;;  %v8956_v3 = vsel %vm3445_vm2, %v3486_v62, %v3485_v51 }
 0x11c   : > { %6999 = vmatmul.mubr.msk.f32.gmra.mrb[20].mxu0 %vm597_vm0, %v8908_v59  ;;  %6613 = vmatprep.mubr.msk.f32.mxu1 %vm597_vm0, %v8427_v17  ;;  %v3495_v59 = vrot.slane %v8739_v2, 2  ;;  %10197 = vst [vmem:[#allocation92_spill] sm:$0xff] %v8956_v3  ;;  %v3498_v2 = vrot.slane %v10175_v25, 2  ;;  %v3501_v25 = vrot.slane %v10179_v21, 2 }
 0x11d   : > { %7001 = vmatprep.mubr.msk.f32.mxu0 %vm597_vm0, %v8911_v34  ;;  %v3494_v34 = vrot.slane %v8729_v22, 2  ;;  %v3497_v22 = vrot.slane %v10172_v14, 2  ;;  %v3500_v14 = vrot.slane %v10176_v24, 2 }
 0x11f   : > { %6614 = vmatmul.mubr.msk.f32.gmra.mrb[50].mxu1 %vm597_vm0, %v8435_v30  ;;  %v3496_v4 = vsel %vm3445_vm2, %v3494_v34, %v3495_v59  ;;  %v3622_v62 = vsel %vm3445_vm2, %v3495_v59, %v3494_v34  ;;  %v8970_v51 = vsel %vm3445_vm2, %v3497_v22, %v3498_v2  ;;  %v8986_v59 = vsel %vm3445_vm2, %v3500_v14, %v3501_v25 }
 0x120   : > { %7002 = vmatmul.mubr.msk.f32.gmra.mrb[22].mxu0 %vm597_vm0, %v8924_v63  ;;  %6616 = vmatprep.mubr.msk.f32.mxu1 %vm597_vm0, %v8443_v29  ;;  %v3503_v34 = vrot.slane %v8313_v35, 2 }
 0x121   : > { %7004 = vmatprep.mubr.msk.f32.mxu0 %vm597_vm0, %v8927_v40  ;;  %v10198_v40 = vld [vmem:[#allocation39_spill] sm:$0xff] }
 0x123   : > { %6617 = vmatmul.mubr.msk.f32.gmra.mrb[52].mxu1 %vm597_vm0, %v8455_v18 }
 0x124   : > { %7005 = vmatmul.mubr.msk.f32.gmra.mrb[24].mxu0 %vm597_vm0, %v8940_v60  ;;  %6619 = vmatprep.mubr.msk.f32.mxu1 %vm597_vm0, %v8461_v47 }
 0x125   : > { %7007 = vmatprep.mubr.msk.f32.mxu0 %vm597_vm0, %v8943_v55 }
 0x127   : > { %6620 = vmatmul.mubr.msk.f32.gmra.mrb[54].mxu1 %vm597_vm0, %v10198_v40 }
 0x128   : > { %7008 = vmatmul.mubr.msk.f32.gmra.mrb[26].mxu0 %vm597_vm0, %v8956_v3  ;;  %6624 = vmatprep.mubr.msk.f32.mxu1 %vm597_vm0, %v7969_v5  ;;  %v10199_v3 = vld [vmem:[#allocation47_spill] sm:$0xff]  ;;  %v8983_v5 = vsel %vm3445_vm2, %v3498_v2, %v3497_v22  ;;  %v3506_v2 = vrot.slane %v8329_v41, 2 }
 0x129   : > { %7010 = vmatprep.mubr.msk.f32.mxu0 %vm597_vm0, %v3496_v4  ;;  %v8991_v4 = vld [vmem:[%s7977_s6 + $0x20] sm:$0xff] }
 0x12b   : > { %6625 = vmatmul.mubr.msk.f32.vlgmr.msra.gmra.mrb[0].mxu1 %vm597_vm0, %v7979_v9  ;;  %v3504_v9 = vrot.slane %v8323_v31, 2 }
 0x12c   : > { %7011 = vmatmul.mubr.msk.f32.gmra.mrb[28].mxu0 %vm597_vm0, %v3622_v62  ;;  %6709 = vmatpush3.msra.mxu1 %v10199_v3  ;;  %v3507_v3 = vrot.slane %v8337_v38, 2  ;;  %v3512_v62 = vrot.slane %v8357_v33, 2 }
 0x12d   : > { %6627 = vmatprep.mubr.msk.f32.mxu1 %vm597_vm0, %v7981_v10  ;;  %7013 = vmatprep.mubr.msk.f32.mxu0 %vm597_vm0, %v8970_v51  ;;  %v9003_v10 = vsel %vm3445_vm2, %v3501_v25, %v3500_v14  ;;  %v9006_v22 = vsel %vm3445_vm2, %v3503_v34, %v3504_v9  ;;  %v3509_v14 = vrot.slane %v8343_v23, 2  ;;  %v3510_v25 = vrot.slane %v8351_v52, 2 }
 0x12e   : > { %7224 = vmatprep.subr.mxu1 %v8991_v4 }
 0x12f   : > { %6628 = vmatmul.mubr.msk.f32.gmra.mrb[2].mxu1 %vm597_vm0, %v7983_v11  ;;  %v9019_v11 = vsel %vm3445_vm2, %v3504_v9, %v3503_v34  ;;  %v3513_v34 = vrot.slane %v8365_v39, 2  ;;  %v3515_v9 = vrot.slane %v8371_v42, 2 }
 0x130   : > { %7014 = vmatmul.mubr.msk.f32.gmra.mrb[30].mxu0 %vm597_vm0, %v8983_v5  ;;  %6630 = vmatprep.mubr.msk.f32.mxu1 %vm597_vm0, %v8005_v26  ;;  %v9022_v26 = vsel %vm3445_vm2, %v3506_v2, %v3507_v3 }
 0x131   : > { %7016 = vmatprep.mubr.msk.f32.mxu0 %vm597_vm0, %v8986_v59 }
 0x133   : > { %6631 = vmatmul.mubr.msk.f32.gmra.mrb[4].mxu1 %vm597_vm0, %v8007_v27  ;;  %v9035_v27 = vsel %vm3445_vm2, %v3507_v3, %v3506_v2  ;;  %v3516_v2 = vrot.slane %v8379_v48, 2  ;;  %v3518_v3 = vrot.slane %v8385_v50, 2 }
 0x134   : > { %7017 = vmatmul.mubr.msk.f32.gmra.mrb[32].mxu0 %vm597_vm0, %v9003_v10  ;;  %6633 = vmatprep.mubr.msk.f32.mxu1 %vm597_vm0, %v8023_v32  ;;  %v9038_v32 = vsel %vm3445_vm2, %v3509_v14, %v3510_v25 }
 0x135   : > { %7019 = vmatprep.mubr.msk.f32.mxu0 %vm597_vm0, %v9006_v22 }
 0x137   : > { %6634 = vmatmul.mubr.msk.f32.gmra.mrb[6].mxu1 %vm597_vm0, %v8032_v36  ;;  %v9051_v36 = vsel %vm3445_vm2, %v3510_v25, %v3509_v14  ;;  %v3519_v14 = vrot.slane %v8393_v56, 2  ;;  %v3521_v25 = vrot.slane %v8399_v58, 2 }
 0x138   : > { %7020 = vmatmul.mubr.msk.f32.gmra.mrb[34].mxu0 %vm597_vm0, %v9019_v11  ;;  %6636 = vmatprep.mubr.msk.f32.mxu1 %vm597_vm0, %v8057_v44  ;;  %v9054_v44 = vsel %vm3445_vm2, %v3512_v62, %v3513_v34 }
 0x139   : > { %7022 = vmatprep.mubr.msk.f32.mxu0 %vm597_vm0, %v9022_v26 }
 0x13b   : > { %6637 = vmatmul.mubr.msk.f32.gmra.mrb[8].mxu1 %vm597_vm0, %v8059_v45  ;;  %v9067_v45 = vsel %vm3445_vm2, %v3513_v34, %v3512_v62  ;;  %v3522_v62 = vrot.slane %v8407_v0, 2  ;;  %v3524_v34 = vrot.slane %v8413_v6, 2 }
 0x13c   : > { %7023 = vmatmul.mubr.msk.f32.gmra.mrb[36].mxu0 %vm597_vm0, %v9035_v27  ;;  %6639 = vmatprep.mubr.msk.f32.mxu1 %vm597_vm0, %v8075_v49  ;;  %v9070_v49 = vsel %vm3445_vm2, %v3515_v9, %v3516_v2 }
 0x13d   : > { %7025 = vmatprep.mubr.msk.f32.mxu0 %vm597_vm0, %v9038_v32 }
 0x13f   : > { %6640 = vmatmul.mubr.msk.f32.gmra.mrb[10].mxu1 %vm597_vm0, %v8082_v53  ;;  %v9083_v53 = vsel %vm3445_vm2, %v3516_v2, %v3515_v9  ;;  %v3525_v9 = vrot.slane %v8421_v15, 2  ;;  %v3527_v2 = vrot.slane %v8427_v17, 2 }
 0x140   : > { %7026 = vmatmul.mubr.msk.f32.gmra.mrb[38].mxu0 %vm597_vm0, %v9051_v36  ;;  %6642 = vmatprep.mubr.msk.f32.mxu1 %vm597_vm0, %v8097_v57  ;;  %v9086_v57 = vsel %vm3445_vm2, %v3518_v3, %v3519_v14 }
 0x141   : > { %7028 = vmatprep.mubr.msk.f32.mxu0 %vm597_vm0, %v9054_v44 }
 0x143   : > { %6643 = vmatmul.mubr.msk.f32.gmra.mrb[12].mxu1 %vm597_vm0, %v8104_v61  ;;  %v9099_v61 = vsel %vm3445_vm2, %v3519_v14, %v3518_v3  ;;  %v3528_v3 = vrot.slane %v8435_v30, 2  ;;  %v3530_v14 = vrot.slane %v8443_v29, 2 }
 0x144   : > { %7029 = vmatmul.mubr.msk.f32.gmra.mrb[40].mxu0 %vm597_vm0, %v9067_v45  ;;  %6645 = vmatprep.mubr.msk.f32.mxu1 %vm597_vm0, %v8127_v8  ;;  %v9102_v8 = vsel %vm3445_vm2, %v3521_v25, %v3522_v62 }
 0x145   : > { %7031 = vmatprep.mubr.msk.f32.mxu0 %vm597_vm0, %v9070_v49 }
 0x147   : > { %6646 = vmatmul.mubr.msk.f32.gmra.mrb[14].mxu1 %vm597_vm0, %v8129_v12  ;;  %v9115_v12 = vsel %vm3445_vm2, %v3522_v62, %v3521_v25  ;;  %v3531_v25 = vrot.slane %v8455_v18, 2  ;;  %v3533_v62 = vrot.slane %v8461_v47, 2 }
 0x148   : > { %7032 = vmatmul.mubr.msk.f32.gmra.mrb[42].mxu0 %vm597_vm0, %v9083_v53  ;;  %6648 = vmatprep.mubr.msk.f32.mxu1 %vm597_vm0, %v8145_v16  ;;  %v9118_v16 = vsel %vm3445_vm2, %v3524_v34, %v3525_v9 }
 0x149   : > { %7034 = vmatprep.mubr.msk.f32.mxu0 %vm597_vm0, %v9086_v57 }
 0x14b   : > { %6649 = vmatmul.mubr.msk.f32.gmra.mrb[16].mxu1 %vm597_vm0, %v8152_v20  ;;  %v9131_v20 = vsel %vm3445_vm2, %v3525_v9, %v3524_v34  ;;  %v3534_v34 = vrot.slane %v10198_v40, 2 }
 0x14c   : > { %7035 = vmatmul.mubr.msk.f32.gmra.mrb[44].mxu0 %vm597_vm0, %v9099_v61  ;;  %6651 = vmatprep.mubr.msk.f32.mxu1 %vm597_vm0, %v8167_v28  ;;  %v9134_v28 = vsel %vm3445_vm2, %v3527_v2, %v3528_v3 }
 0x14d   : > { %7037 = vmatprep.mubr.msk.f32.mxu0 %vm597_vm0, %v9102_v8  ;;  %v9166_v9 = vsel %vm3445_vm2, %v3533_v62, %v3534_v34 }
 0x14e   : > { %10201 = vst [vmem:[#allocation39_spill] sm:$0xff] %v9166_v9 }
 0x14f   : > { %6652 = vmatmul.mubr.msk.f32.gmra.mrb[18].mxu1 %vm597_vm0, %v8174_v37  ;;  %v9147_v37 = vsel %vm3445_vm2, %v3528_v3, %v3527_v2  ;;  %v10202_v2 = vld [vmem:[#allocation28_spill] sm:$0xff]  ;;  %v9177_v3 = vsel %vm3445_vm2, %v3534_v34, %v3533_v62  ;;  %v10228_v34 = vld [vmem:[#allocation41_spill] sm:$0xff] }
 0x150   : > { %7038 = vmatmul.mubr.msk.f32.gmra.mrb[46].mxu0 %vm597_vm0, %v9115_v12  ;;  %6654 = vmatprep.mubr.msk.f32.mxu1 %vm597_vm0, %v8189_v46  ;;  %v9150_v46 = vsel %vm3445_vm2, %v3530_v14, %v3531_v25 }
 0x151   : > { %7040 = vmatprep.mubr.msk.f32.mxu0 %vm597_vm0, %v9118_v16 }
 0x153   : > { %6655 = vmatmul.mubr.msk.f32.gmra.mrb[20].mxu1 %vm597_vm0, %v8196_v54  ;;  %v10200_v54 = vld [vmem:[#allocation26_spill] sm:$0xff] }
 0x154   : > { %7041 = vmatmul.mubr.msk.f32.gmra.mrb[48].mxu0 %vm597_vm0, %v9131_v20  ;;  %6657 = vmatprep.mubr.msk.f32.mxu1 %vm597_vm0, %v8216_v7  ;;  %v9163_v7 = vsel %vm3445_vm2, %v3531_v25, %v3530_v14  ;;  %v10204_v14 = vld [vmem:[#allocation38_spill] sm:$0xff]  ;;  %v10205_v25 = vld [vmem:[#allocation36_spill] sm:$0xff] }
 0x155   : > { %7043 = vmatprep.mubr.msk.f32.mxu0 %vm597_vm0, %v9134_v28 }
 0x157   : > { %6658 = vmatmul.mubr.msk.f32.gmra.mrb[22].mxu1 %vm597_vm0, %v8218_v13  ;;  %v10203_v13 = vld [vmem:[#allocation37_spill] sm:$0xff] }
 0x158   : > { %7044 = vmatmul.mubr.msk.f32.gmra.mrb[50].mxu0 %vm597_vm0, %v9147_v37  ;;  %6660 = vmatprep.mubr.msk.f32.mxu1 %vm597_vm0, %v10200_v54 }
 0x159   : > { %7046 = vmatprep.mubr.msk.f32.mxu0 %vm597_vm0, %v9150_v46 }
 0x15b   : > { %6661 = vmatmul.mubr.msk.f32.gmra.mrb[24].mxu1 %vm597_vm0, %v10202_v2 }
 0x15c   : > { %7047 = vmatmul.mubr.msk.f32.gmra.mrb[52].mxu0 %vm597_vm0, %v9163_v7  ;;  %6663 = vmatprep.mubr.msk.f32.mxu1 %vm597_vm0, %v10203_v13 }
 0x15d   : > { %7049 = vmatprep.mubr.msk.f32.mxu0 %vm597_vm0, %v9166_v9 }
 0x15f   : > { %6664 = vmatmul.mubr.msk.f32.gmra.mrb[26].mxu1 %vm597_vm0, %v10204_v14 }
 0x160   : > { %7050 = vmatmul.mubr.msk.f32.gmra.mrb[54].mxu0 %vm597_vm0, %v9177_v3  ;;  %6666 = vmatprep.mubr.msk.f32.mxu1 %vm597_vm0, %v10176_v24  ;;  %v10206_v24 = vld [vmem:[#allocation34_spill] sm:$0xff] }
 0x161   : > { %7054 = vmatprep.mubr.msk.f32.mxu0 %vm597_vm0, %v8747_v19  ;;  %v10209_v19 = vld [vmem:[#allocation76_spill] sm:$0xff] }
 0x163   : > { %6667 = vmatmul.mubr.msk.f32.gmra.mrb[28].mxu1 %vm597_vm0, %v10179_v21  ;;  %v10207_v21 = vld [vmem:[#allocation75_spill] sm:$0xff] }
 0x164   : > { %7055 = vmatmul.mubr.msk.f32.vlgmr.msra.gmra.mrb[0].mxu0 %vm597_vm0, %v8763_v1  ;;  %6669 = vmatprep.mubr.msk.f32.mxu1 %vm597_vm0, %v8313_v35  ;;  %v10208_v35 = vld [vmem:[#allocation35_spill] sm:$0xff] }
 0x165   : > { %7139 = vmatpush3.msra.mxu0 %v8754_v43  ;;  %7057 = vmatprep.mubr.msk.f32.mxu0 %vm597_vm0, %v10205_v25  ;;  %v10227_v43 = vld [vmem:[#allocation44_spill] sm:$0xff] }
 0x166   : > { %v1885_v1 = vrot.slane %v10227_v43, 1  ;;  %v10231_v43 = vld [vmem:[#allocation69_spill] sm:$0xff] }
 0x167   : > { %6670 = vmatmul.mubr.msk.f32.gmra.mrb[30].mxu1 %vm597_vm0, %v8323_v31  ;;  %v10210_v31 = vld [vmem:[#allocation77_spill] sm:$0xff] }
 0x168   : > { %7058 = vmatmul.mubr.msk.f32.gmra.mrb[2].mxu0 %vm597_vm0, %v10206_v24  ;;  %6672 = vmatprep.mubr.msk.f32.mxu1 %vm597_vm0, %v8329_v41  ;;  %v10211_v41 = vld [vmem:[#allocation78_spill] sm:$0xff] }
 0x169   : > { %7060 = vmatprep.mubr.msk.f32.mxu0 %vm597_vm0, %v10207_v21 }
 0x16b   : > { %6673 = vmatmul.mubr.msk.f32.gmra.mrb[32].mxu1 %vm597_vm0, %v8337_v38  ;;  %v10212_v38 = vld [vmem:[#allocation79_spill] sm:$0xff] }
 0x16c   : > { %7061 = vmatmul.mubr.msk.f32.gmra.mrb[4].mxu0 %vm597_vm0, %v10208_v35  ;;  %6675 = vmatprep.mubr.msk.f32.mxu1 %vm597_vm0, %v8343_v23  ;;  %v10213_v23 = vld [vmem:[#allocation80_spill] sm:$0xff] }
 0x16d   : > { %7063 = vmatprep.mubr.msk.f32.mxu0 %vm597_vm0, %v10209_v19 }
 0x16f   : > { %6676 = vmatmul.mubr.msk.f32.gmra.mrb[34].mxu1 %vm597_vm0, %v8351_v52  ;;  %v10214_v52 = vld [vmem:[#allocation81_spill] sm:$0xff] }
 0x170   : > { %7064 = vmatmul.mubr.msk.f32.gmra.mrb[6].mxu0 %vm597_vm0, %v10210_v31  ;;  %6678 = vmatprep.mubr.msk.f32.mxu1 %vm597_vm0, %v8357_v33  ;;  %v10215_v33 = vld [vmem:[#allocation82_spill] sm:$0xff] }
 0x171   : > { %7066 = vmatprep.mubr.msk.f32.mxu0 %vm597_vm0, %v10211_v41 }
 0x173   : > { %6679 = vmatmul.mubr.msk.f32.gmra.mrb[36].mxu1 %vm597_vm0, %v8365_v39  ;;  %v10216_v39 = vld [vmem:[#allocation83_spill] sm:$0xff] }
 0x174   : > { %7067 = vmatmul.mubr.msk.f32.gmra.mrb[8].mxu0 %vm597_vm0, %v10212_v38  ;;  %6681 = vmatprep.mubr.msk.f32.mxu1 %vm597_vm0, %v8371_v42  ;;  %v10217_v42 = vld [vmem:[#allocation84_spill] sm:$0xff] }
 0x175   : > { %7069 = vmatprep.mubr.msk.f32.mxu0 %vm597_vm0, %v10213_v23 }
 0x177   : > { %6682 = vmatmul.mubr.msk.f32.gmra.mrb[38].mxu1 %vm597_vm0, %v8379_v48  ;;  %v10218_v48 = vld [vmem:[#allocation85_spill] sm:$0xff] }
 0x178   : > { %7070 = vmatmul.mubr.msk.f32.gmra.mrb[10].mxu0 %vm597_vm0, %v10214_v52  ;;  %6684 = vmatprep.mubr.msk.f32.mxu1 %vm597_vm0, %v8385_v50  ;;  %v10219_v50 = vld [vmem:[#allocation86_spill] sm:$0xff] }
 0x179   : > { %7072 = vmatprep.mubr.msk.f32.mxu0 %vm597_vm0, %v10215_v33 }
 0x17b   : > { %6685 = vmatmul.mubr.msk.f32.gmra.mrb[40].mxu1 %vm597_vm0, %v8393_v56  ;;  %v10220_v56 = vld [vmem:[#allocation87_spill] sm:$0xff] }
 0x17c   : > { %7073 = vmatmul.mubr.msk.f32.gmra.mrb[12].mxu0 %vm597_vm0, %v10216_v39  ;;  %6687 = vmatprep.mubr.msk.f32.mxu1 %vm597_vm0, %v8399_v58  ;;  %v10221_v58 = vld [vmem:[#allocation88_spill] sm:$0xff] }
 0x17d   : > { %7075 = vmatprep.mubr.msk.f32.mxu0 %vm597_vm0, %v10217_v42 }
 0x17f   : > { %6688 = vmatmul.mubr.msk.f32.gmra.mrb[42].mxu1 %vm597_vm0, %v8407_v0  ;;  %v10222_v0 = vld [vmem:[#allocation89_spill] sm:$0xff] }
 0x180   : > { %7076 = vmatmul.mubr.msk.f32.gmra.mrb[14].mxu0 %vm597_vm0, %v10218_v48  ;;  %6690 = vmatprep.mubr.msk.f32.mxu1 %vm597_vm0, %v8413_v6  ;;  %v10223_v6 = vld [vmem:[#allocation90_spill] sm:$0xff] }
 0x181   : > { %7078 = vmatprep.mubr.msk.f32.mxu0 %vm597_vm0, %v10219_v50 }
 0x183   : > { %6691 = vmatmul.mubr.msk.f32.gmra.mrb[44].mxu1 %vm597_vm0, %v8421_v15  ;;  %v10224_v15 = vld [vmem:[#allocation91_spill] sm:$0xff] }
 0x184   : > { %7079 = vmatmul.mubr.msk.f32.gmra.mrb[16].mxu0 %vm597_vm0, %v10220_v56  ;;  %6693 = vmatprep.mubr.msk.f32.mxu1 %vm597_vm0, %v8427_v17  ;;  %v3489_v17 = vrot.slane %v10202_v2, 2 }
 0x185   : > { %7081 = vmatprep.mubr.msk.f32.mxu0 %vm597_vm0, %v10221_v58 }
 0x187   : > { %6694 = vmatmul.mubr.msk.f32.gmra.mrb[46].mxu1 %vm597_vm0, %v8435_v30  ;;  %v3488_v30 = vrot.slane %v10200_v54, 2  ;;  %v10230_v54 = vld [vmem:[#allocation68_spill] sm:$0xff] }
 0x188   : > { %7082 = vmatmul.mubr.msk.f32.gmra.mrb[18].mxu0 %vm597_vm0, %v10222_v0  ;;  %6696 = vmatprep.mubr.msk.f32.mxu1 %vm597_vm0, %v8443_v29  ;;  %v10226_v29 = vld [vmem:[#allocation42_spill] sm:$0xff] }
 0x189   : > { %7084 = vmatprep.mubr.msk.f32.mxu0 %vm597_vm0, %v10223_v6  ;;  %v9289_v62 = vsel %vm3445_vm2, %v3488_v30, %v3489_v17  ;;  %v9300_v2 = vsel %vm3445_vm2, %v3489_v17, %v3488_v30  ;;  %v10232_v30 = vld [vmem:[#allocation4_spill] sm:$0xff]  ;;  %v10233_v17 = vld [vmem:[#allocation5_spill] sm:$0xff] }
 0x18b   : > { %6697 = vmatmul.mubr.msk.f32.gmra.mrb[48].mxu1 %vm597_vm0, %v8455_v18  ;;  %v10225_v18 = vld [vmem:[#allocation40_spill] sm:$0xff] }
 0x18c   : > { %7085 = vmatmul.mubr.msk.f32.gmra.mrb[20].mxu0 %vm597_vm0, %v8924_v63  ;;  %6699 = vmatprep.mubr.msk.f32.mxu1 %vm597_vm0, %v8461_v47  ;;  %v1884_v47 = vrot.slane %v10226_v29, 1 }
 0x18d   : > { %7087 = vmatprep.mubr.msk.f32.mxu0 %vm597_vm0, %v10224_v15 }
 0x18e   : > { %v1886_v29 = vsel %vm1883_vm1, %v1884_v47, %v1885_v1 }
 0x18f   : > { %6700 = vmatmul.mubr.msk.f32.gmra.mrb[50].mxu1 %vm597_vm0, %v10198_v40  ;;  %v10229_v40 = vld [vmem:[#allocation92_spill] sm:$0xff] }
 0x190   : > { %7088 = vmatmul.mubr.msk.f32.gmra.mrb[22].mxu0 %vm597_vm0, %v8940_v60  ;;  %6702 = vmatprep.mubr.msk.f32.mxu1 %vm597_vm0, %v10225_v18 }
 0x191   : > { %7090 = vmatprep.mubr.msk.f32.mxu0 %vm597_vm0, %v8943_v55 }
 0x193   : > { %6703 = vmatmul.mubr.msk.f32.gmra.mrb[52].mxu1 %vm597_vm0, %v10228_v34 }
 0x194   : > { %7091 = vmatmul.mubr.msk.f32.gmra.mrb[24].mxu0 %vm597_vm0, %v10229_v40  ;;  %6705 = vmatprep.mubr.msk.f32.mxu1 %vm597_vm0, %v10230_v54  ;;  %v2044_v40 = vsel %vm1883_vm1, %v1885_v1, %v1884_v47  ;;  %v10237_v47 = vld [vmem:[#allocation9_spill] sm:$0xff]  ;;  %v10238_v1 = vld [vmem:[#allocation10_spill] sm:$0xff] }
 0x195   : > { %7093 = vmatprep.mubr.msk.f32.mxu0 %vm597_vm0, %v9289_v62 }
 0x197   : > { %6706 = vmatmul.mubr.msk.f32.gmra.mrb[54].mxu1 %vm597_vm0, %v10231_v43  ;;  %v10260_v43 = vld [vmem:[#allocation33_spill] sm:$0xff] }
 0x198   : > { %7094 = vmatmul.mubr.msk.f32.gmra.mrb[26].mxu0 %vm597_vm0, %v9300_v2  ;;  %6710 = vmatprep.mubr.msk.f32.mxu1 %vm597_vm0, %v1886_v29  ;;  %v10240_v29 = vld [vmem:[#allocation12_spill] sm:$0xff]  ;;  %v1936_v54 = vrot.slane %v10260_v43, 1  ;;  %v10263_v43 = vld [vmem:[#allocation45_spill] sm:$0xff] }
 0x199   : > { %7096 = vmatprep.mubr.msk.f32.mxu0 %vm597_vm0, %v8970_v51  ;;  %v10234_v51 = vld [vmem:[#allocation6_spill] sm:$0xff] }
 0x19b   : > { %6711 = vmatmul.mubr.msk.f32.vlgmr.msra.gmra.mrb[0].mxu1 %vm597_vm0, %v2044_v40  ;;  %v10239_v40 = vld [vmem:[#allocation11_spill] sm:$0xff] }
 0x19c   : > { %7097 = vmatmul.mubr.msk.f32.gmra.mrb[28].mxu0 %vm597_vm0, %v8983_v5  ;;  %7225 = vmatpush3.msra.mxu1 %v8991_v4  ;;  %v10235_v5 = vld [vmem:[#allocation7_spill] sm:$0xff]  ;;  %v10236_v4 = vld [vmem:[#allocation8_spill] sm:$0xff] }
 0x19d   : > { %6713 = vmatprep.mubr.msk.f32.mxu1 %vm597_vm0, %v10232_v30  ;;  %7099 = vmatprep.mubr.msk.f32.mxu0 %vm597_vm0, %v8986_v59  ;;  %v10241_v30 = vld [vmem:[#allocation13_spill] sm:$0xff] }
 0x19f   : > { %6714 = vmatmul.mubr.msk.f32.gmra.mrb[2].mxu1 %vm597_vm0, %v10233_v17  ;;  %v10242_v17 = vld [vmem:[#allocation14_spill] sm:$0xff] }
 0x1a0   : > { %7100 = vmatmul.mubr.msk.f32.gmra.mrb[30].mxu0 %vm597_vm0, %v9003_v10  ;;  %6716 = vmatprep.mubr.msk.f32.mxu1 %vm597_vm0, %v10234_v51  ;;  %v10243_v51 = vld [vmem:[#allocation15_spill] sm:$0xff] }
 0x1a1   : > { %7102 = vmatprep.mubr.msk.f32.mxu0 %vm597_vm0, %v9006_v22 }
 0x1a3   : > { %6717 = vmatmul.mubr.msk.f32.gmra.mrb[4].mxu1 %vm597_vm0, %v10235_v5  ;;  %v10244_v5 = vld [vmem:[#allocation16_spill] sm:$0xff] }
 0x1a4   : > { %7103 = vmatmul.mubr.msk.f32.gmra.mrb[32].mxu0 %vm597_vm0, %v9019_v11  ;;  %6719 = vmatprep.mubr.msk.f32.mxu1 %vm597_vm0, %v10236_v4  ;;  %v10245_v4 = vld [vmem:[#allocation17_spill] sm:$0xff] }
 0x1a5   : > { %7105 = vmatprep.mubr.msk.f32.mxu0 %vm597_vm0, %v9022_v26 }
 0x1a7   : > { %6720 = vmatmul.mubr.msk.f32.gmra.mrb[6].mxu1 %vm597_vm0, %v10237_v47  ;;  %v10246_v47 = vld [vmem:[#allocation18_spill] sm:$0xff] }
 0x1a8   : > { %7106 = vmatmul.mubr.msk.f32.gmra.mrb[34].mxu0 %vm597_vm0, %v9035_v27  ;;  %6722 = vmatprep.mubr.msk.f32.mxu1 %vm597_vm0, %v10238_v1  ;;  %v10247_v1 = vld [vmem:[#allocation19_spill] sm:$0xff] }
 0x1a9   : > { %7108 = vmatprep.mubr.msk.f32.mxu0 %vm597_vm0, %v9038_v32 }
 0x1ab   : > { %6723 = vmatmul.mubr.msk.f32.gmra.mrb[8].mxu1 %vm597_vm0, %v10239_v40  ;;  %v10248_v40 = vld [vmem:[#allocation20_spill] sm:$0xff] }
 0x1ac   : > { %7109 = vmatmul.mubr.msk.f32.gmra.mrb[36].mxu0 %vm597_vm0, %v9051_v36  ;;  %6725 = vmatprep.mubr.msk.f32.mxu1 %vm597_vm0, %v10240_v29  ;;  %v10249_v29 = vld [vmem:[#allocation21_spill] sm:$0xff] }
 0x1ad   : > { %7111 = vmatprep.mubr.msk.f32.mxu0 %vm597_vm0, %v9054_v44 }
 0x1af   : > { %6726 = vmatmul.mubr.msk.f32.gmra.mrb[10].mxu1 %vm597_vm0, %v10241_v30  ;;  %v10250_v30 = vld [vmem:[#allocation22_spill] sm:$0xff] }
 0x1b0   : > { %7112 = vmatmul.mubr.msk.f32.gmra.mrb[38].mxu0 %vm597_vm0, %v9067_v45  ;;  %6728 = vmatprep.mubr.msk.f32.mxu1 %vm597_vm0, %v10242_v17  ;;  %v10251_v17 = vld [vmem:[#allocation23_spill] sm:$0xff] }
 0x1b1   : > { %7114 = vmatprep.mubr.msk.f32.mxu0 %vm597_vm0, %v9070_v49 }
 0x1b3   : > { %6729 = vmatmul.mubr.msk.f32.gmra.mrb[12].mxu1 %vm597_vm0, %v10243_v51  ;;  %v10252_v51 = vld [vmem:[#allocation24_spill] sm:$0xff] }
 0x1b4   : > { %7115 = vmatmul.mubr.msk.f32.gmra.mrb[40].mxu0 %vm597_vm0, %v9083_v53  ;;  %6731 = vmatprep.mubr.msk.f32.mxu1 %vm597_vm0, %v10244_v5  ;;  %v3536_v5 = vrot.slane %v10225_v18, 2 }
 0x1b5   : > { %7117 = vmatprep.mubr.msk.f32.mxu0 %vm597_vm0, %v9086_v57 }
 0x1b7   : > { %6732 = vmatmul.mubr.msk.f32.gmra.mrb[14].mxu1 %vm597_vm0, %v10245_v4  ;;  %v3537_v4 = vrot.slane %v10228_v34, 2  ;;  %v10257_v34 = vld [vmem:[#allocation29_spill] sm:$0xff] }
 0x1b8   : > { %7118 = vmatmul.mubr.msk.f32.gmra.mrb[42].mxu0 %vm597_vm0, %v9099_v61  ;;  %6734 = vmatprep.mubr.msk.f32.mxu1 %vm597_vm0, %v10246_v47  ;;  %v10253_v47 = vld [vmem:[#allocation25_spill] sm:$0xff] }
 0x1b9   : > { %7120 = vmatprep.mubr.msk.f32.mxu0 %vm597_vm0, %v9102_v8  ;;  %v9412_v18 = vsel %vm3445_vm2, %v3536_v5, %v3537_v4 }
 0x1bb   : > { %6735 = vmatmul.mubr.msk.f32.gmra.mrb[16].mxu1 %vm597_vm0, %v10247_v1  ;;  %v10254_v1 = vld [vmem:[#allocation27_spill] sm:$0xff] }
 0x1bc   : > { %7121 = vmatmul.mubr.msk.f32.gmra.mrb[44].mxu0 %vm597_vm0, %v9115_v12  ;;  %6737 = vmatprep.mubr.msk.f32.mxu1 %vm597_vm0, %v10248_v40  ;;  %v10255_v40 = vld [vmem:[#allocation73_spill] sm:$0xff] }
 0x1bd   : > { %7123 = vmatprep.mubr.msk.f32.mxu0 %vm597_vm0, %v9118_v16 }
 0x1bf   : > { %6738 = vmatmul.mubr.msk.f32.gmra.mrb[18].mxu1 %vm597_vm0, %v10249_v29  ;;  %v1932_v29 = vrot.slane %v10255_v40, 1  ;;  %v10259_v40 = vld [vmem:[#allocation32_spill] sm:$0xff] }
 0x1c0   : > { %7124 = vmatmul.mubr.msk.f32.gmra.mrb[46].mxu0 %vm597_vm0, %v9131_v20  ;;  %6740 = vmatprep.mubr.msk.f32.mxu1 %vm597_vm0, %v10250_v30  ;;  %v10256_v30 = vld [vmem:[#allocation74_spill] sm:$0xff] }
 0x1c1   : > { %7126 = vmatprep.mubr.msk.f32.mxu0 %vm597_vm0, %v9134_v28 }
 0x1c3   : > { %6741 = vmatmul.mubr.msk.f32.gmra.mrb[20].mxu1 %vm597_vm0, %v10251_v17  ;;  %v1933_v17 = vrot.slane %v10256_v30, 1  ;;  %v1935_v30 = vrot.slane %v10259_v40, 1 }
 0x1c4   : > { %7127 = vmatmul.mubr.msk.f32.gmra.mrb[48].mxu0 %vm597_vm0, %v9147_v37  ;;  %6743 = vmatprep.mubr.msk.f32.mxu1 %vm597_vm0, %v10252_v51  ;;  %v10258_v51 = vld [vmem:[#allocation30_spill] sm:$0xff] }
 0x1c5   : > { %7129 = vmatprep.mubr.msk.f32.mxu0 %vm597_vm0, %v9150_v46 }
 0x1c7   : > { %6744 = vmatmul.mubr.msk.f32.gmra.mrb[22].mxu1 %vm597_vm0, %v10253_v47  ;;  %v9423_v47 = vsel %vm3445_vm2, %v3537_v4, %v3536_v5  ;;  %v1937_v5 = vsel %vm1883_vm1, %v1935_v30, %v1936_v54  ;;  %v10283_v4 = vld [vmem:[#allocation65_spill] sm:$0xff] }
 0x1c8   : > { %7130 = vmatmul.mubr.msk.f32.gmra.mrb[50].mxu0 %vm597_vm0, %v9163_v7  ;;  %6746 = vmatprep.mubr.msk.f32.mxu1 %vm597_vm0, %v10254_v1  ;;  %v1934_v1 = vsel %vm1883_vm1, %v1932_v29, %v1933_v17 }
 0x1c9   : > { %7132 = vmatprep.mubr.msk.f32.mxu0 %vm597_vm0, %v9166_v9  ;;  %v10261_v9 = vld [vmem:[#allocation31_spill] sm:$0xff] }
 0x1cb   : > { %6747 = vmatmul.mubr.msk.f32.gmra.mrb[24].mxu1 %vm597_vm0, %v10257_v34  ;;  %v2060_v34 = vsel %vm1883_vm1, %v1933_v17, %v1932_v29  ;;  %v10284_v29 = vld [vmem:[#allocation66_spill] sm:$0xff] }
 0x1cc   : > { %7133 = vmatmul.mubr.msk.f32.gmra.mrb[52].mxu0 %vm597_vm0, %v9177_v3  ;;  %6749 = vmatprep.mubr.msk.f32.mxu1 %vm597_vm0, %v10258_v51 }
 0x1cd   : > { %7135 = vmatprep.mubr.msk.f32.mxu0 %vm597_vm0, %v9412_v18 }
 0x1cf   : > { %6750 = vmatmul.mubr.msk.f32.gmra.mrb[26].mxu1 %vm597_vm0, %v10261_v9  ;;  %v2061_v9 = vsel %vm1883_vm1, %v1936_v54, %v1935_v30  ;;  %v10281_v54 = vld [vmem:[#allocation64_spill] sm:$0xff] }
 0x1d0   : > { %7136 = vmatmul.mubr.msk.f32.gmra.mrb[54].mxu0 %vm597_vm0, %v9423_v47  ;;  %6752 = vmatprep.mubr.msk.f32.mxu1 %vm597_vm0, %v1934_v1 }
 0x1d1   : > { %7140 = vmatprep.mubr.msk.f32.mxu0 %vm597_vm0, %v10205_v25  ;;  %v10262_v25 = vld [vmem:[#allocation43_spill] sm:$0xff] }
 0x1d3   : > { %6753 = vmatmul.mubr.msk.f32.gmra.mrb[28].mxu1 %vm597_vm0, %v2060_v34 }
 0x1d4   : > { %7141 = vmatmul.mubr.msk.f32.vlgmr.msra.gmra.mrb[0].mxu0 %vm597_vm0, %v10206_v24  ;;  %6755 = vmatprep.mubr.msk.f32.mxu1 %vm597_vm0, %v1937_v5  ;;  %v10264_v24 = vld [vmem:[#allocation46_spill] sm:$0xff] }
 0x1d5   : > { %7143 = vmatprep.mubr.msk.f32.mxu0 %vm597_vm0, %v10207_v21  ;;  %v10265_v21 = vld [vmem:[#allocation48_spill] sm:$0xff] }
 0x1d7   : > { %6756 = vmatmul.mubr.msk.f32.gmra.mrb[30].mxu1 %vm597_vm0, %v2061_v9 }
 0x1d8   : > { %7144 = vmatmul.mubr.msk.f32.gmra.mrb[2].mxu0 %vm597_vm0, %v10208_v35  ;;  %6758 = vmatprep.mubr.msk.f32.mxu1 %vm597_vm0, %v10262_v25  ;;  %v10266_v35 = vld [vmem:[#allocation49_spill] sm:$0xff] }
 0x1d9   : > { %7146 = vmatprep.mubr.msk.f32.mxu0 %vm597_vm0, %v10209_v19  ;;  %v10267_v19 = vld [vmem:[#allocation50_spill] sm:$0xff] }
 0x1db   : > { %6759 = vmatmul.mubr.msk.f32.gmra.mrb[32].mxu1 %vm597_vm0, %v10263_v43 }
 0x1dc   : > { %7147 = vmatmul.mubr.msk.f32.gmra.mrb[4].mxu0 %vm597_vm0, %v10210_v31  ;;  %6761 = vmatprep.mubr.msk.f32.mxu1 %vm597_vm0, %v10264_v24  ;;  %v10268_v31 = vld [vmem:[#allocation51_spill] sm:$0xff] }
 0x1dd   : > { %7149 = vmatprep.mubr.msk.f32.mxu0 %vm597_vm0, %v10211_v41  ;;  %v10269_v41 = vld [vmem:[#allocation52_spill] sm:$0xff] }
 0x1df   : > { %6762 = vmatmul.mubr.msk.f32.gmra.mrb[34].mxu1 %vm597_vm0, %v10265_v21 }
 0x1e0   : > { %7150 = vmatmul.mubr.msk.f32.gmra.mrb[6].mxu0 %vm597_vm0, %v10212_v38  ;;  %6764 = vmatprep.mubr.msk.f32.mxu1 %vm597_vm0, %v10266_v35  ;;  %v10270_v38 = vld [vmem:[#allocation53_spill] sm:$0xff] }
 0x1e1   : > { %7152 = vmatprep.mubr.msk.f32.mxu0 %vm597_vm0, %v10213_v23  ;;  %v10271_v23 = vld [vmem:[#allocation54_spill] sm:$0xff] }
 0x1e3   : > { %6765 = vmatmul.mubr.msk.f32.gmra.mrb[36].mxu1 %vm597_vm0, %v10267_v19 }
 0x1e4   : > { %7153 = vmatmul.mubr.msk.f32.gmra.mrb[8].mxu0 %vm597_vm0, %v10214_v52  ;;  %6767 = vmatprep.mubr.msk.f32.mxu1 %vm597_vm0, %v10268_v31  ;;  %v10272_v52 = vld [vmem:[#allocation55_spill] sm:$0xff] }
 0x1e5   : > { %7155 = vmatprep.mubr.msk.f32.mxu0 %vm597_vm0, %v10215_v33  ;;  %v10273_v33 = vld [vmem:[#allocation56_spill] sm:$0xff] }
 0x1e7   : > { %6768 = vmatmul.mubr.msk.f32.gmra.mrb[38].mxu1 %vm597_vm0, %v10269_v41 }
 0x1e8   : > { %7156 = vmatmul.mubr.msk.f32.gmra.mrb[10].mxu0 %vm597_vm0, %v10216_v39  ;;  %6770 = vmatprep.mubr.msk.f32.mxu1 %vm597_vm0, %v10270_v38  ;;  %v10274_v39 = vld [vmem:[#allocation57_spill] sm:$0xff] }
 0x1e9   : > { %7158 = vmatprep.mubr.msk.f32.mxu0 %vm597_vm0, %v10217_v42  ;;  %v10275_v42 = vld [vmem:[#allocation58_spill] sm:$0xff] }
 0x1eb   : > { %6771 = vmatmul.mubr.msk.f32.gmra.mrb[40].mxu1 %vm597_vm0, %v10271_v23 }
 0x1ec   : > { %7159 = vmatmul.mubr.msk.f32.gmra.mrb[12].mxu0 %vm597_vm0, %v10218_v48  ;;  %6773 = vmatprep.mubr.msk.f32.mxu1 %vm597_vm0, %v10272_v52  ;;  %v10276_v48 = vld [vmem:[#allocation59_spill] sm:$0xff] }
 0x1ed   : > { %7161 = vmatprep.mubr.msk.f32.mxu0 %vm597_vm0, %v10219_v50  ;;  %v10277_v50 = vld [vmem:[#allocation60_spill] sm:$0xff] }
 0x1ef   : > { %6774 = vmatmul.mubr.msk.f32.gmra.mrb[42].mxu1 %vm597_vm0, %v10273_v33 }
 0x1f0   : > { %7162 = vmatmul.mubr.msk.f32.gmra.mrb[14].mxu0 %vm597_vm0, %v10220_v56  ;;  %6776 = vmatprep.mubr.msk.f32.mxu1 %vm597_vm0, %v10274_v39  ;;  %v10278_v56 = vld [vmem:[#allocation61_spill] sm:$0xff] }
 0x1f1   : > { %7164 = vmatprep.mubr.msk.f32.mxu0 %vm597_vm0, %v10221_v58  ;;  %v10279_v58 = vld [vmem:[#allocation62_spill] sm:$0xff] }
 0x1f3   : > { %6777 = vmatmul.mubr.msk.f32.gmra.mrb[44].mxu1 %vm597_vm0, %v10275_v42 }
 0x1f4   : > { %7165 = vmatmul.mubr.msk.f32.gmra.mrb[16].mxu0 %vm597_vm0, %v10222_v0  ;;  %6779 = vmatprep.mubr.msk.f32.mxu1 %vm597_vm0, %v10276_v48  ;;  %v10280_v0 = vld [vmem:[#allocation63_spill] sm:$0xff] }
 0x1f5   : > { %7167 = vmatprep.mubr.msk.f32.mxu0 %vm597_vm0, %v10223_v6  ;;  %v3492_v6 = vrot.slane %v10204_v14, 2  ;;  %v10286_v14 = vld [vmem:[#allocation70_spill] sm:$0xff] }
 0x1f7   : > { %6780 = vmatmul.mubr.msk.f32.gmra.mrb[46].mxu1 %vm597_vm0, %v10277_v50 }
 0x1f8   : > { %7168 = vmatmul.mubr.msk.f32.gmra.mrb[18].mxu0 %vm597_vm0, %v8924_v63  ;;  %6782 = vmatprep.mubr.msk.f32.mxu1 %vm597_vm0, %v10278_v56  ;;  %v3491_v63 = vrot.slane %v10203_v13, 2 }
 0x1f9   : > { %7170 = vmatprep.mubr.msk.f32.mxu0 %vm597_vm0, %v10224_v15  ;;  %v10282_v15 = vld [vmem:[#allocation92_spill] sm:$0xff] }
 0x1fa   : > { %v3621_v13 = vsel %vm3445_vm2, %v3492_v6, %v3491_v63 }
 0x1fb   : > { %6783 = vmatmul.mubr.msk.f32.gmra.mrb[48].mxu1 %vm597_vm0, %v10279_v58 }
 0x1fc   : > { %7171 = vmatmul.mubr.msk.f32.gmra.mrb[20].mxu0 %vm597_vm0, %v8940_v60  ;;  %6785 = vmatprep.mubr.msk.f32.mxu1 %vm597_vm0, %v10280_v0  ;;  %v3493_v60 = vsel %vm3445_vm2, %v3491_v63, %v3492_v6 }
 0x1fd   : > { %7173 = vmatprep.mubr.msk.f32.mxu0 %vm597_vm0, %v8943_v55  ;;  %v10285_v55 = vld [vmem:[#allocation67_spill] sm:$0xff] }
 0x1ff   : > { %6786 = vmatmul.mubr.msk.f32.gmra.mrb[50].mxu1 %vm597_vm0, %v10281_v54 }
 0x200   : > { %7174 = vmatmul.mubr.msk.f32.gmra.mrb[22].mxu0 %vm597_vm0, %v10282_v15  ;;  %6788 = vmatprep.mubr.msk.f32.mxu1 %vm597_vm0, %v10283_v4 }
 0x201   : > { %7176 = vmatprep.mubr.msk.f32.mxu0 %vm597_vm0, %v9289_v62 }
 0x203   : > { %6789 = vmatmul.mubr.msk.f32.gmra.mrb[52].mxu1 %vm597_vm0, %v10284_v29 }
 0x204   : > { %7177 = vmatmul.mubr.msk.f32.gmra.mrb[24].mxu0 %vm597_vm0, %v9300_v2  ;;  %6791 = vmatprep.mubr.msk.f32.mxu1 %vm597_vm0, %v10285_v55 }
 0x205   : > { %7179 = vmatprep.mubr.msk.f32.mxu0 %vm597_vm0, %v3493_v60 }
 0x207   : > { %6792 = vmatmul.mubr.msk.f32.gmra.mrb[54].mxu1 %vm597_vm0, %v10286_v14 }
 0x208   : > { %7180 = vmatmul.mubr.msk.f32.gmra.mrb[26].mxu0 %vm597_vm0, %v3621_v13  ;;  %6838 = vmatprep.mubr.msk.f32.mxu1 %vm597_vm0, %v1937_v5 }
 0x209   : > { %7182 = vmatprep.mubr.msk.f32.mxu0 %vm597_vm0, %v8986_v59  ;;  %v10287_v59 = vld [vmem:[#allocation39_spill] sm:$0xff] }
 0x20b   : > { %6839 = vmatmul.mubr.msk.f32.vlgmr.msra.gmra.mrb[28].mxu1 %vm597_vm0, %v2061_v9 }
 0x20c   : > { %7183 = vmatmul.mubr.msk.f32.gmra.mrb[28].mxu0 %vm597_vm0, %v9003_v10  ;;  %6841 = vmatprep.mubr.msk.f32.mxu1 %vm597_vm0, %v10262_v25  ;;  %v10288_v10 = vld [vmem:[#allocation68_spill] sm:$0xff] }
 0x20d   : > { %7185 = vmatprep.mubr.msk.f32.mxu0 %vm597_vm0, %v9006_v22  ;;  %v3539_v22 = vrot.slane %v10288_v10, 2 }
 0x20f   : > { %6842 = vmatmul.mubr.msk.f32.gmra.mrb[30].mxu1 %vm597_vm0, %v10263_v43 }
 0x210   : > { %7186 = vmatmul.mubr.msk.f32.gmra.mrb[30].mxu0 %vm597_vm0, %v9019_v11  ;;  %6844 = vmatprep.mubr.msk.f32.mxu1 %vm597_vm0, %v10264_v24  ;;  %v10289_v11 = vld [vmem:[#allocation69_spill] sm:$0xff] }
 0x211   : > { %7188 = vmatprep.mubr.msk.f32.mxu0 %vm597_vm0, %v9022_v26  ;;  %v3540_v26 = vrot.slane %v10289_v11, 2 }
 0x213   : > { %6845 = vmatmul.mubr.msk.f32.gmra.mrb[32].mxu1 %vm597_vm0, %v10265_v21 }
 0x214   : > { %7189 = vmatmul.mubr.msk.f32.gmra.mrb[32].mxu0 %vm597_vm0, %v9035_v27  ;;  %6847 = vmatprep.mubr.msk.f32.mxu1 %vm597_vm0, %v10266_v35  ;;  %v3541_v27 = vsel %vm3445_vm2, %v3539_v22, %v3540_v26 }
 0x215   : > { %7191 = vmatprep.mubr.msk.f32.mxu0 %vm597_vm0, %v9038_v32  ;;  %v10290_v32 = vld [vmem:[#allocation71_spill] sm:$0xff] }
 0x217   : > { %6848 = vmatmul.mubr.msk.f32.gmra.mrb[34].mxu1 %vm597_vm0, %v10267_v19 }
 0x218   : > { %7192 = vmatmul.mubr.msk.f32.gmra.mrb[34].mxu0 %vm597_vm0, %v9051_v36  ;;  %6850 = vmatprep.mubr.msk.f32.mxu1 %vm597_vm0, %v10268_v31  ;;  %v3637_v36 = vsel %vm3445_vm2, %v3540_v26, %v3539_v22 }
 0x219   : > { %7194 = vmatprep.mubr.msk.f32.mxu0 %vm597_vm0, %v9054_v44  ;;  %v10291_v44 = vld [vmem:[#allocation72_spill] sm:$0xff] }
 0x21b   : > { %6851 = vmatmul.mubr.msk.f32.gmra.mrb[36].mxu1 %vm597_vm0, %v10269_v41 }
 0x21c   : > { %7195 = vmatmul.mubr.msk.f32.gmra.mrb[36].mxu0 %vm597_vm0, %v9067_v45  ;;  %6853 = vmatprep.mubr.msk.f32.mxu1 %vm597_vm0, %v10270_v38 }
 0x21d   : > { %7197 = vmatprep.mubr.msk.f32.mxu0 %vm597_vm0, %v9070_v49 }
 0x21f   : > { %6854 = vmatmul.mubr.msk.f32.gmra.mrb[38].mxu1 %vm597_vm0, %v10271_v23 }
 0x220   : > { %7198 = vmatmul.mubr.msk.f32.gmra.mrb[38].mxu0 %vm597_vm0, %v9083_v53  ;;  %6856 = vmatprep.mubr.msk.f32.mxu1 %vm597_vm0, %v10272_v52 }
 0x221   : > { %7200 = vmatprep.mubr.msk.f32.mxu0 %vm597_vm0, %v9086_v57 }
 0x223   : > { %6857 = vmatmul.mubr.msk.f32.gmra.mrb[40].mxu1 %vm597_vm0, %v10273_v33 }
 0x224   : > { %7201 = vmatmul.mubr.msk.f32.gmra.mrb[40].mxu0 %vm597_vm0, %v9099_v61  ;;  %6859 = vmatprep.mubr.msk.f32.mxu1 %vm597_vm0, %v10274_v39 }
 0x225   : > { %7203 = vmatprep.mubr.msk.f32.mxu0 %vm597_vm0, %v9102_v8 }
 0x227   : > { %6860 = vmatmul.mubr.msk.f32.gmra.mrb[42].mxu1 %vm597_vm0, %v10275_v42 }
 0x228   : > { %7204 = vmatmul.mubr.msk.f32.gmra.mrb[42].mxu0 %vm597_vm0, %v9115_v12  ;;  %6862 = vmatprep.mubr.msk.f32.mxu1 %vm597_vm0, %v10276_v48 }
 0x229   : > { %7206 = vmatprep.mubr.msk.f32.mxu0 %vm597_vm0, %v9118_v16 }
 0x22b   : > { %6863 = vmatmul.mubr.msk.f32.gmra.mrb[44].mxu1 %vm597_vm0, %v10277_v50 }
 0x22c   : > { %7207 = vmatmul.mubr.msk.f32.gmra.mrb[44].mxu0 %vm597_vm0, %v9131_v20  ;;  %6865 = vmatprep.mubr.msk.f32.mxu1 %vm597_vm0, %v10278_v56 }
 0x22d   : > { %7209 = vmatprep.mubr.msk.f32.mxu0 %vm597_vm0, %v9134_v28 }
 0x22f   : > { %6866 = vmatmul.mubr.msk.f32.gmra.mrb[46].mxu1 %vm597_vm0, %v10279_v58 }
 0x230   : > { %7210 = vmatmul.mubr.msk.f32.gmra.mrb[46].mxu0 %vm597_vm0, %v9147_v37  ;;  %6868 = vmatprep.mubr.msk.f32.mxu1 %vm597_vm0, %v10280_v0 }
 0x231   : > { %7212 = vmatprep.mubr.msk.f32.mxu0 %vm597_vm0, %v9150_v46 }
 0x233   : > { %6869 = vmatmul.mubr.msk.f32.gmra.mrb[48].mxu1 %vm597_vm0, %v10281_v54 }
 0x234   : > { %7213 = vmatmul.mubr.msk.f32.gmra.mrb[48].mxu0 %vm597_vm0, %v9163_v7  ;;  %6871 = vmatprep.mubr.msk.f32.mxu1 %vm597_vm0, %v10283_v4 }
 0x235   : > { %7215 = vmatprep.mubr.msk.f32.mxu0 %vm597_vm0, %v10287_v59 }
 0x237   : > { %6872 = vmatmul.mubr.msk.f32.gmra.mrb[50].mxu1 %vm597_vm0, %v10284_v29 }
 0x238   : > { %7216 = vmatmul.mubr.msk.f32.gmra.mrb[50].mxu0 %vm597_vm0, %v9177_v3  ;;  %6874 = vmatprep.mubr.msk.f32.mxu1 %vm597_vm0, %v10285_v55 }
 0x239   : > { %7218 = vmatprep.mubr.msk.f32.mxu0 %vm597_vm0, %v9412_v18 }
 0x23b   : > { %6875 = vmatmul.mubr.msk.f32.gmra.mrb[52].mxu1 %vm597_vm0, %v10286_v14 }
 0x23c   : > { %7219 = vmatmul.mubr.msk.f32.gmra.mrb[52].mxu0 %vm597_vm0, %v9423_v47  ;;  %6877 = vmatprep.mubr.msk.f32.mxu1 %vm597_vm0, %v10290_v32 }
 0x23d   : > { %7221 = vmatprep.mubr.msk.f32.mxu0 %vm597_vm0, %v3541_v27 }
 0x23f   : > { %6878 = vmatmul.mubr.msk.f32.gmra.mrb[54].mxu1 %vm597_vm0, %v10291_v44 }
 0x240   : > { %7222 = vmatmul.mubr.msk.f32.gmra.mrb[54].mxu0 %vm597_vm0, %v3637_v36 }
 0x26e   : > { %v6712_v45 = vpop.f32.mrb[0].mxu1 }
 0x26f   : > { %v2284_v49 = vpop.f32.mrb[1].mxu1 }
 0x272   : > { %v6715_v53 = vpop.f32.mrb[2].mxu1 }
 0x273   : > { %v2294_v57 = vpop.f32.mrb[3].mxu1 }
 0x276   : > { %v6718_v61 = vpop.f32.mrb[4].mxu1 }
 0x277   : > { %v2304_v8 = vpop.f32.mrb[5].mxu1 }
 0x27a   : > { %v6721_v12 = vpop.f32.mrb[6].mxu1 }
 0x27b   : > { %v2314_v16 = vpop.f32.mrb[7].mxu1 }
 0x27e   : > { %v6724_v20 = vpop.f32.mrb[8].mxu1 }
 0x27f   : > { %v2324_v28 = vpop.f32.mrb[9].mxu1 }
 0x282   : > { %v6727_v37 = vpop.f32.mrb[10].mxu1 }
 0x283   : > { %v2334_v46 = vpop.f32.mrb[11].mxu1 }
 0x286   : > { %v6730_v7 = vpop.f32.mrb[12].mxu1 }
 0x287   : > { %v2344_v3 = vpop.f32.mrb[13].mxu1 }
 0x28a   : > { %v6733_v62 = vpop.f32.mrb[14].mxu1 }
 0x28b   : > { %v2354_v2 = vpop.f32.mrb[15].mxu1 }
 0x28e   : > { %v9657_v17 = vpop.f32.mrb[16].mxu1 }
 0x28f   : > { %v9659_v18 = vpop.f32.mrb[17].mxu1 }
 0x292   : > { %v9661_v51 = vpop.f32.mrb[18].mxu1 }
 0x293   : > { %v9663_v47 = vpop.f32.mrb[19].mxu1 }
 0x296   : > { %v9665_v1 = vpop.f32.mrb[20].mxu1 }
 0x297   : > { %v9667_v40 = vpop.f32.mrb[21].mxu1 }
 0x29a   : > { %v9669_v30 = vpop.f32.mrb[22].mxu1 }
 0x29b   : > { %v9671_v34 = vpop.f32.mrb[23].mxu1 }
 0x29e   : > { %v9673_v5 = vpop.f32.mrb[24].mxu1 }
 0x29f   : > { %v9675_v9 = vpop.f32.mrb[25].mxu1 }
 0x2a2   : > { %v9677_v25 = vpop.f32.mrb[26].mxu1 }
 0x2a3   : > { %v9679_v43 = vpop.f32.mrb[27].mxu1 }
 0x2a7   : > { %v7142_v24 = vpop.f32.mrb[0].mxu0 }
 0x2a8   : > { %v7226_v21 = vadd.f32 %v7142_v24, %v6712_v45  ;;  %v4672_v35 = vpop.f32.mrb[1].mxu0 }
 0x2a9   : > { %v7227_v19 = vadd.f32 %v4672_v35, %v2284_v49 }
 0x2aa   : > { %5008 = vst.msk [vmem:[%s9683_s8 + $0x8] sm:$0xff] %vm597_vm0, %v7226_v21 }
 0x2ab   : > { %5007 = vst.msk [vmem:[%s9683_s8] sm:$0xff] %vm597_vm0, %v7227_v19  ;;  %v7145_v31 = vpop.f32.mrb[2].mxu0 }
 0x2ac   : > { %v7228_v41 = vadd.f32 %v7145_v31, %v6715_v53  ;;  %v4682_v38 = vpop.f32.mrb[3].mxu0 }
 0x2ad   : > { %v7229_v23 = vadd.f32 %v4682_v38, %v2294_v57 }
 0x2ae   : > { %5010 = vst.msk [vmem:[%s9683_s8 + $0x18] sm:$0xff] %vm597_vm0, %v7228_v41 }
 0x2af   : > { %5009 = vst.msk [vmem:[%s9683_s8 + $0x10] sm:$0xff] %vm597_vm0, %v7229_v23  ;;  %v7148_v52 = vpop.f32.mrb[4].mxu0 }
 0x2b0   : > { %v7230_v33 = vadd.f32 %v7148_v52, %v6718_v61  ;;  %v4692_v39 = vpop.f32.mrb[5].mxu0 }
 0x2b1   : > { %v7231_v42 = vadd.f32 %v4692_v39, %v2304_v8 }
 0x2b2   : > { %5012 = vst.msk [vmem:[%s9683_s8 + $0x28] sm:$0xff] %vm597_vm0, %v7230_v33 }
 0x2b3   : > { %5011 = vst.msk [vmem:[%s9683_s8 + $0x20] sm:$0xff] %vm597_vm0, %v7231_v42  ;;  %v7151_v48 = vpop.f32.mrb[6].mxu0 }
 0x2b4   : > { %v7232_v50 = vadd.f32 %v7151_v48, %v6721_v12  ;;  %v4702_v56 = vpop.f32.mrb[7].mxu0 }
 0x2b5   : > { %v7233_v58 = vadd.f32 %v4702_v56, %v2314_v16 }
 0x2b6   : > { %5014 = vst.msk [vmem:[%s9683_s8 + $0x38] sm:$0xff] %vm597_vm0, %v7232_v50 }
 0x2b7   : > { %5013 = vst.msk [vmem:[%s9683_s8 + $0x30] sm:$0xff] %vm597_vm0, %v7233_v58  ;;  %v7154_v0 = vpop.f32.mrb[8].mxu0 }
 0x2b8   : > { %v7234_v63 = vadd.f32 %v7154_v0, %v6724_v20  ;;  %v4712_v6 = vpop.f32.mrb[9].mxu0 }
 0x2b9   : > { %v7235_v54 = vadd.f32 %v4712_v6, %v2324_v28 }
 0x2ba   : > { %5016 = vst.msk [vmem:[%s9683_s8 + $0x48] sm:$0xff] %vm597_vm0, %v7234_v63 }
 0x2bb   : > { %5015 = vst.msk [vmem:[%s9683_s8 + $0x40] sm:$0xff] %vm597_vm0, %v7235_v54  ;;  %v7157_v15 = vpop.f32.mrb[10].mxu0 }
 0x2bc   : > { %v7236_v4 = vadd.f32 %v7157_v15, %v6727_v37  ;;  %v4722_v60 = vpop.f32.mrb[11].mxu0 }
 0x2bd   : > { %v7237_v29 = vadd.f32 %v4722_v60, %v2334_v46 }
 0x2be   : > { %5018 = vst.msk [vmem:[%s9683_s8 + $0x58] sm:$0xff] %vm597_vm0, %v7236_v4 }
 0x2bf   : > { %5017 = vst.msk [vmem:[%s9683_s8 + $0x50] sm:$0xff] %vm597_vm0, %v7237_v29  ;;  %v7160_v55 = vpop.f32.mrb[12].mxu0 }
 0x2c0   : > { %v7238_v13 = vadd.f32 %v7160_v55, %v6730_v7  ;;  %v4732_v14 = vpop.f32.mrb[13].mxu0 }
 0x2c1   : > { %v7239_v59 = vadd.f32 %v4732_v14, %v2344_v3 }
 0x2c2   : > { %5020 = vst.msk [vmem:[%s9683_s8 + $0x68] sm:$0xff] %vm597_vm0, %v7238_v13 }
 0x2c3   : > { %5019 = vst.msk [vmem:[%s9683_s8 + $0x60] sm:$0xff] %vm597_vm0, %v7239_v59  ;;  %v7163_v10 = vpop.f32.mrb[14].mxu0 }
 0x2c4   : > { %v7240_v22 = vadd.f32 %v7163_v10, %v6733_v62  ;;  %v4742_v11 = vpop.f32.mrb[15].mxu0 }
 0x2c5   : > { %v7241_v26 = vadd.f32 %v4742_v11, %v2354_v2 }
 0x2c6   : > { %5022 = vst.msk [vmem:[%s9683_s8 + $0x78] sm:$0xff] %vm597_vm0, %v7240_v22 }
 0x2c7   : > { %5021 = vst.msk [vmem:[%s9683_s8 + $0x70] sm:$0xff] %vm597_vm0, %v7241_v26  ;;  %v7166_v27 = vpop.f32.mrb[16].mxu0 }
 0x2c8   : > { %v7242_v32 = vadd.f32 %v7166_v27, %v9657_v17  ;;  %v4752_v36 = vpop.f32.mrb[17].mxu0 }
 0x2c9   : > { %v7243_v44 = vadd.f32 %v4752_v36, %v9659_v18 }
 0x2ca   : > { %5024 = vst.msk [vmem:[%s9683_s8 + $0x88] sm:$0xff] %vm597_vm0, %v7242_v32 }
 0x2cb   : > { %5023 = vst.msk [vmem:[%s9683_s8 + $0x80] sm:$0xff] %vm597_vm0, %v7243_v44  ;;  %v7169_v45 = vpop.f32.mrb[18].mxu0 }
 0x2cc   : > { %v7244_v49 = vadd.f32 %v7169_v45, %v9661_v51  ;;  %v4762_v53 = vpop.f32.mrb[19].mxu0 }
 0x2cd   : > { %v7245_v57 = vadd.f32 %v4762_v53, %v9663_v47 }
 0x2ce   : > { %5026 = vst.msk [vmem:[%s9683_s8 + $0x98] sm:$0xff] %vm597_vm0, %v7244_v49 }
 0x2cf   : > { %5025 = vst.msk [vmem:[%s9683_s8 + $0x90] sm:$0xff] %vm597_vm0, %v7245_v57  ;;  %v7172_v61 = vpop.f32.mrb[20].mxu0 }
 0x2d0   : > { %v7246_v8 = vadd.f32 %v7172_v61, %v9665_v1  ;;  %v4772_v12 = vpop.f32.mrb[21].mxu0 }
 0x2d1   : > { %v7247_v16 = vadd.f32 %v4772_v12, %v9667_v40 }
 0x2d2   : > { %5028 = vst.msk [vmem:[%s9683_s8 + $0xa8] sm:$0xff] %vm597_vm0, %v7246_v8 }
 0x2d3   : > { %5027 = vst.msk [vmem:[%s9683_s8 + $0xa0] sm:$0xff] %vm597_vm0, %v7247_v16  ;;  %v7175_v20 = vpop.f32.mrb[22].mxu0 }
 0x2d4   : > { %v7248_v28 = vadd.f32 %v7175_v20, %v9669_v30  ;;  %v4782_v37 = vpop.f32.mrb[23].mxu0 }
 0x2d5   : > { %v7249_v46 = vadd.f32 %v4782_v37, %v9671_v34 }
 0x2d6   : > { %5030 = vst.msk [vmem:[%s9683_s8 + $0xb8] sm:$0xff] %vm597_vm0, %v7248_v28 }
 0x2d7   : > { %5029 = vst.msk [vmem:[%s9683_s8 + $0xb0] sm:$0xff] %vm597_vm0, %v7249_v46  ;;  %v7178_v7 = vpop.f32.mrb[24].mxu0 }
 0x2d8   : > { %v7250_v3 = vadd.f32 %v7178_v7, %v9673_v5  ;;  %v4792_v62 = vpop.f32.mrb[25].mxu0 }
 0x2d9   : > { %v7251_v2 = vadd.f32 %v4792_v62, %v9675_v9 }
 0x2da   : > { %5032 = vst.msk [vmem:[%s9683_s8 + $0xc8] sm:$0xff] %vm597_vm0, %v7250_v3 }
 0x2db   : > { %5031 = vst.msk [vmem:[%s9683_s8 + $0xc0] sm:$0xff] %vm597_vm0, %v7251_v2  ;;  %v7181_v17 = vpop.f32.mrb[26].mxu0 }
 0x2dc   : > { %v7252_v18 = vadd.f32 %v7181_v17, %v9677_v25  ;;  %v4802_v51 = vpop.f32.mrb[27].mxu0 }
 0x2dd   : > { %v7253_v47 = vadd.f32 %v4802_v51, %v9679_v43 }
 0x2de   : > { %5034 = vst.msk [vmem:[%s9683_s8 + $0xd8] sm:$0xff] %vm597_vm0, %v7252_v18  ;;  %v6840_v1 = vpop.f32.mrb[28].mxu1 }
 0x2df   : > { %5033 = vst.msk [vmem:[%s9683_s8 + $0xd0] sm:$0xff] %vm597_vm0, %v7253_v47  ;;  %v7184_v40 = vpop.f32.mrb[28].mxu0  ;;  %v2837_v30 = vpop.f32.mrb[29].mxu1 }
 0x2e0   : > { %v7254_v34 = vadd.f32 %v7184_v40, %v6840_v1  ;;  %v4812_v5 = vpop.f32.mrb[29].mxu0 }
 0x2e1   : > { %v7255_v9 = vadd.f32 %v4812_v5, %v2837_v30 }
 0x2e2   : > { %5036 = vst.msk [vmem:[%s9683_s8 + $0xe8] sm:$0xff] %vm597_vm0, %v7254_v34  ;;  %v6843_v24 = vpop.f32.mrb[30].mxu1 }
 0x2e3   : > { %5035 = vst.msk [vmem:[%s9683_s8 + $0xe0] sm:$0xff] %vm597_vm0, %v7255_v9  ;;  %v7187_v25 = vpop.f32.mrb[30].mxu0  ;;  %v2847_v43 = vpop.f32.mrb[31].mxu1 }
 0x2e4   : > { %v7256_v21 = vadd.f32 %v7187_v25, %v6843_v24  ;;  %v4822_v35 = vpop.f32.mrb[31].mxu0 }
 0x2e5   : > { %v7257_v19 = vadd.f32 %v4822_v35, %v2847_v43 }
 0x2e6   : > { %5038 = vst.msk [vmem:[%s9683_s8 + $0xf8] sm:$0xff] %vm597_vm0, %v7256_v21  ;;  %v6846_v31 = vpop.f32.mrb[32].mxu1 }
 0x2e7   : > { %5037 = vst.msk [vmem:[%s9683_s8 + $0xf0] sm:$0xff] %vm597_vm0, %v7257_v19  ;;  %v7190_v41 = vpop.f32.mrb[32].mxu0  ;;  %v2857_v38 = vpop.f32.mrb[33].mxu1 }
 0x2e8   : > { %v7258_v23 = vadd.f32 %v7190_v41, %v6846_v31  ;;  %v4832_v52 = vpop.f32.mrb[33].mxu0 }
 0x2e9   : > { %v7259_v33 = vadd.f32 %v4832_v52, %v2857_v38 }
 0x2ea   : > { %5040 = vst.msk [vmem:[%s9683_s8 + $0x108] sm:$0xff] %vm597_vm0, %v7258_v23  ;;  %v6849_v39 = vpop.f32.mrb[34].mxu1 }
 0x2eb   : > { %5039 = vst.msk [vmem:[%s9683_s8 + $0x100] sm:$0xff] %vm597_vm0, %v7259_v33  ;;  %v7193_v42 = vpop.f32.mrb[34].mxu0  ;;  %v2867_v48 = vpop.f32.mrb[35].mxu1 }
 0x2ec   : > { %v7260_v50 = vadd.f32 %v7193_v42, %v6849_v39  ;;  %v4842_v56 = vpop.f32.mrb[35].mxu0 }
 0x2ed   : > { %v7261_v58 = vadd.f32 %v4842_v56, %v2867_v48  ;;  %v5213_v48 = vld [vmem:[%s9683_s8] sm:$0xff] (%p7808_p6)  ;;  %v5217_v56 = vld [vmem:[%s9683_s8 + $0x10] sm:$0xff] (%p7808_p6) }
 0x2ee   : > { %5042 = vst.msk [vmem:[%s9683_s8 + $0x118] sm:$0xff] %vm597_vm0, %v7260_v50  ;;  %v6852_v0 = vpop.f32.mrb[36].mxu1  ;;  %v5215_v50 = vld [vmem:[%s9683_s8 + $0x8] sm:$0xff] (%p7808_p6)  ;;  %5214 = vst [vmem:[%s9821_s17] sm:$0xff] (%p7808_p6), %v5213_v48 }
 0x2ef   : > { %5041 = vst.msk [vmem:[%s9683_s8 + $0x110] sm:$0xff] %vm597_vm0, %v7261_v58  ;;  %v7196_v63 = vpop.f32.mrb[36].mxu0  ;;  %v2877_v6 = vpop.f32.mrb[37].mxu1  ;;  %v5219_v58 = vld [vmem:[%s9683_s8 + $0x18] sm:$0xff] (%p7808_p6)  ;;  %5216 = vst [vmem:[%s9821_s17 + $0x8] sm:$0xff] (%p7808_p6), %v5215_v50 }
 0x2f0   : > { %v7262_v54 = vadd.f32 %v7196_v63, %v6852_v0  ;;  %v4852_v15 = vpop.f32.mrb[37].mxu0  ;;  %v5221_v0 = vld [vmem:[%s9683_s8 + $0x20] sm:$0xff] (%p7808_p6)  ;;  %v5223_v63 = vld [vmem:[%s9683_s8 + $0x28] sm:$0xff] (%p7808_p6)  ;;  %5218 = vst [vmem:[%s9821_s17 + $0x10] sm:$0xff] (%p7808_p6), %v5217_v56  ;;  %5220 = vst [vmem:[%s9821_s17 + $0x18] sm:$0xff] (%p7808_p6), %v5219_v58 }
 0x2f1   : > { %v7263_v4 = vadd.f32 %v4852_v15, %v2877_v6  ;;  %v5225_v6 = vld [vmem:[%s9683_s8 + $0x30] sm:$0xff] (%p7808_p6)  ;;  %v5229_v15 = vld [vmem:[%s9683_s8 + $0x40] sm:$0xff] (%p7808_p6)  ;;  %5222 = vst [vmem:[%s9821_s17 + $0x20] sm:$0xff] (%p7808_p6), %v5221_v0  ;;  %5224 = vst [vmem:[%s9821_s17 + $0x28] sm:$0xff] (%p7808_p6), %v5223_v63 }
 0x2f2   : > { %5044 = vst.msk [vmem:[%s9683_s8 + $0x128] sm:$0xff] %vm597_vm0, %v7262_v54  ;;  %v6855_v60 = vpop.f32.mrb[38].mxu1  ;;  %v5227_v54 = vld [vmem:[%s9683_s8 + $0x38] sm:$0xff] (%p7808_p6)  ;;  %5226 = vst [vmem:[%s9821_s17 + $0x30] sm:$0xff] (%p7808_p6), %v5225_v6 }
 0x2f3   : > { %5043 = vst.msk [vmem:[%s9683_s8 + $0x120] sm:$0xff] %vm597_vm0, %v7263_v4  ;;  %v7199_v29 = vpop.f32.mrb[38].mxu0  ;;  %v2887_v55 = vpop.f32.mrb[39].mxu1  ;;  %5228 = vst [vmem:[%s9821_s17 + $0x38] sm:$0xff] (%p7808_p6), %v5227_v54  ;;  %v5231_v4 = vld [vmem:[%s9683_s8 + $0x48] sm:$0xff] (%p7808_p6) }
 0x2f4   : > { %v7264_v13 = vadd.f32 %v7199_v29, %v6855_v60  ;;  %v4862_v14 = vpop.f32.mrb[39].mxu0  ;;  %5230 = vst [vmem:[%s9821_s17 + $0x40] sm:$0xff] (%p7808_p6), %v5229_v15  ;;  %v5233_v60 = vld [vmem:[%s9683_s8 + $0x50] sm:$0xff] (%p7808_p6)  ;;  %v5235_v29 = vld [vmem:[%s9683_s8 + $0x58] sm:$0xff] (%p7808_p6)  ;;  %5232 = vst [vmem:[%s9821_s17 + $0x48] sm:$0xff] (%p7808_p6), %v5231_v4 }
 0x2f5   : > { %v7265_v59 = vadd.f32 %v4862_v14, %v2887_v55  ;;  %5234 = vst [vmem:[%s9821_s17 + $0x50] sm:$0xff] (%p7808_p6), %v5233_v60  ;;  %5236 = vst [vmem:[%s9821_s17 + $0x58] sm:$0xff] (%p7808_p6), %v5235_v29  ;;  %v5237_v55 = vld [vmem:[%s9683_s8 + $0x60] sm:$0xff] (%p7808_p6)  ;;  %v5241_v14 = vld [vmem:[%s9683_s8 + $0x70] sm:$0xff] (%p7808_p6) }
 0x2f6   : > { %5046 = vst.msk [vmem:[%s9683_s8 + $0x138] sm:$0xff] %vm597_vm0, %v7264_v13  ;;  %v6858_v10 = vpop.f32.mrb[40].mxu1  ;;  %v5239_v13 = vld [vmem:[%s9683_s8 + $0x68] sm:$0xff] (%p7808_p6)  ;;  %5238 = vst [vmem:[%s9821_s17 + $0x60] sm:$0xff] (%p7808_p6), %v5237_v55 }
 0x2f7   : > { %5045 = vst.msk [vmem:[%s9683_s8 + $0x130] sm:$0xff] %vm597_vm0, %v7265_v59  ;;  %v7202_v22 = vpop.f32.mrb[40].mxu0  ;;  %v2897_v11 = vpop.f32.mrb[41].mxu1  ;;  %5240 = vst [vmem:[%s9821_s17 + $0x68] sm:$0xff] (%p7808_p6), %v5239_v13  ;;  %v5243_v59 = vld [vmem:[%s9683_s8 + $0x78] sm:$0xff] (%p7808_p6) }
 0x2f8   : > { %v7266_v26 = vadd.f32 %v7202_v22, %v6858_v10  ;;  %v4872_v27 = vpop.f32.mrb[41].mxu0  ;;  %5242 = vst [vmem:[%s9821_s17 + $0x70] sm:$0xff] (%p7808_p6), %v5241_v14  ;;  %v5245_v10 = vld [vmem:[%s9683_s8 + $0x80] sm:$0xff] (%p7808_p6)  ;;  %v5247_v22 = vld [vmem:[%s9683_s8 + $0x88] sm:$0xff] (%p7808_p6)  ;;  %5244 = vst [vmem:[%s9821_s17 + $0x78] sm:$0xff] (%p7808_p6), %v5243_v59 }
 0x2f9   : > { %v7267_v32 = vadd.f32 %v4872_v27, %v2897_v11  ;;  %5246 = vst [vmem:[%s9821_s17 + $0x80] sm:$0xff] (%p7808_p6), %v5245_v10  ;;  %5248 = vst [vmem:[%s9821_s17 + $0x88] sm:$0xff] (%p7808_p6), %v5247_v22  ;;  %v5249_v11 = vld [vmem:[%s9683_s8 + $0x90] sm:$0xff] (%p7808_p6)  ;;  %v5253_v27 = vld [vmem:[%s9683_s8 + $0xa0] sm:$0xff] (%p7808_p6) }
 0x2fa   : > { %5048 = vst.msk [vmem:[%s9683_s8 + $0x148] sm:$0xff] %vm597_vm0, %v7266_v26  ;;  %v6861_v36 = vpop.f32.mrb[42].mxu1  ;;  %v5251_v26 = vld [vmem:[%s9683_s8 + $0x98] sm:$0xff] (%p7808_p6)  ;;  %5250 = vst [vmem:[%s9821_s17 + $0x90] sm:$0xff] (%p7808_p6), %v5249_v11 }
 0x2fb   : > { %5047 = vst.msk [vmem:[%s9683_s8 + $0x140] sm:$0xff] %vm597_vm0, %v7267_v32  ;;  %v7205_v44 = vpop.f32.mrb[42].mxu0  ;;  %v2907_v45 = vpop.f32.mrb[43].mxu1  ;;  %5252 = vst [vmem:[%s9821_s17 + $0x98] sm:$0xff] (%p7808_p6), %v5251_v26  ;;  %v5255_v32 = vld [vmem:[%s9683_s8 + $0xa8] sm:$0xff] (%p7808_p6) }
 0x2fc   : > { %v7268_v49 = vadd.f32 %v7205_v44, %v6861_v36  ;;  %v4882_v53 = vpop.f32.mrb[43].mxu0  ;;  %5254 = vst [vmem:[%s9821_s17 + $0xa0] sm:$0xff] (%p7808_p6), %v5253_v27  ;;  %v5257_v36 = vld [vmem:[%s9683_s8 + $0xb0] sm:$0xff] (%p7808_p6)  ;;  %v5259_v44 = vld [vmem:[%s9683_s8 + $0xb8] sm:$0xff] (%p7808_p6)  ;;  %5256 = vst [vmem:[%s9821_s17 + $0xa8] sm:$0xff] (%p7808_p6), %v5255_v32 }
 0x2fd   : > { %v7269_v57 = vadd.f32 %v4882_v53, %v2907_v45  ;;  %5258 = vst [vmem:[%s9821_s17 + $0xb0] sm:$0xff] (%p7808_p6), %v5257_v36  ;;  %5260 = vst [vmem:[%s9821_s17 + $0xb8] sm:$0xff] (%p7808_p6), %v5259_v44  ;;  %v5261_v45 = vld [vmem:[%s9683_s8 + $0xc0] sm:$0xff] (%p7808_p6)  ;;  %v5265_v53 = vld [vmem:[%s9683_s8 + $0xd0] sm:$0xff] (%p7808_p6) }
 0x2fe   : > { %5050 = vst.msk [vmem:[%s9683_s8 + $0x158] sm:$0xff] %vm597_vm0, %v7268_v49  ;;  %v6864_v61 = vpop.f32.mrb[44].mxu1  ;;  %v5263_v49 = vld [vmem:[%s9683_s8 + $0xc8] sm:$0xff] (%p7808_p6)  ;;  %5262 = vst [vmem:[%s9821_s17 + $0xc0] sm:$0xff] (%p7808_p6), %v5261_v45 }
 0x2ff   : > { %5049 = vst.msk [vmem:[%s9683_s8 + $0x150] sm:$0xff] %vm597_vm0, %v7269_v57  ;;  %v7208_v8 = vpop.f32.mrb[44].mxu0  ;;  %v2917_v12 = vpop.f32.mrb[45].mxu1  ;;  %5264 = vst [vmem:[%s9821_s17 + $0xc8] sm:$0xff] (%p7808_p6), %v5263_v49  ;;  %v5267_v57 = vld [vmem:[%s9683_s8 + $0xd8] sm:$0xff] (%p7808_p6) }
 0x300   : > { %v7270_v16 = vadd.f32 %v7208_v8, %v6864_v61  ;;  %v4892_v20 = vpop.f32.mrb[45].mxu0  ;;  %5266 = vst [vmem:[%s9821_s17 + $0xd0] sm:$0xff] (%p7808_p6), %v5265_v53  ;;  %v5269_v61 = vld [vmem:[%s9683_s8 + $0xe0] sm:$0xff] (%p7808_p6)  ;;  %v5271_v8 = vld [vmem:[%s9683_s8 + $0xe8] sm:$0xff] (%p7808_p6)  ;;  %5268 = vst [vmem:[%s9821_s17 + $0xd8] sm:$0xff] (%p7808_p6), %v5267_v57 }
 0x301   : > { %v7271_v28 = vadd.f32 %v4892_v20, %v2917_v12  ;;  %5270 = vst [vmem:[%s9821_s17 + $0x540] sm:$0xff] (%p7808_p6), %v5269_v61  ;;  %5272 = vst [vmem:[%s9821_s17 + $0x548] sm:$0xff] (%p7808_p6), %v5271_v8  ;;  %v5273_v12 = vld [vmem:[%s9683_s8 + $0xf0] sm:$0xff] (%p7808_p6)  ;;  %v5277_v20 = vld [vmem:[%s9683_s8 + $0x100] sm:$0xff] (%p7808_p6) }
 0x302   : > { %5052 = vst.msk [vmem:[%s9683_s8 + $0x168] sm:$0xff] %vm597_vm0, %v7270_v16  ;;  %v6867_v37 = vpop.f32.mrb[46].mxu1  ;;  %v5275_v16 = vld [vmem:[%s9683_s8 + $0xf8] sm:$0xff] (%p7808_p6)  ;;  %5274 = vst [vmem:[%s9821_s17 + $0x550] sm:$0xff] (%p7808_p6), %v5273_v12 }
 0x303   : > { %5051 = vst.msk [vmem:[%s9683_s8 + $0x160] sm:$0xff] %vm597_vm0, %v7271_v28  ;;  %v7211_v46 = vpop.f32.mrb[46].mxu0  ;;  %v2927_v7 = vpop.f32.mrb[47].mxu1  ;;  %5276 = vst [vmem:[%s9821_s17 + $0x558] sm:$0xff] (%p7808_p6), %v5275_v16  ;;  %v5279_v28 = vld [vmem:[%s9683_s8 + $0x108] sm:$0xff] (%p7808_p6) }
 0x304   : > { %v7272_v3 = vadd.f32 %v7211_v46, %v6867_v37  ;;  %v4902_v62 = vpop.f32.mrb[47].mxu0  ;;  %5278 = vst [vmem:[%s9821_s17 + $0x560] sm:$0xff] (%p7808_p6), %v5277_v20  ;;  %v5281_v37 = vld [vmem:[%s9683_s8 + $0x110] sm:$0xff] (%p7808_p6)  ;;  %v5283_v46 = vld [vmem:[%s9683_s8 + $0x118] sm:$0xff] (%p7808_p6)  ;;  %5280 = vst [vmem:[%s9821_s17 + $0x568] sm:$0xff] (%p7808_p6), %v5279_v28 }
 0x305   : > { %v7273_v2 = vadd.f32 %v4902_v62, %v2927_v7  ;;  %5282 = vst [vmem:[%s9821_s17 + $0x570] sm:$0xff] (%p7808_p6), %v5281_v37  ;;  %5284 = vst [vmem:[%s9821_s17 + $0x578] sm:$0xff] (%p7808_p6), %v5283_v46  ;;  %v5285_v7 = vld [vmem:[%s9683_s8 + $0x120] sm:$0xff] (%p7808_p6)  ;;  %v5289_v62 = vld [vmem:[%s9683_s8 + $0x130] sm:$0xff] (%p7808_p6) }
 0x306   : > { %5054 = vst.msk [vmem:[%s9683_s8 + $0x178] sm:$0xff] %vm597_vm0, %v7272_v3  ;;  %v6870_v17 = vpop.f32.mrb[48].mxu1  ;;  %v5287_v3 = vld [vmem:[%s9683_s8 + $0x128] sm:$0xff] (%p7808_p6)  ;;  %5286 = vst [vmem:[%s9821_s17 + $0x580] sm:$0xff] (%p7808_p6), %v5285_v7 }
 0x307   : > { %5053 = vst.msk [vmem:[%s9683_s8 + $0x170] sm:$0xff] %vm597_vm0, %v7273_v2  ;;  %v7214_v18 = vpop.f32.mrb[48].mxu0  ;;  %v2937_v51 = vpop.f32.mrb[49].mxu1  ;;  %5288 = vst [vmem:[%s9821_s17 + $0x588] sm:$0xff] (%p7808_p6), %v5287_v3  ;;  %v5291_v2 = vld [vmem:[%s9683_s8 + $0x138] sm:$0xff] (%p7808_p6) }
 0x308   : > { %v7274_v47 = vadd.f32 %v7214_v18, %v6870_v17  ;;  %v4912_v1 = vpop.f32.mrb[49].mxu0  ;;  %5290 = vst [vmem:[%s9821_s17 + $0x590] sm:$0xff] (%p7808_p6), %v5289_v62  ;;  %v5293_v17 = vld [vmem:[%s9683_s8 + $0x140] sm:$0xff] (%p7808_p6)  ;;  %v5295_v18 = vld [vmem:[%s9683_s8 + $0x148] sm:$0xff] (%p7808_p6)  ;;  %5292 = vst [vmem:[%s9821_s17 + $0x598] sm:$0xff] (%p7808_p6), %v5291_v2 }
 0x309   : > { %v7275_v40 = vadd.f32 %v4912_v1, %v2937_v51  ;;  %5294 = vst [vmem:[%s9821_s17 + $0x5a0] sm:$0xff] (%p7808_p6), %v5293_v17  ;;  %5296 = vst [vmem:[%s9821_s17 + $0x5a8] sm:$0xff] (%p7808_p6), %v5295_v18  ;;  %v5297_v51 = vld [vmem:[%s9683_s8 + $0x150] sm:$0xff] (%p7808_p6) }
 0x30a   : > { %5056 = vst.msk [vmem:[%s9683_s8 + $0x188] sm:$0xff] %vm597_vm0, %v7274_v47  ;;  %v6873_v30 = vpop.f32.mrb[50].mxu1  ;;  %v5299_v47 = vld [vmem:[%s9683_s8 + $0x158] sm:$0xff] (%p7808_p6)  ;;  %v5301_v1 = vld [vmem:[%s9683_s8 + $0x160] sm:$0xff] (%p7808_p6)  ;;  %5298 = vst [vmem:[%s9821_s17 + $0x5b0] sm:$0xff] (%p7808_p6), %v5297_v51 }
 0x30b   : > { %5055 = vst.msk [vmem:[%s9683_s8 + $0x180] sm:$0xff] %vm597_vm0, %v7275_v40  ;;  %v7217_v34 = vpop.f32.mrb[50].mxu0  ;;  %v2947_v5 = vpop.f32.mrb[51].mxu1  ;;  %5300 = vst [vmem:[%s9821_s17 + $0x5b8] sm:$0xff] (%p7808_p6), %v5299_v47  ;;  %v5303_v40 = vld [vmem:[%s9683_s8 + $0x168] sm:$0xff] (%p7808_p6) }
 0x30c   : > { %v7276_v9 = vadd.f32 %v7217_v34, %v6873_v30  ;;  %v4922_v24 = vpop.f32.mrb[51].mxu0  ;;  %5302 = vst [vmem:[%s9821_s17 + $0x5c0] sm:$0xff] (%p7808_p6), %v5301_v1  ;;  %5304 = vst [vmem:[%s9821_s17 + $0x5c8] sm:$0xff] (%p7808_p6), %v5303_v40 }
 0x30d   : > { %v7277_v25 = vadd.f32 %v4922_v24, %v2947_v5  ;;  %v5307_v34 = vld [vmem:[%s9683_s8 + $0x178] sm:$0xff] (%p7808_p6) }
 0x30e   : > { %5058 = vst.msk [vmem:[%s9683_s8 + $0x198] sm:$0xff] %vm597_vm0, %v7276_v9  ;;  %v6876_v43 = vpop.f32.mrb[52].mxu1  ;;  %v5305_v30 = vld [vmem:[%s9683_s8 + $0x170] sm:$0xff] (%p7808_p6)  ;;  %5308 = vst [vmem:[%s9821_s17 + $0x5d8] sm:$0xff] (%p7808_p6), %v5307_v34 }
 0x30f   : > { %5057 = vst.msk [vmem:[%s9683_s8 + $0x190] sm:$0xff] %vm597_vm0, %v7277_v25  ;;  %v7220_v21 = vpop.f32.mrb[52].mxu0  ;;  %v2957_v35 = vpop.f32.mrb[53].mxu1  ;;  %5306 = vst [vmem:[%s9821_s17 + $0x5d0] sm:$0xff] (%p7808_p6), %v5305_v30 }
 0x310   : > { %v7278_v19 = vadd.f32 %v7220_v21, %v6876_v43  ;;  %v4932_v31 = vpop.f32.mrb[53].mxu0 }
 0x311   : > { %v7279_v41 = vadd.f32 %v4932_v31, %v2957_v35  ;;  %5069 = sbr.rel (!%p7808_p6) target bundleno = 800 (0x320), region = 70  ;;  %v5311_v9 = vld [vmem:[%s9683_s8 + $0x188] sm:$0xff] (%p7808_p6) }
 0x312   : > { %5060 = vst.msk [vmem:[%s9683_s8 + $0x1a8] sm:$0xff] %vm597_vm0, %v7278_v19  ;;  %v6879_v38 = vpop.f32.mrb[54].mxu1  ;;  %v5309_v5 = vld [vmem:[%s9683_s8 + $0x180] sm:$0xff] (%p7808_p6)  ;;  %5312 = vst [vmem:[%s9821_s17 + $0x5e8] sm:$0xff] (%p7808_p6), %v5311_v9 }
 0x313   : > { %5059 = vst.msk [vmem:[%s9683_s8 + $0x1a0] sm:$0xff] %vm597_vm0, %v7279_v41  ;;  %v7223_v23 = vpop.f32.mrb[54].mxu0  ;;  %v2967_v52 = vpop.f32.mrb[55].mxu1  ;;  %5310 = vst [vmem:[%s9821_s17 + $0x5e0] sm:$0xff] (%p7808_p6), %v5309_v5 }
 0x314   : > { %v7280_v33 = vadd.f32 %v7223_v23, %v6879_v38  ;;  %v4942_v39 = vpop.f32.mrb[55].mxu0 }
 0x315   : > { %v7281_v42 = vadd.f32 %v4942_v39, %v2967_v52  ;;  %v5315_v25 = vld [vmem:[%s9683_s8 + $0x198] sm:$0xff] (%p7808_p6) }
 0x316   : > { %5062 = vst.msk [vmem:[%s9683_s8 + $0x1b8] sm:$0xff] %vm597_vm0, %v7280_v33  ;;  %v5313_v24 = vld [vmem:[%s9683_s8 + $0x190] sm:$0xff] (%p7808_p6)  ;;  %5316 = vst [vmem:[%s9821_s17 + $0x5f8] sm:$0xff] (%p7808_p6), %v5315_v25 }
 0x317   : > { %5061 = vst.msk [vmem:[%s9683_s8 + $0x1b0] sm:$0xff] %vm597_vm0, %v7281_v42  ;;  %5314 = vst [vmem:[%s9821_s17 + $0x5f0] sm:$0xff] (%p7808_p6), %v5313_v24 }
 0x319   : > { %v5319_v21 = vld [vmem:[%s9683_s8 + $0x1a8] sm:$0xff] }
 0x31a   : > { %v5317_v43 = vld [vmem:[%s9683_s8 + $0x1a0] sm:$0xff]  ;;  %5320 = vst [vmem:[%s9821_s17 + $0x608] sm:$0xff] %v5319_v21 }
 0x31b   : > { %5318 = vst [vmem:[%s9821_s17 + $0x600] sm:$0xff] %v5317_v43 }
 0x31d   : > { %v5323_v19 = vld [vmem:[%s9683_s8 + $0x1b8] sm:$0xff] }
 0x31e   : > { %v5321_v35 = vld [vmem:[%s9683_s8 + $0x1b0] sm:$0xff]  ;;  %5324 = vst [vmem:[%s9821_s17 + $0x618] sm:$0xff] %v5323_v19 }
 0x31f   : > { %5322 = vst [vmem:[%s9821_s17 + $0x610] sm:$0xff] %v5321_v35 }
 0x320 PF: > { %s12_s13 = sadd.s32 1, %s7756_s13   ;;  %s10292_s9 = smov %s7744_s10 }
 0x321   : > { %p9_p12 = scmp.ge.s32.totalorder %s12_s13, 8   ;;  %s10293_s10 = smov %s7813_s19 }
 0x322   : > { %s10294_s11 = smov %s7752_s12  ;;  %s10295_s12 = smov %s10297_s14 }
 0x323   :  { %11 = sbr.rel (!%p9_p12) target bundleno = 3 (0x3), region = 150 }

</bundles_post_ra>
